<compile_context>
chip_gen: v7x
topology: tpu7x:2x2x1
jax: 0.10.0
libtpu: 0.0.40
codegen_flags: <defaults>
</compile_context>

<pallas_src>
import math
import numpy as np

import jax
import jax.numpy as jnp
from jax.experimental import pallas as pl
from jax.experimental.pallas import tpu as pltpu

# ----------------------------------------------------------------------------
# problem sizes (consistent with the module's __init__ signature)
# ----------------------------------------------------------------------------
BATCH = 256       # total batch for the example run
TILE_B = 128      # rows per grid step (>=2 blocks so v7x uses both TCs)
INPUT_DIM = 128   # input_dim
HIDDEN_DIM = 64   # hidden_dim
LATENT_DIM = 32   # latent_dim
assert 2 * LATENT_DIM == HIDDEN_DIM  # lets the fused-head bias share the (16, H) slab

LN_EPS = 0.1                                   # Encoder uses nn.LayerNorm(eps=0.1)
MIXTURE_WEIGHTS = (3.0 / 20.0, 3.0 / 4.0, 1.0 / 10.0)
LOG_W0 = math.log(MIXTURE_WEIGHTS[0])
LOG_W1 = math.log(MIXTURE_WEIGHTS[1])
LOG_W2 = math.log(MIXTURE_WEIGHTS[2])
LOG_2PI = math.log(2.0 * math.pi)
LOGVAR_UNIFORM = 10.0                          # logvar_uniform_prior filled with 10
# mu_prior / logvar_prior are filled with 0 -> folded into constants below.


# ----------------------------------------------------------------------------
# Pallas kernel (one batch tile per grid step)
# ----------------------------------------------------------------------------
def _composite_prior_kernel(
    x_ref,       # (TILE_B, INPUT_DIM)
    z_ref,       # (TILE_B, LATENT_DIM)
    w1_ref,      # (INPUT_DIM, H)
    wh_ref,      # (4, H, H)        fc2..fc5 stacked
    whead_ref,   # (H, 2L)          [wmu | wlv]
    small_ref,   # (16, H)  rows: b1 | bh[0:4] | ln_g[0:5] | ln_b[0:5] | bhead
    out_ref,     # (TILE_B, L)
):
    f32 = jnp.float32

    def swish(v):
        return v * jax.nn.sigmoid(v)

    def layernorm(v, gamma, beta):
        mu = jnp.mean(v, axis=-1, keepdims=True)
        var = jnp.mean((v - mu) ** 2, axis=-1, keepdims=True)
        return (v - mu) * jax.lax.rsqrt(var + LN_EPS) * gamma + beta

    small = small_ref[...]                       # (16, H) resident in a few vregs

    # --- Encoder (dropout_rate=0 -> dropout is identity) --------------------
    x = x_ref[...].astype(f32)
    x = x * jax.lax.rsqrt(jnp.sum(x * x, axis=-1, keepdims=True))

    h = layernorm(
        swish(jnp.dot(x, w1_ref[...], preferred_element_type=f32) + small[0, :]),
        small[5, :], small[10, :],
    )
    res = h                                      # h1 + ... + h_{k-1}
    for i in range(4):                           # fc2..fc5 / ln2..ln5 (unrolled)
        pre = jnp.dot(h, wh_ref[i], preferred_element_type=f32) + small[1 + i, :]
        h = layernorm(swish(pre + res), small[6 + i, :], small[11 + i, :])
        res = res + h
    h5 = h

    # fused fc_mu | fc_logvar head: one (H, 2L) matmul, then lane slices
    head = jnp.dot(h5, whead_ref[...], preferred_element_type=f32) + small[15, :]
    post_mu = head[:, :LATENT_DIM]
    post_logvar = head[:, LATENT_DIM:]

    # --- composite prior -----------------------------------------------------
    z = z_ref[...].astype(f32)
    z2 = z * z
    diff = z - post_mu

    # constant components hoisted: exp(0)=1, exp(-10) is a compile-time literal
    stnd = -0.5 * (LOG_2PI + z2) + LOG_W0
    unif = -0.5 * (LOGVAR_UNIFORM + LOG_2PI + z2 * math.exp(-LOGVAR_UNIFORM)) + LOG_W2
    post = -0.5 * (post_logvar + LOG_2PI + diff * diff * jnp.exp(-post_logvar)) + LOG_W1

    # logsumexp over the 3 mixture components
    m = jnp.maximum(jnp.maximum(stnd, post), unif)
    out = m + jnp.log(jnp.exp(stnd - m) + jnp.exp(post - m) + jnp.exp(unif - m))

    # TODO(synk): output last dim is 32 (< 128 lanes) -> masked stores; a
    # lane-dense (TILE_B/4, 128) reshape could shave a little store time.
    out_ref[...] = out.astype(out_ref.dtype)


# ----------------------------------------------------------------------------
# wrapper: batch-tiled grid, weights resident via constant index_maps
# ----------------------------------------------------------------------------
def composite_prior(x, z, packed, *, tile_b=TILE_B):
    bn = x.shape[0]
    assert bn % tile_b == 0, "batch must be a multiple of the batch tile"
    grid = (bn // tile_b,)
    return pl.pallas_call(
        _composite_prior_kernel,
        out_shape=jax.ShapeDtypeStruct((bn, LATENT_DIM), jnp.float32),
        grid_spec=pltpu.PrefetchScalarGridSpec(
            num_scalar_prefetch=0,
            grid=grid,
            in_specs=[
                pl.BlockSpec((tile_b, INPUT_DIM), lambda i: (i, 0)),          # x
                pl.BlockSpec((tile_b, LATENT_DIM), lambda i: (i, 0)),         # z
                pl.BlockSpec((INPUT_DIM, HIDDEN_DIM), lambda i: (0, 0)),      # w1
                pl.BlockSpec((4, HIDDEN_DIM, HIDDEN_DIM), lambda i: (0, 0, 0)),  # wh
                pl.BlockSpec((HIDDEN_DIM, 2 * LATENT_DIM), lambda i: (0, 0)),    # whead
                pl.BlockSpec((16, HIDDEN_DIM), lambda i: (0, 0)),                # small
            ],
            out_specs=pl.BlockSpec((tile_b, LATENT_DIM), lambda i: (i, 0)),
        ),
        compiler_params=pltpu.CompilerParams(
            dimension_semantics=("parallel",),
        ),
    )(x, z, packed["w1"], packed["wh"], packed["whead"], packed["small"])


def pack_params(p):
    """One-time packing: fuse mu/logvar heads, stack all small vectors into (16, H)."""
    whead = jnp.concatenate([p["wmu"], p["wlv"]], axis=1)            # (H, 2L)
    bhead = jnp.concatenate([p["bmu"], p["blv"]], axis=1)            # (1, 2L) == (1, H)
    small = jnp.concatenate(
        [p["b1"], p["bh"], p["ln_g"], p["ln_b"], bhead], axis=0      # (16, H)
    ).astype(jnp.float32)
    return {"w1": p["w1"], "wh": p["wh"], "whead": whead, "small": small}


# ----------------------------------------------------------------------------
# pure-JAX reference (mirrors the PyTorch forward) for a correctness check
# ----------------------------------------------------------------------------
def composite_prior_ref(x, z, p):
    def swish(v):
        return v * jax.nn.sigmoid(v)

    def ln(v, g, b):
        mu = jnp.mean(v, axis=-1, keepdims=True)
        var = jnp.mean((v - mu) ** 2, axis=-1, keepdims=True)
        return (v - mu) / jnp.sqrt(var + LN_EPS) * g + b

    xn = x / jnp.sqrt(jnp.sum(x * x, axis=-1, keepdims=True))
    h1 = ln(swish(xn @ p["w1"] + p["b1"]), p["ln_g"][0], p["ln_b"][0])
    h2 = ln(swish(h1 @ p["wh"][0] + p["bh"][0] + h1), p["ln_g"][1], p["ln_b"][1])
    h3 = ln(swish(h2 @ p["wh"][1] + p["bh"][1] + h1 + h2), p["ln_g"][2], p["ln_b"][2])
    h4 = ln(swish(h3 @ p["wh"][2] + p["bh"][2] + h1 + h2 + h3), p["ln_g"][3], p["ln_b"][3])
    h5 = ln(swish(h4 @ p["wh"][3] + p["bh"][3] + h1 + h2 + h3 + h4), p["ln_g"][4], p["ln_b"][4])
    post_mu = h5 @ p["wmu"] + p["bmu"]
    post_lv = h5 @ p["wlv"] + p["blv"]

    def lnp(zz, mu, lv):
        return -0.5 * (lv + LOG_2PI + (zz - mu) ** 2 / jnp.exp(lv))

    g0 = lnp(z, 0.0, jnp.zeros_like(z)) + math.log(MIXTURE_WEIGHTS[0])
    g1 = lnp(z, post_mu, post_lv) + math.log(MIXTURE_WEIGHTS[1])
    g2 = lnp(z, 0.0, jnp.full_like(z, LOGVAR_UNIFORM)) + math.log(MIXTURE_WEIGHTS[2])
    return jax.scipy.special.logsumexp(jnp.stack([g0, g1, g2], axis=-1), axis=-1)


# ----------------------------------------------------------------------------
# deterministic parameter / input construction
# ----------------------------------------------------------------------------
def make_params(key):
    ks = jax.random.split(key, 10)
    s = 0.05
    return {
        "w1": s * jax.random.normal(ks[0], (INPUT_DIM, HIDDEN_DIM), jnp.float32),
        "b1": s * jax.random.normal(ks[1], (1, HIDDEN_DIM), jnp.float32),
        "wh": s * jax.random.normal(ks[2], (4, HIDDEN_DIM, HIDDEN_DIM), jnp.float32),
        "bh": s * jax.random.normal(ks[3], (4, HIDDEN_DIM), jnp.float32),
        # LayerNorm defaults: gamma=1, beta=0 (perturb slightly for a nontrivial test)
        "ln_g": 1.0 + 0.01 * jax.random.normal(ks[4], (5, HIDDEN_DIM), jnp.float32),
        "ln_b": 0.01 * jax.random.normal(ks[5], (5, HIDDEN_DIM), jnp.float32),
        "wmu": s * jax.random.normal(ks[6], (HIDDEN_DIM, LATENT_DIM), jnp.float32),
        "bmu": s * jax.random.normal(ks[7], (1, LATENT_DIM), jnp.float32),
        "wlv": s * jax.random.normal(ks[8], (HIDDEN_DIM, LATENT_DIM), jnp.float32),
        "blv": s * jax.random.normal(ks[9], (1, LATENT_DIM), jnp.float32),
    }


if __name__ == "__main__":
    key = jax.random.PRNGKey(0)
    k_x, k_z, k_p = jax.random.split(key, 3)

    # x is an implicit-feedback row (non-negative, nonzero so norm > 0)
    x = jnp.abs(jax.random.normal(k_x, (BATCH, INPUT_DIM), jnp.float32)) + 0.1
    z = jax.random.normal(k_z, (BATCH, LATENT_DIM), jnp.float32)
    params = make_params(k_p)
    packed = pack_params(params)

    out = jax.block_until_ready(composite_prior(x, z, packed))

    ref = composite_prior_ref(x, z, params)
    np.testing.assert_allclose(np.asarray(out), np.asarray(ref), rtol=3e-5, atol=3e-5)

    print("KERNEL_OK")
</pallas_src>

<mosaic_0001>
module attributes {stable_mosaic.version = 11 : i64} {
  func.func @_composite_prior_kernel(%arg0: i32, %arg1: memref<128x128xf32, #tpu.memory_space<vmem>>, %arg2: memref<128x32xf32, #tpu.memory_space<vmem>>, %arg3: memref<128x64xf32, #tpu.memory_space<vmem>>, %arg4: memref<4x64x64xf32, #tpu.memory_space<vmem>>, %arg5: memref<64x64xf32, #tpu.memory_space<vmem>>, %arg6: memref<16x64xf32, #tpu.memory_space<vmem>>, %arg7: memref<128x32xf32, #tpu.memory_space<vmem>>) attributes {dimension_semantics = [#tpu.dimension_semantics<parallel>], iteration_bounds = array<i64: 2>, scalar_prefetch = 0 : i64, scratch_operands = 0 : i64, tpu.core_type = #tpu.core_type<tc>, window_params = [{transform_indices = @transform_0, window_bounds = array<i64: 128, 128>}, {transform_indices = @transform_1, window_bounds = array<i64: 128, 32>}, {pipeline_mode = #tpu.pipeline_mode<synchronous>, transform_indices = @transform_2, window_bounds = array<i64: 128, 64>}, {pipeline_mode = #tpu.pipeline_mode<synchronous>, transform_indices = @transform_3, window_bounds = array<i64: 4, 64, 64>}, {pipeline_mode = #tpu.pipeline_mode<synchronous>, transform_indices = @transform_4, window_bounds = array<i64: 64, 64>}, {pipeline_mode = #tpu.pipeline_mode<synchronous>, transform_indices = @transform_5, window_bounds = array<i64: 16, 64>}, {transform_indices = @transform_6, window_bounds = array<i64: 128, 32>}]} {
    %c0 = arith.constant 0 : index
    %c0_0 = arith.constant 0 : index
    %0 = vector.load %arg6[%c0, %c0_0] : memref<16x64xf32, #tpu.memory_space<vmem>>, vector<16x64xf32>
    %c0_1 = arith.constant 0 : index
    %c0_2 = arith.constant 0 : index
    %1 = vector.load %arg1[%c0_1, %c0_2] : memref<128x128xf32, #tpu.memory_space<vmem>>, vector<128x128xf32>
    %2 = arith.mulf %1, %1 : vector<128x128xf32>
    %cst = arith.constant dense<0.000000e+00> : vector<128xf32>
    %3 = vector.multi_reduction <add>, %2, %cst [1] : vector<128x128xf32> to vector<128xf32>
    %4 = vector.shape_cast %3 : vector<128xf32> to vector<128x1xf32>
    %5 = math.rsqrt %4 : vector<128x1xf32>
    %6 = vector.broadcast %5 : vector<128x1xf32> to vector<128x128xf32>
    %7 = arith.mulf %1, %6 : vector<128x128xf32>
    %c0_3 = arith.constant 0 : index
    %c0_4 = arith.constant 0 : index
    %8 = vector.load %arg3[%c0_3, %c0_4] : memref<128x64xf32, #tpu.memory_space<vmem>>, vector<128x64xf32>
    %cst_5 = arith.constant dense<0.000000e+00> : vector<128x64xf32>
    %9 = tpu.matmul %7, %8, %cst_5 {dimension_numbers = #tpu.dot_dimension_numbers<[1], [0], [0], [1], [0, 0, 1, 1], [], []>} : vector<128x128xf32>, vector<128x64xf32>, vector<128x64xf32> -> vector<128x64xf32>
    %10 = vector.extract_strided_slice %0 {offsets = [0, 0], sizes = [1, 64], strides = [1, 1]} : vector<16x64xf32> to vector<1x64xf32>
    %11 = vector.shape_cast %10 : vector<1x64xf32> to vector<64xf32>
    %12 = vector.shape_cast %11 : vector<64xf32> to vector<1x64xf32>
    %13 = vector.broadcast %12 : vector<1x64xf32> to vector<128x64xf32>
    %14 = arith.addf %9, %13 : vector<128x64xf32>
    %15 = arith.negf %14 : vector<128x64xf32>
    %16 = math.exp %15 : vector<128x64xf32>
    %cst_6 = arith.constant 1.000000e+00 : f32
    %17 = vector.broadcast %cst_6 : f32 to vector<128x64xf32>
    %18 = arith.addf %17, %16 : vector<128x64xf32>
    %19 = arith.divf %17, %18 : vector<128x64xf32>
    %20 = arith.mulf %14, %19 : vector<128x64xf32>
    %21 = vector.extract_strided_slice %0 {offsets = [5, 0], sizes = [1, 64], strides = [1, 1]} : vector<16x64xf32> to vector<1x64xf32>
    %22 = vector.shape_cast %21 : vector<1x64xf32> to vector<64xf32>
    %23 = vector.extract_strided_slice %0 {offsets = [10, 0], sizes = [1, 64], strides = [1, 1]} : vector<16x64xf32> to vector<1x64xf32>
    %24 = vector.shape_cast %23 : vector<1x64xf32> to vector<64xf32>
    %cst_7 = arith.constant dense<0.000000e+00> : vector<128xf32>
    %25 = vector.multi_reduction <add>, %20, %cst_7 [1] : vector<128x64xf32> to vector<128xf32>
    %26 = vector.shape_cast %25 : vector<128xf32> to vector<128x1xf32>
    %cst_8 = arith.constant 6.400000e+01 : f32
    %27 = vector.broadcast %cst_8 : f32 to vector<128x1xf32>
    %28 = arith.divf %26, %27 : vector<128x1xf32>
    %29 = vector.broadcast %28 : vector<128x1xf32> to vector<128x64xf32>
    %30 = arith.subf %20, %29 : vector<128x64xf32>
    %31 = arith.mulf %30, %30 : vector<128x64xf32>
    %cst_9 = arith.constant dense<0.000000e+00> : vector<128xf32>
    %32 = vector.multi_reduction <add>, %31, %cst_9 [1] : vector<128x64xf32> to vector<128xf32>
    %33 = vector.shape_cast %32 : vector<128xf32> to vector<128x1xf32>
    %cst_10 = arith.constant 6.400000e+01 : f32
    %34 = vector.broadcast %cst_10 : f32 to vector<128x1xf32>
    %35 = arith.divf %33, %34 : vector<128x1xf32>
    %36 = vector.broadcast %28 : vector<128x1xf32> to vector<128x64xf32>
    %37 = arith.subf %20, %36 : vector<128x64xf32>
    %cst_11 = arith.constant 1.000000e-01 : f32
    %38 = vector.broadcast %cst_11 : f32 to vector<128x1xf32>
    %39 = arith.addf %35, %38 : vector<128x1xf32>
    %40 = math.rsqrt %39 : vector<128x1xf32>
    %41 = vector.broadcast %40 : vector<128x1xf32> to vector<128x64xf32>
    %42 = arith.mulf %37, %41 : vector<128x64xf32>
    %43 = vector.shape_cast %22 : vector<64xf32> to vector<1x64xf32>
    %44 = vector.broadcast %43 : vector<1x64xf32> to vector<128x64xf32>
    %45 = arith.mulf %42, %44 : vector<128x64xf32>
    %46 = vector.shape_cast %24 : vector<64xf32> to vector<1x64xf32>
    %47 = vector.broadcast %46 : vector<1x64xf32> to vector<128x64xf32>
    %48 = arith.addf %45, %47 : vector<128x64xf32>
    %c0_12 = arith.constant 0 : index
    %c0_13 = arith.constant 0 : index
    %c0_14 = arith.constant 0 : index
    %49 = vector.load %arg4[%c0_12, %c0_13, %c0_14] : memref<4x64x64xf32, #tpu.memory_space<vmem>>, vector<1x64x64xf32>
    %50 = vector.shape_cast %49 : vector<1x64x64xf32> to vector<64x64xf32>
    %cst_15 = arith.constant dense<0.000000e+00> : vector<128x64xf32>
    %51 = tpu.matmul %48, %50, %cst_15 {dimension_numbers = #tpu.dot_dimension_numbers<[1], [0], [0], [1], [0, 0, 1, 1], [], []>} : vector<128x64xf32>, vector<64x64xf32>, vector<128x64xf32> -> vector<128x64xf32>
    %52 = vector.extract_strided_slice %0 {offsets = [1, 0], sizes = [1, 64], strides = [1, 1]} : vector<16x64xf32> to vector<1x64xf32>
    %53 = vector.shape_cast %52 : vector<1x64xf32> to vector<64xf32>
    %54 = vector.shape_cast %53 : vector<64xf32> to vector<1x64xf32>
    %55 = vector.broadcast %54 : vector<1x64xf32> to vector<128x64xf32>
    %56 = arith.addf %51, %55 : vector<128x64xf32>
    %57 = arith.addf %56, %48 : vector<128x64xf32>
    %58 = arith.negf %57 : vector<128x64xf32>
    %59 = math.exp %58 : vector<128x64xf32>
    %cst_16 = arith.constant 1.000000e+00 : f32
    %60 = vector.broadcast %cst_16 : f32 to vector<128x64xf32>
    %61 = arith.addf %60, %59 : vector<128x64xf32>
    %62 = arith.divf %60, %61 : vector<128x64xf32>
    %63 = arith.mulf %57, %62 : vector<128x64xf32>
    %64 = vector.extract_strided_slice %0 {offsets = [6, 0], sizes = [1, 64], strides = [1, 1]} : vector<16x64xf32> to vector<1x64xf32>
    %65 = vector.shape_cast %64 : vector<1x64xf32> to vector<64xf32>
    %66 = vector.extract_strided_slice %0 {offsets = [11, 0], sizes = [1, 64], strides = [1, 1]} : vector<16x64xf32> to vector<1x64xf32>
    %67 = vector.shape_cast %66 : vector<1x64xf32> to vector<64xf32>
    %cst_17 = arith.constant dense<0.000000e+00> : vector<128xf32>
    %68 = vector.multi_reduction <add>, %63, %cst_17 [1] : vector<128x64xf32> to vector<128xf32>
    %69 = vector.shape_cast %68 : vector<128xf32> to vector<128x1xf32>
    %cst_18 = arith.constant 6.400000e+01 : f32
    %70 = vector.broadcast %cst_18 : f32 to vector<128x1xf32>
    %71 = arith.divf %69, %70 : vector<128x1xf32>
    %72 = vector.broadcast %71 : vector<128x1xf32> to vector<128x64xf32>
    %73 = arith.subf %63, %72 : vector<128x64xf32>
    %74 = arith.mulf %73, %73 : vector<128x64xf32>
    %cst_19 = arith.constant dense<0.000000e+00> : vector<128xf32>
    %75 = vector.multi_reduction <add>, %74, %cst_19 [1] : vector<128x64xf32> to vector<128xf32>
    %76 = vector.shape_cast %75 : vector<128xf32> to vector<128x1xf32>
    %cst_20 = arith.constant 6.400000e+01 : f32
    %77 = vector.broadcast %cst_20 : f32 to vector<128x1xf32>
    %78 = arith.divf %76, %77 : vector<128x1xf32>
    %79 = vector.broadcast %71 : vector<128x1xf32> to vector<128x64xf32>
    %80 = arith.subf %63, %79 : vector<128x64xf32>
    %cst_21 = arith.constant 1.000000e-01 : f32
    %81 = vector.broadcast %cst_21 : f32 to vector<128x1xf32>
    %82 = arith.addf %78, %81 : vector<128x1xf32>
    %83 = math.rsqrt %82 : vector<128x1xf32>
    %84 = vector.broadcast %83 : vector<128x1xf32> to vector<128x64xf32>
    %85 = arith.mulf %80, %84 : vector<128x64xf32>
    %86 = vector.shape_cast %65 : vector<64xf32> to vector<1x64xf32>
    %87 = vector.broadcast %86 : vector<1x64xf32> to vector<128x64xf32>
    %88 = arith.mulf %85, %87 : vector<128x64xf32>
    %89 = vector.shape_cast %67 : vector<64xf32> to vector<1x64xf32>
    %90 = vector.broadcast %89 : vector<1x64xf32> to vector<128x64xf32>
    %91 = arith.addf %88, %90 : vector<128x64xf32>
    %92 = arith.addf %48, %91 : vector<128x64xf32>
    %c1 = arith.constant 1 : index
    %c0_22 = arith.constant 0 : index
    %c0_23 = arith.constant 0 : index
    %93 = vector.load %arg4[%c1, %c0_22, %c0_23] : memref<4x64x64xf32, #tpu.memory_space<vmem>>, vector<1x64x64xf32>
    %94 = vector.shape_cast %93 : vector<1x64x64xf32> to vector<64x64xf32>
    %cst_24 = arith.constant dense<0.000000e+00> : vector<128x64xf32>
    %95 = tpu.matmul %91, %94, %cst_24 {dimension_numbers = #tpu.dot_dimension_numbers<[1], [0], [0], [1], [0, 0, 1, 1], [], []>} : vector<128x64xf32>, vector<64x64xf32>, vector<128x64xf32> -> vector<128x64xf32>
    %96 = vector.extract_strided_slice %0 {offsets = [2, 0], sizes = [1, 64], strides = [1, 1]} : vector<16x64xf32> to vector<1x64xf32>
    %97 = vector.shape_cast %96 : vector<1x64xf32> to vector<64xf32>
    %98 = vector.shape_cast %97 : vector<64xf32> to vector<1x64xf32>
    %99 = vector.broadcast %98 : vector<1x64xf32> to vector<128x64xf32>
    %100 = arith.addf %95, %99 : vector<128x64xf32>
    %101 = arith.addf %100, %92 : vector<128x64xf32>
    %102 = arith.negf %101 : vector<128x64xf32>
    %103 = math.exp %102 : vector<128x64xf32>
    %cst_25 = arith.constant 1.000000e+00 : f32
    %104 = vector.broadcast %cst_25 : f32 to vector<128x64xf32>
    %105 = arith.addf %104, %103 : vector<128x64xf32>
    %106 = arith.divf %104, %105 : vector<128x64xf32>
    %107 = arith.mulf %101, %106 : vector<128x64xf32>
    %108 = vector.extract_strided_slice %0 {offsets = [7, 0], sizes = [1, 64], strides = [1, 1]} : vector<16x64xf32> to vector<1x64xf32>
    %109 = vector.shape_cast %108 : vector<1x64xf32> to vector<64xf32>
    %110 = vector.extract_strided_slice %0 {offsets = [12, 0], sizes = [1, 64], strides = [1, 1]} : vector<16x64xf32> to vector<1x64xf32>
    %111 = vector.shape_cast %110 : vector<1x64xf32> to vector<64xf32>
    %cst_26 = arith.constant dense<0.000000e+00> : vector<128xf32>
    %112 = vector.multi_reduction <add>, %107, %cst_26 [1] : vector<128x64xf32> to vector<128xf32>
    %113 = vector.shape_cast %112 : vector<128xf32> to vector<128x1xf32>
    %cst_27 = arith.constant 6.400000e+01 : f32
    %114 = vector.broadcast %cst_27 : f32 to vector<128x1xf32>
    %115 = arith.divf %113, %114 : vector<128x1xf32>
    %116 = vector.broadcast %115 : vector<128x1xf32> to vector<128x64xf32>
    %117 = arith.subf %107, %116 : vector<128x64xf32>
    %118 = arith.mulf %117, %117 : vector<128x64xf32>
    %cst_28 = arith.constant dense<0.000000e+00> : vector<128xf32>
    %119 = vector.multi_reduction <add>, %118, %cst_28 [1] : vector<128x64xf32> to vector<128xf32>
    %120 = vector.shape_cast %119 : vector<128xf32> to vector<128x1xf32>
    %cst_29 = arith.constant 6.400000e+01 : f32
    %121 = vector.broadcast %cst_29 : f32 to vector<128x1xf32>
    %122 = arith.divf %120, %121 : vector<128x1xf32>
    %123 = vector.broadcast %115 : vector<128x1xf32> to vector<128x64xf32>
    %124 = arith.subf %107, %123 : vector<128x64xf32>
    %cst_30 = arith.constant 1.000000e-01 : f32
    %125 = vector.broadcast %cst_30 : f32 to vector<128x1xf32>
    %126 = arith.addf %122, %125 : vector<128x1xf32>
    %127 = math.rsqrt %126 : vector<128x1xf32>
    %128 = vector.broadcast %127 : vector<128x1xf32> to vector<128x64xf32>
    %129 = arith.mulf %124, %128 : vector<128x64xf32>
    %130 = vector.shape_cast %109 : vector<64xf32> to vector<1x64xf32>
    %131 = vector.broadcast %130 : vector<1x64xf32> to vector<128x64xf32>
    %132 = arith.mulf %129, %131 : vector<128x64xf32>
    %133 = vector.shape_cast %111 : vector<64xf32> to vector<1x64xf32>
    %134 = vector.broadcast %133 : vector<1x64xf32> to vector<128x64xf32>
    %135 = arith.addf %132, %134 : vector<128x64xf32>
    %136 = arith.addf %92, %135 : vector<128x64xf32>
    %c2 = arith.constant 2 : index
    %c0_31 = arith.constant 0 : index
    %c0_32 = arith.constant 0 : index
    %137 = vector.load %arg4[%c2, %c0_31, %c0_32] : memref<4x64x64xf32, #tpu.memory_space<vmem>>, vector<1x64x64xf32>
    %138 = vector.shape_cast %137 : vector<1x64x64xf32> to vector<64x64xf32>
    %cst_33 = arith.constant dense<0.000000e+00> : vector<128x64xf32>
    %139 = tpu.matmul %135, %138, %cst_33 {dimension_numbers = #tpu.dot_dimension_numbers<[1], [0], [0], [1], [0, 0, 1, 1], [], []>} : vector<128x64xf32>, vector<64x64xf32>, vector<128x64xf32> -> vector<128x64xf32>
    %140 = vector.extract_strided_slice %0 {offsets = [3, 0], sizes = [1, 64], strides = [1, 1]} : vector<16x64xf32> to vector<1x64xf32>
    %141 = vector.shape_cast %140 : vector<1x64xf32> to vector<64xf32>
    %142 = vector.shape_cast %141 : vector<64xf32> to vector<1x64xf32>
    %143 = vector.broadcast %142 : vector<1x64xf32> to vector<128x64xf32>
    %144 = arith.addf %139, %143 : vector<128x64xf32>
    %145 = arith.addf %144, %136 : vector<128x64xf32>
    %146 = arith.negf %145 : vector<128x64xf32>
    %147 = math.exp %146 : vector<128x64xf32>
    %cst_34 = arith.constant 1.000000e+00 : f32
    %148 = vector.broadcast %cst_34 : f32 to vector<128x64xf32>
    %149 = arith.addf %148, %147 : vector<128x64xf32>
    %150 = arith.divf %148, %149 : vector<128x64xf32>
    %151 = arith.mulf %145, %150 : vector<128x64xf32>
    %152 = vector.extract_strided_slice %0 {offsets = [8, 0], sizes = [1, 64], strides = [1, 1]} : vector<16x64xf32> to vector<1x64xf32>
    %153 = vector.shape_cast %152 : vector<1x64xf32> to vector<64xf32>
    %154 = vector.extract_strided_slice %0 {offsets = [13, 0], sizes = [1, 64], strides = [1, 1]} : vector<16x64xf32> to vector<1x64xf32>
    %155 = vector.shape_cast %154 : vector<1x64xf32> to vector<64xf32>
    %cst_35 = arith.constant dense<0.000000e+00> : vector<128xf32>
    %156 = vector.multi_reduction <add>, %151, %cst_35 [1] : vector<128x64xf32> to vector<128xf32>
    %157 = vector.shape_cast %156 : vector<128xf32> to vector<128x1xf32>
    %cst_36 = arith.constant 6.400000e+01 : f32
    %158 = vector.broadcast %cst_36 : f32 to vector<128x1xf32>
    %159 = arith.divf %157, %158 : vector<128x1xf32>
    %160 = vector.broadcast %159 : vector<128x1xf32> to vector<128x64xf32>
    %161 = arith.subf %151, %160 : vector<128x64xf32>
    %162 = arith.mulf %161, %161 : vector<128x64xf32>
    %cst_37 = arith.constant dense<0.000000e+00> : vector<128xf32>
    %163 = vector.multi_reduction <add>, %162, %cst_37 [1] : vector<128x64xf32> to vector<128xf32>
    %164 = vector.shape_cast %163 : vector<128xf32> to vector<128x1xf32>
    %cst_38 = arith.constant 6.400000e+01 : f32
    %165 = vector.broadcast %cst_38 : f32 to vector<128x1xf32>
    %166 = arith.divf %164, %165 : vector<128x1xf32>
    %167 = vector.broadcast %159 : vector<128x1xf32> to vector<128x64xf32>
    %168 = arith.subf %151, %167 : vector<128x64xf32>
    %cst_39 = arith.constant 1.000000e-01 : f32
    %169 = vector.broadcast %cst_39 : f32 to vector<128x1xf32>
    %170 = arith.addf %166, %169 : vector<128x1xf32>
    %171 = math.rsqrt %170 : vector<128x1xf32>
    %172 = vector.broadcast %171 : vector<128x1xf32> to vector<128x64xf32>
    %173 = arith.mulf %168, %172 : vector<128x64xf32>
    %174 = vector.shape_cast %153 : vector<64xf32> to vector<1x64xf32>
    %175 = vector.broadcast %174 : vector<1x64xf32> to vector<128x64xf32>
    %176 = arith.mulf %173, %175 : vector<128x64xf32>
    %177 = vector.shape_cast %155 : vector<64xf32> to vector<1x64xf32>
    %178 = vector.broadcast %177 : vector<1x64xf32> to vector<128x64xf32>
    %179 = arith.addf %176, %178 : vector<128x64xf32>
    %180 = arith.addf %136, %179 : vector<128x64xf32>
    %c3 = arith.constant 3 : index
    %c0_40 = arith.constant 0 : index
    %c0_41 = arith.constant 0 : index
    %181 = vector.load %arg4[%c3, %c0_40, %c0_41] : memref<4x64x64xf32, #tpu.memory_space<vmem>>, vector<1x64x64xf32>
    %182 = vector.shape_cast %181 : vector<1x64x64xf32> to vector<64x64xf32>
    %cst_42 = arith.constant dense<0.000000e+00> : vector<128x64xf32>
    %183 = tpu.matmul %179, %182, %cst_42 {dimension_numbers = #tpu.dot_dimension_numbers<[1], [0], [0], [1], [0, 0, 1, 1], [], []>} : vector<128x64xf32>, vector<64x64xf32>, vector<128x64xf32> -> vector<128x64xf32>
    %184 = vector.extract_strided_slice %0 {offsets = [4, 0], sizes = [1, 64], strides = [1, 1]} : vector<16x64xf32> to vector<1x64xf32>
    %185 = vector.shape_cast %184 : vector<1x64xf32> to vector<64xf32>
    %186 = vector.shape_cast %185 : vector<64xf32> to vector<1x64xf32>
    %187 = vector.broadcast %186 : vector<1x64xf32> to vector<128x64xf32>
    %188 = arith.addf %183, %187 : vector<128x64xf32>
    %189 = arith.addf %188, %180 : vector<128x64xf32>
    %190 = arith.negf %189 : vector<128x64xf32>
    %191 = math.exp %190 : vector<128x64xf32>
    %cst_43 = arith.constant 1.000000e+00 : f32
    %192 = vector.broadcast %cst_43 : f32 to vector<128x64xf32>
    %193 = arith.addf %192, %191 : vector<128x64xf32>
    %194 = arith.divf %192, %193 : vector<128x64xf32>
    %195 = arith.mulf %189, %194 : vector<128x64xf32>
    %196 = vector.extract_strided_slice %0 {offsets = [9, 0], sizes = [1, 64], strides = [1, 1]} : vector<16x64xf32> to vector<1x64xf32>
    %197 = vector.shape_cast %196 : vector<1x64xf32> to vector<64xf32>
    %198 = vector.extract_strided_slice %0 {offsets = [14, 0], sizes = [1, 64], strides = [1, 1]} : vector<16x64xf32> to vector<1x64xf32>
    %199 = vector.shape_cast %198 : vector<1x64xf32> to vector<64xf32>
    %cst_44 = arith.constant dense<0.000000e+00> : vector<128xf32>
    %200 = vector.multi_reduction <add>, %195, %cst_44 [1] : vector<128x64xf32> to vector<128xf32>
    %201 = vector.shape_cast %200 : vector<128xf32> to vector<128x1xf32>
    %cst_45 = arith.constant 6.400000e+01 : f32
    %202 = vector.broadcast %cst_45 : f32 to vector<128x1xf32>
    %203 = arith.divf %201, %202 : vector<128x1xf32>
    %204 = vector.broadcast %203 : vector<128x1xf32> to vector<128x64xf32>
    %205 = arith.subf %195, %204 : vector<128x64xf32>
    %206 = arith.mulf %205, %205 : vector<128x64xf32>
    %cst_46 = arith.constant dense<0.000000e+00> : vector<128xf32>
    %207 = vector.multi_reduction <add>, %206, %cst_46 [1] : vector<128x64xf32> to vector<128xf32>
    %208 = vector.shape_cast %207 : vector<128xf32> to vector<128x1xf32>
    %cst_47 = arith.constant 6.400000e+01 : f32
    %209 = vector.broadcast %cst_47 : f32 to vector<128x1xf32>
    %210 = arith.divf %208, %209 : vector<128x1xf32>
    %211 = vector.broadcast %203 : vector<128x1xf32> to vector<128x64xf32>
    %212 = arith.subf %195, %211 : vector<128x64xf32>
    %cst_48 = arith.constant 1.000000e-01 : f32
    %213 = vector.broadcast %cst_48 : f32 to vector<128x1xf32>
    %214 = arith.addf %210, %213 : vector<128x1xf32>
    %215 = math.rsqrt %214 : vector<128x1xf32>
    %216 = vector.broadcast %215 : vector<128x1xf32> to vector<128x64xf32>
    %217 = arith.mulf %212, %216 : vector<128x64xf32>
    %218 = vector.shape_cast %197 : vector<64xf32> to vector<1x64xf32>
    %219 = vector.broadcast %218 : vector<1x64xf32> to vector<128x64xf32>
    %220 = arith.mulf %217, %219 : vector<128x64xf32>
    %221 = vector.shape_cast %199 : vector<64xf32> to vector<1x64xf32>
    %222 = vector.broadcast %221 : vector<1x64xf32> to vector<128x64xf32>
    %223 = arith.addf %220, %222 : vector<128x64xf32>
    %c0_49 = arith.constant 0 : index
    %c0_50 = arith.constant 0 : index
    %224 = vector.load %arg5[%c0_49, %c0_50] : memref<64x64xf32, #tpu.memory_space<vmem>>, vector<64x64xf32>
    %cst_51 = arith.constant dense<0.000000e+00> : vector<128x64xf32>
    %225 = tpu.matmul %223, %224, %cst_51 {dimension_numbers = #tpu.dot_dimension_numbers<[1], [0], [0], [1], [0, 0, 1, 1], [], []>} : vector<128x64xf32>, vector<64x64xf32>, vector<128x64xf32> -> vector<128x64xf32>
    %226 = vector.extract_strided_slice %0 {offsets = [15, 0], sizes = [1, 64], strides = [1, 1]} : vector<16x64xf32> to vector<1x64xf32>
    %227 = vector.shape_cast %226 : vector<1x64xf32> to vector<64xf32>
    %228 = vector.shape_cast %227 : vector<64xf32> to vector<1x64xf32>
    %229 = vector.broadcast %228 : vector<1x64xf32> to vector<128x64xf32>
    %230 = arith.addf %225, %229 : vector<128x64xf32>
    %231 = vector.extract_strided_slice %230 {offsets = [0, 0], sizes = [128, 32], strides = [1, 1]} : vector<128x64xf32> to vector<128x32xf32>
    %232 = vector.extract_strided_slice %230 {offsets = [0, 32], sizes = [128, 32], strides = [1, 1]} : vector<128x64xf32> to vector<128x32xf32>
    %c0_52 = arith.constant 0 : index
    %c0_53 = arith.constant 0 : index
    %233 = vector.load %arg2[%c0_52, %c0_53] : memref<128x32xf32, #tpu.memory_space<vmem>>, vector<128x32xf32>
    %234 = arith.mulf %233, %233 : vector<128x32xf32>
    %235 = arith.subf %233, %231 : vector<128x32xf32>
    %cst_54 = arith.constant 1.83787704 : f32
    %236 = vector.broadcast %cst_54 : f32 to vector<128x32xf32>
    %237 = arith.addf %236, %234 : vector<128x32xf32>
    %cst_55 = arith.constant -5.000000e-01 : f32
    %238 = vector.broadcast %cst_55 : f32 to vector<128x32xf32>
    %239 = arith.mulf %238, %237 : vector<128x32xf32>
    %cst_56 = arith.constant -1.897120e+00 : f32
    %240 = vector.broadcast %cst_56 : f32 to vector<128x32xf32>
    %241 = arith.addf %239, %240 : vector<128x32xf32>
    %cst_57 = arith.constant 4.5399931E-5 : f32
    %242 = vector.broadcast %cst_57 : f32 to vector<128x32xf32>
    %243 = arith.mulf %234, %242 : vector<128x32xf32>
    %cst_58 = arith.constant 11.8378773 : f32
    %244 = vector.broadcast %cst_58 : f32 to vector<128x32xf32>
    %245 = arith.addf %244, %243 : vector<128x32xf32>
    %cst_59 = arith.constant -5.000000e-01 : f32
    %246 = vector.broadcast %cst_59 : f32 to vector<128x32xf32>
    %247 = arith.mulf %246, %245 : vector<128x32xf32>
    %cst_60 = arith.constant -2.30258512 : f32
    %248 = vector.broadcast %cst_60 : f32 to vector<128x32xf32>
    %249 = arith.addf %247, %248 : vector<128x32xf32>
    %cst_61 = arith.constant 1.83787704 : f32
    %250 = vector.broadcast %cst_61 : f32 to vector<128x32xf32>
    %251 = arith.addf %232, %250 : vector<128x32xf32>
    %252 = arith.mulf %235, %235 : vector<128x32xf32>
    %cst_62 = arith.constant 0.000000e+00 : f32
    %253 = vector.broadcast %cst_62 : f32 to vector<128x32xf32>
    %254 = arith.subf %253, %232 : vector<128x32xf32>
    %255 = math.exp %254 : vector<128x32xf32>
    %256 = arith.mulf %252, %255 : vector<128x32xf32>
    %257 = arith.addf %251, %256 : vector<128x32xf32>
    %cst_63 = arith.constant -5.000000e-01 : f32
    %258 = vector.broadcast %cst_63 : f32 to vector<128x32xf32>
    %259 = arith.mulf %258, %257 : vector<128x32xf32>
    %cst_64 = arith.constant -0.287682086 : f32
    %260 = vector.broadcast %cst_64 : f32 to vector<128x32xf32>
    %261 = arith.addf %259, %260 : vector<128x32xf32>
    %262 = arith.maximumf %241, %261 : vector<128x32xf32>
    %263 = arith.maximumf %262, %249 : vector<128x32xf32>
    %264 = arith.subf %241, %263 : vector<128x32xf32>
    %265 = math.exp %264 : vector<128x32xf32>
    %266 = arith.subf %261, %263 : vector<128x32xf32>
    %267 = math.exp %266 : vector<128x32xf32>
    %268 = arith.addf %265, %267 : vector<128x32xf32>
    %269 = arith.subf %249, %263 : vector<128x32xf32>
    %270 = math.exp %269 : vector<128x32xf32>
    %271 = arith.addf %268, %270 : vector<128x32xf32>
    %272 = math.log %271 : vector<128x32xf32>
    %273 = arith.addf %263, %272 : vector<128x32xf32>
    %c0_65 = arith.constant 0 : index
    %c0_66 = arith.constant 0 : index
    %274 = vector.load %arg7[%c0_65, %c0_66] : memref<128x32xf32, #tpu.memory_space<vmem>>, vector<128x32xf32>
    tpu.vector_store %arg7[%c0_65, %c0_66], %273 {strides = array<i32>} : memref<128x32xf32, #tpu.memory_space<vmem>>, vector<128x32xf32>,
    return
  }
  func.func @transform_0(%arg0: i32) -> (i32, i32) {
    %c0_i32 = arith.constant 0 : i32
    %c0_i32_0 = arith.constant 0 : i32
    return %arg0, %c0_i32 : i32, i32
  }
  func.func @transform_1(%arg0: i32) -> (i32, i32) {
    %c0_i32 = arith.constant 0 : i32
    %c0_i32_0 = arith.constant 0 : i32
    return %arg0, %c0_i32 : i32, i32
  }
  func.func @transform_2(%arg0: i32) -> (i32, i32) {
    %c0_i32 = arith.constant 0 : i32
    %c0_i32_0 = arith.constant 0 : i32
    %c0_i32_1 = arith.constant 0 : i32
    return %c0_i32, %c0_i32_0 : i32, i32
  }
  func.func @transform_3(%arg0: i32) -> (i32, i32, i32) {
    %c0_i32 = arith.constant 0 : i32
    %c0_i32_0 = arith.constant 0 : i32
    %c0_i32_1 = arith.constant 0 : i32
    %c0_i32_2 = arith.constant 0 : i32
    return %c0_i32, %c0_i32_0, %c0_i32_1 : i32, i32, i32
  }
  func.func @transform_4(%arg0: i32) -> (i32, i32) {
    %c0_i32 = arith.constant 0 : i32
    %c0_i32_0 = arith.constant 0 : i32
    %c0_i32_1 = arith.constant 0 : i32
    return %c0_i32, %c0_i32_0 : i32, i32
  }
  func.func @transform_5(%arg0: i32) -> (i32, i32) {
    %c0_i32 = arith.constant 0 : i32
    %c0_i32_0 = arith.constant 0 : i32
    %c0_i32_1 = arith.constant 0 : i32
    return %c0_i32, %c0_i32_0 : i32, i32
  }
  func.func @transform_6(%arg0: i32) -> (i32, i32) {
    %c0_i32 = arith.constant 0 : i32
    %c0_i32_0 = arith.constant 0 : i32
    return %arg0, %c0_i32 : i32, i32
  }
}

</mosaic_0001>

<bundles_post_ra>
// kernel: tpu_custom_call.1
= control target key start
LH: loop header
LB: loop body
LE: loop exit
PB: predicated region body
PF: predicated region fallthrough
CT: control target
= control target key end

     0   :  { %11 = vsyncpa [#allocation3], 0  ;;  %s9014_s0 = inlined_call_operand.vmem [shape: f32[256,128], index: 0, kind: input, shape index: {}]   ;;  %s9015_s1 = inlined_call_operand.vmem [shape: f32[256,32], index: 1, kind: input, shape index: {}]   ;;  %s9016_s2 = inlined_call_operand.vmem [shape: f32[128,64], index: 2, kind: input, shape index: {}]   ;;  %s9017_s3 = inlined_call_operand.vmem [shape: f32[4,64,64], index: 3, kind: input, shape index: {}]   ;;  %s9018_s4 = inlined_call_operand.hbm [shape: f32[64,64], index: 4, kind: input, shape index: {}]   ;;  %s9019_s5 = inlined_call_operand.hbm [shape: f32[16,64], index: 5, kind: input, shape index: {}]   ;;  %s9020_s6 = inlined_call_operand.vmem [shape: f32[256,32], index: 6, kind: output, shape index: {}]  }
   0x1   :  { %12 = vsyncpa [#allocation5], 0  ;;  %s6050_s21 = smov 0  }
   0x2 LB: > { %s4499_s22 = sadd.s32 4294967295, %s6007_s21   ;;  %p4501_p0 = scmp.ge.s32.totalorder %s6007_s21, 1  ;;  %s6007_s21 = sphi %s6050_s21, %s18_s21  }
   0x3   : > { %p185_p1 = scmp.lt.s32.totalorder %s6007_s21, 3  ;;  %s6009_s23 = smov [#allocation2]  }
   0x4   : > { %s203_s24 = sshll.u32 %s6009_s23, 4  ;;  %p6064_p3 = scmp.eq.s32.totalorder %s4499_s22, 0  ;;  %s204_s24 = int_to_ptr.vmem [resolvable:$true] %s203_s24 }
   0x5   : > { %p6058_p2 = pnand %p4501_p0, %p185_p1  ;;  %s6010_s27 = smov [#allocation4]  }
   0x6   : > { %s9041_s26 = scalar_select %p6064_p3, 1, 0 }
   0x7   : > { %s9040_s25 = scalar_select %p6058_p2, 1, 0 }
   0x8   : > { %p5236_p4 = pneg %p6058_p2  ;;  %s216_s28 = sshll.u32 %s6010_s27, 4  ;;  %s6076_s28 = int_to_ptr.vmem [resolvable:$true] %s216_s28 }
   0x9   : > { %s5937_s8 = scalar_lea.hbm %s9018_s4, 1024 }
   0xa   : > { %p6072_p5 = pnand %p6064_p3, %p5236_p4  ;;  %p5938_p6 = scmp.ne.s32.totalorder %s9018_s4, %s5937_s8 }
   0xb   : > { %p5944_p10 = scmp.lt.u32.totalorder %s5937_s8, %s9018_s4 }
   0xc   : > { %p5939_p7 = pneg %p6072_p5 }
   0xe   : > { %p5940_p8 = pnand %p5939_p7, %p5938_p6 }
  0x10   : > { %p5941_p9 = pneg %p5940_p8 }
  0x12   : > { %p5946_p11 = pnand %p5944_p10, %p5941_p9 }
  0x14   : > { %5949 = shalt.err (!%p5946_p11)
}
  0x15   : > { %s5950_s13 = scalar_lea.vmem %s204_s24, 1024  ;;  %p5958_p1 = scmp.lt.s32.totalorder %s204_s24, %s204_s24 }
  0x16   : > { %p5951_p12 = scmp.ne.s32.totalorder %s204_s24, %s5950_s13  ;;  %p5959_p4 = scmp.lt.s32.totalorder %s5950_s13, %s5950_s13 }
  0x18   : > { %p5953_p13 = pnand %p5951_p12, %p5939_p7  ;;  %p5960_p3 = por %p5959_p4, %p5958_p1 }
  0x1a   : > { %p5954_p0 = pneg %p5953_p13 }
  0x1c   : > { %p5961_p2 = pnand %p5960_p3, %p5954_p0 }
  0x1e   : > { %5964 = shalt.err (!%p5961_p2)
}
  0x1f   : > { %s6011_s14 = smov 128   ;;  %s6012_s15 = smov 8  }
  0x20   : > { %5239 = dma.hbm_to_vmem [thread:$0]  (!%p6072_p5), %s9018_s4, 1024, %s204_s24, [#allocation3], %s6011_s14, %s6011_s14, %s6012_s15  }
  0x21   : > { %s5965_s20 = scalar_lea.hbm %s9019_s5, 256 }
  0x22   : > { %p5966_p6 = scmp.ne.s32.totalorder %s9019_s5, %s5965_s20  ;;  %p5972_p8 = scmp.lt.u32.totalorder %s5965_s20, %s9019_s5 }
  0x24   : > { %p5968_p2 = pnand %p5966_p6, %p5939_p7 }
  0x26   : > { %p5969_p3 = pneg %p5968_p2 }
  0x28   : > { %p5974_p9 = pnand %p5972_p8, %p5969_p3 }
  0x2a   : > { %5977 = shalt.err (!%p5974_p9)
}
  0x2b   : > { %s5978_s24 = scalar_lea.vmem %s6076_s28, 256  ;;  %p5986_p13 = scmp.lt.s32.totalorder %s6076_s28, %s6076_s28 }
  0x2c   : > { %p5979_p10 = scmp.ne.s32.totalorder %s6076_s28, %s5978_s24  ;;  %p5987_p0 = scmp.lt.s32.totalorder %s5978_s24, %s5978_s24 }
  0x2e   : > { %p5981_p11 = pnand %p5979_p10, %p5939_p7  ;;  %p5988_p1 = por %p5987_p0, %p5986_p13 }
  0x30   : > { %p5982_p12 = pneg %p5981_p11 }
  0x32   : > { %p5989_p4 = pnand %p5988_p1, %p5982_p12 }
  0x34   : > { %5992 = shalt.err (!%p5989_p4)
}
  0x35   : > { %5242 = dma.hbm_to_vmem [thread:$0]  (!%p6072_p5), %s9019_s5, 256, %s6076_s28, [#allocation5], %s6011_s14, %s6011_s14, %s6012_s15  }
  0x36   : > { %p9043_p6 = scmp.ne.s32.totalorder %s9040_s25, 0 }
  0x38   : > { %250 = sbr.rel (%p9043_p6) target bundleno = 3921 (0xf51), region = 44 }
  0x3f   : > { %p9044_p2 = scmp.ne.s32.totalorder %s9041_s26, 0 }
  0x41   : > { %5998 = dma.done.wait (%p9044_p2), [#allocation3], 1024  }
  0x42   : > { %6000 = vsyncadd (%p9044_p2), [#allocation3], 4294966272 }
  0x43   : > { %6002 = dma.done.wait (%p9044_p2), [#allocation5], 256  }
  0x44   : > { %6004 = vsyncadd (%p9044_p2), [#allocation5], 4294967040  ;;  %s4508_s29 = sshll.u32 %s4499_s22, 4  ;;  %v405_v10 = vld [vmem:[%s9016_s2] sm:$0xff]  ;;  %v406_v11 = vld [vmem:[%s9016_s2 + $0x8] sm:$0xff]  ;;  %vm682_vm0 = vcmask 523264  }
  0x45   : > { %p290_p7 = scmp.lt.s32.totalorder %s4508_s29, 31  ;;  %v5108_v12 = vpack.c.bf16 %v406_v11, %v405_v10  ;;  %v407_v13 = vld [vmem:[%s9016_s2 + $0x10] sm:$0xff]  ;;  %v408_v14 = vld [vmem:[%s9016_s2 + $0x18] sm:$0xff]  ;;  %v409_v18 = vld [vmem:[%s9016_s2 + $0x20] sm:$0xff]  ;;  %s6013_s19 = smov 96   ;;  %vm4392_vm1 = vcmask 261120  }
  0x46   : > { %v5112_v17 = vpack.c.bf16 %v408_v14, %v407_v13  ;;  %v410_v19 = vld [vmem:[%s9016_s2 + $0x28] sm:$0xff]  ;;  %v411_v25 = vld [vmem:[%s9016_s2 + $0x30] sm:$0xff]  ;;  %v412_v26 = vld [vmem:[%s9016_s2 + $0x38] sm:$0xff]  ;;  %s6014_s27 = smov 32  }
  0x47   : > { %s9072_s29 = smov (!%p290_p7, %s4508_s29), 31  ;;  %5109 = vmatprep.subr.bf16.mxu0 %v5108_v12  ;;  %v5116_v22 = vpack.c.bf16 %v410_v19, %v409_v18  ;;  %v5120_v29 = vpack.c.bf16 %v412_v26, %v411_v25  ;;  %v413_v32 = vld [vmem:[%s9016_s2 + $0x40] sm:$0xff]  ;;  %v414_v33 = vld [vmem:[%s9016_s2 + $0x48] sm:$0xff]  ;;  %v415_v39 = vld [vmem:[%s9016_s2 + $0x50] sm:$0xff] }
  0x48   : > { %s6137_s28 = sshll.u32 %s9072_s29, 3  ;;  %5111 = vmatpush3.bf16.msra.mxu0 %v5108_v12  ;;  %v5124_v36 = vpack.c.bf16 %v414_v33, %v413_v32  ;;  %v416_v40 = vld [vmem:[%s9016_s2 + $0x58] sm:$0xff]  ;;  %v417_v46 = vld [vmem:[%s9016_s2 + $0x60] sm:$0xff]  ;;  %v418_v47 = vld [vmem:[%s9016_s2 + $0x68] sm:$0xff] }
  0x49   : > { %s6143_s11 = scalar_lea.vmem %s9014_s0, %s6137_s28  ;;  %5113 = vmatprep.subr.bf16.mxu0 %v5112_v17  ;;  %v5128_v43 = vpack.c.bf16 %v416_v40, %v415_v39  ;;  %v5132_v50 = vpack.c.bf16 %v418_v47, %v417_v46  ;;  %v419_v53 = vld [vmem:[%s9016_s2 + $0x70] sm:$0xff]  ;;  %v420_v54 = vld [vmem:[%s9016_s2 + $0x78] sm:$0xff]  ;;  %s8491_s23 = scalar_lea.vmem %s9015_s1, %s6137_s28 }
  0x4a   : > { %v6146_v0 = vld [vmem:[%s6143_s11] sm:$0xff]  ;;  %v6149_v1 = vld [vmem:[%s6143_s11 + $0x10] sm:$0xff]  ;;  %v6152_v2 = vld [vmem:[%s6143_s11 + $0x8] sm:$0xff]  ;;  %v5136_v55 = vpack.c.bf16 %v420_v54, %v419_v53  ;;  %s8949_s24 = scalar_lea.vmem %s9020_s6, %s6137_s28 }
  0x4b   : > { %v325_v3 = vmul.f32 %v6146_v0, %v6146_v0  ;;  %v327_v4 = vmul.f32 %v6149_v1, %v6149_v1  ;;  %v6159_v5 = vld [vmem:[%s6143_s11 + $0x18] sm:$0xff]  ;;  %v326_v6 = vmul.f32 %v6152_v2, %v6152_v2  ;;  %v6166_v8 = vld [vmem:[%s6143_s11 + $0x20] sm:$0xff]  ;;  %v6169_v9 = vld [vmem:[%s6143_s11 + $0x28] sm:$0xff] }
  0x4c   : > { %v328_v7 = vmul.f32 %v6159_v5, %v6159_v5  ;;  %v329_v15 = vmul.f32 %v6166_v8, %v6166_v8  ;;  %v330_v16 = vmul.f32 %v6169_v9, %v6169_v9  ;;  %v6194_v20 = vld [vmem:[%s6143_s11 + $0x30] sm:$0xff]  ;;  %v6197_v21 = vld [vmem:[%s6143_s11 + $0x38] sm:$0xff]  ;;  %v6210_v27 = vld [vmem:[%s6143_s11 + $0x40] sm:$0xff]  ;;  %5115 = vmatpush3.bf16.msra.mxu0 %v5112_v17 }
  0x4d   : > { %341 = vadd.xlane.f32.xlu0 %v325_v3  ;;  %345 = vadd.xlane.f32.xlu1 %v327_v4  ;;  %v331_v23 = vmul.f32 %v6194_v20, %v6194_v20  ;;  %v332_v24 = vmul.f32 %v6197_v21, %v6197_v21  ;;  %v6213_v28 = vld [vmem:[%s6143_s11 + $0x48] sm:$0xff]  ;;  %v333_v30 = vmul.f32 %v6210_v27, %v6210_v27  ;;  %v6226_v34 = vld [vmem:[%s6143_s11 + $0x50] sm:$0xff]  ;;  %v6229_v35 = vld [vmem:[%s6143_s11 + $0x58] sm:$0xff] }
  0x4e   : > { %5117 = vmatprep.subr.bf16.mxu0 %v5116_v22  ;;  %v334_v31 = vmul.f32 %v6213_v28, %v6213_v28  ;;  %v335_v37 = vmul.f32 %v6226_v34, %v6226_v34  ;;  %v336_v38 = vmul.f32 %v6229_v35, %v6229_v35  ;;  %v6242_v41 = vld [vmem:[%s6143_s11 + $0x60] sm:$0xff]  ;;  %v6245_v42 = vld [vmem:[%s6143_s11 + $0x68] sm:$0xff]  ;;  %v6258_v48 = vld [vmem:[%s6143_s11 + $0x70] sm:$0xff] }
  0x4f   : > { %v337_v44 = vmul.f32 %v6242_v41, %v6242_v41  ;;  %v338_v45 = vmul.f32 %v6245_v42, %v6245_v42  ;;  %v6261_v49 = vld [vmem:[%s6143_s11 + $0x78] sm:$0xff]  ;;  %v339_v51 = vmul.f32 %v6258_v48, %v6258_v48 }
  0x50   : > { %5119 = vmatpush3.bf16.msra.mxu0 %v5116_v22  ;;  %v340_v52 = vmul.f32 %v6261_v49, %v6261_v49 }
  0x51   : > { %343 = vadd.xlane.f32.xlu0 %v326_v6  ;;  %347 = vadd.xlane.f32.xlu1 %v328_v7 }
  0x52   : > { %5121 = vmatprep.subr.bf16.mxu0 %v5120_v29 }
  0x54   : > { %5123 = vmatpush3.bf16.msra.mxu0 %v5120_v29 }
  0x55   : > { %349 = vadd.xlane.f32.xlu0 %v329_v15  ;;  %351 = vadd.xlane.f32.xlu1 %v330_v16 }
  0x56   : > { %5125 = vmatprep.subr.bf16.mxu0 %v5124_v36 }
  0x58   : > { %5127 = vmatpush3.bf16.msra.mxu0 %v5124_v36 }
  0x59   : > { %353 = vadd.xlane.f32.xlu0 %v331_v23  ;;  %355 = vadd.xlane.f32.xlu1 %v332_v24 }
  0x5a   : > { %5129 = vmatprep.subr.bf16.mxu0 %v5128_v43 }
  0x5c   : > { %5131 = vmatpush3.bf16.msra.mxu0 %v5128_v43 }
  0x5d   : > { %357 = vadd.xlane.f32.xlu0 %v333_v30  ;;  %359 = vadd.xlane.f32.xlu1 %v334_v31 }
  0x5e   : > { %5133 = vmatprep.subr.bf16.mxu0 %v5132_v50 }
  0x60   : > { %5135 = vmatpush3.bf16.msra.mxu0 %v5132_v50 }
  0x61   : > { %361 = vadd.xlane.f32.xlu0 %v335_v37  ;;  %363 = vadd.xlane.f32.xlu1 %v336_v38 }
  0x62   : > { %5137 = vmatprep.subr.bf16.mxu0 %v5136_v55 }
  0x64   : > { %5139 = vmatpush3.bf16.msra.mxu0 %v5136_v55 }
  0x65   : > { %365 = vadd.xlane.f32.xlu0 %v337_v44  ;;  %367 = vadd.xlane.f32.xlu1 %v338_v45  ;;  %v6292_v45 = vld [vmem:[#allocation4] sm:$0xff] }
  0x69   : > { %369 = vadd.xlane.f32.xlu0 %v339_v51  ;;  %371 = vadd.xlane.f32.xlu1 %v340_v52 }
  0xda   : > { %v342_v56 = vpop.xlane.xlu0 %341  ;;  %v346_v57 = vpop.xlane.xlu1 %345 }
  0xdb   : > { %5261 = vrsqrt.f32 %v342_v56 }
  0xdc   : > { %5263 = vrsqrt.f32 %v346_v57 }
  0xde   : > { %v344_v58 = vpop.xlane.xlu0 %343  ;;  %v348_v59 = vpop.xlane.xlu1 %347 }
  0xdf   : > { %5265 = vrsqrt.f32 %v344_v58 }
  0xe0   : > { %5267 = vrsqrt.f32 %v348_v59 }
  0xe2   : > { %v350_v60 = vpop.xlane.xlu0 %349  ;;  %v352_v61 = vpop.xlane.xlu1 %351 }
  0xe3   : > { %5269 = vrsqrt.f32 %v350_v60 }
  0xe4   : > { %5271 = vrsqrt.f32 %v352_v61 }
  0xe5   : > { %v5262_v62 = vpop.eup %5261 }
  0xe6   : > { %v5264_v63 = vpop.eup %5263  ;;  %v389_v3 = vmul.f32 %v5262_v62, %v6146_v0  ;;  %v354_v4 = vpop.xlane.xlu0 %353 }
  0xe7   : > { %v356_v6 = vpop.xlane.xlu1 %355  ;;  %5273 = vrsqrt.f32 %v354_v4  ;;  %v391_v10 = vmul.f32 %v5264_v63, %v6149_v1 }
  0xe8   : > { %4884 = vmatprep.mubr.f32.mxu0 %v389_v3  ;;  %5275 = vrsqrt.f32 %v356_v6 }
  0xe9   : > { %v5266_v7 = vpop.eup %5265 }
  0xea   : > { %v5268_v11 = vpop.eup %5267  ;;  %v390_v12 = vmul.f32 %v5266_v7, %v6152_v2  ;;  %v358_v13 = vpop.xlane.xlu0 %357 }
  0xeb   : > { %v360_v14 = vpop.xlane.xlu1 %359  ;;  %5277 = vrsqrt.f32 %v358_v13  ;;  %v392_v15 = vmul.f32 %v5268_v11, %v6159_v5 }
  0xec   : > { %4885 = vmatmul.mubr.f32.vlgmr.msra.gmra.mrb[0].mxu0 %v390_v12  ;;  %5279 = vrsqrt.f32 %v360_v14 }
  0xed   : > { %v5270_v16 = vpop.eup %5269  ;;  %4887 = vmatprep.mubr.f32.mxu0 %v391_v10 }
  0xee   : > { %v5272_v0 = vpop.eup %5271  ;;  %v362_v17 = vpop.xlane.xlu0 %361  ;;  %v393_v19 = vmul.f32 %v5270_v16, %v6166_v8 }
  0xef   : > { %v364_v18 = vpop.xlane.xlu1 %363  ;;  %5281 = vrsqrt.f32 %v362_v17  ;;  %v394_v1 = vmul.f32 %v5272_v0, %v6169_v9 }
  0xf0   : > { %4888 = vmatmul.mubr.f32.gmra.mrb[2].mxu0 %v392_v15  ;;  %5283 = vrsqrt.f32 %v364_v18 }
  0xf1   : > { %v5274_v2 = vpop.eup %5273  ;;  %4890 = vmatprep.mubr.f32.mxu0 %v393_v19 }
  0xf2   : > { %v5276_v22 = vpop.eup %5275  ;;  %v366_v23 = vpop.xlane.xlu0 %365  ;;  %v395_v25 = vmul.f32 %v5274_v2, %v6194_v20 }
  0xf3   : > { %v368_v24 = vpop.xlane.xlu1 %367  ;;  %5285 = vrsqrt.f32 %v366_v23  ;;  %v396_v5 = vmul.f32 %v5276_v22, %v6197_v21 }
  0xf4   : > { %4891 = vmatmul.mubr.f32.gmra.mrb[4].mxu0 %v394_v1  ;;  %5287 = vrsqrt.f32 %v368_v24 }
  0xf5   : > { %v5278_v26 = vpop.eup %5277  ;;  %4893 = vmatprep.mubr.f32.mxu0 %v395_v25 }
  0xf6   : > { %v5280_v8 = vpop.eup %5279  ;;  %v370_v29 = vpop.xlane.xlu0 %369  ;;  %v397_v31 = vmul.f32 %v5278_v26, %v6210_v27 }
  0xf7   : > { %v372_v30 = vpop.xlane.xlu1 %371  ;;  %5289 = vrsqrt.f32 %v370_v29  ;;  %v398_v9 = vmul.f32 %v5280_v8, %v6213_v28 }
  0xf8   : > { %4894 = vmatmul.mubr.f32.gmra.mrb[6].mxu0 %v396_v5  ;;  %5291 = vrsqrt.f32 %v372_v30 }
  0xf9   : > { %v5282_v32 = vpop.eup %5281  ;;  %4896 = vmatprep.mubr.f32.mxu0 %v397_v31 }
  0xfa   : > { %v5284_v20 = vpop.eup %5283  ;;  %v399_v33 = vmul.f32 %v5282_v32, %v6226_v34  ;;  %v421_v34 = vlaneseq }
  0xfb   : > { %v400_v21 = vmul.f32 %v5284_v20, %v6229_v35 }
  0xfc   : > { %4897 = vmatmul.mubr.f32.gmra.mrb[8].mxu0 %v398_v9  ;;  %v6289_v35 = vshrl.u32 %v421_v34, 7 }
  0xfd   : > { %v5286_v36 = vpop.eup %5285  ;;  %4899 = vmatprep.mubr.f32.mxu0 %v399_v33 }
  0xfe   : > { %v5288_v37 = vpop.eup %5287  ;;  %v401_v38 = vmul.f32 %v5286_v36, %v6242_v41  ;;  %v423_v44 = vsub.s32 0, %v6289_v35 }
  0xff   : > { %v402_v27 = vmul.f32 %v5288_v37, %v6245_v42 }
 0x100   : > { %4900 = vmatmul.mubr.f32.gmra.mrb[10].mxu0 %v400_v21  ;;  %v6297_v41 = vrot.slane %v6292_v45, %v423_v44 }
 0x101   : > { %v5290_v39 = vpop.eup %5289  ;;  %4902 = vmatprep.mubr.f32.mxu0 %v401_v38 }
 0x102   : > { %v5292_v40 = vpop.eup %5291  ;;  %v403_v28 = vmul.f32 %v5290_v39, %v6258_v48 }
 0x103   : > { %v404_v43 = vmul.f32 %v5292_v40, %v6261_v49 }
 0x104   : > { %4903 = vmatmul.mubr.f32.gmra.mrb[12].mxu0 %v402_v27 }
 0x105   : > { %4905 = vmatprep.mubr.f32.mxu0 %v403_v28 }
 0x108   : > { %4906 = vmatmul.mubr.f32.gmra.mrb[14].mxu0 %v404_v43 }
 0x1bf   : > { %v4886_v42 = vpop.f32.mrb[0].mxu0 }
 0x1c0   : > { %v6300_v46 = vadd.f32 %v4886_v42, %v6297_v41  ;;  %v491_v47 = vpop.f32.mrb[1].mxu0 }
 0x1c1   : > { %v6303_v48 = vadd.f32 %v491_v47, %v6297_v41 }
 0x1c2   : > { %v4515_v49 = vmul.f32 -1.442695, %v6300_v46 }
 0x1c3   : > { %v4514_v50 = vmul.f32 -1.442695, %v6303_v48  ;;  %v4889_v51 = vpop.f32.mrb[2].mxu0 }
 0x1c4   : > { %5293 = vpow2.f32 %v4515_v49  ;;  %v6308_v52 = vadd.f32 %v4889_v51, %v6297_v41  ;;  %v501_v53 = vpop.f32.mrb[3].mxu0 }
 0x1c5   : > { %5295 = vpow2.f32 %v4514_v50  ;;  %v6311_v54 = vadd.f32 %v501_v53, %v6297_v41 }
 0x1c6   : > { %v4517_v55 = vmul.f32 -1.442695, %v6308_v52 }
 0x1c7   : > { %v4516_v56 = vmul.f32 -1.442695, %v6311_v54  ;;  %v4892_v57 = vpop.f32.mrb[4].mxu0 }
 0x1c8   : > { %5297 = vpow2.f32 %v4517_v55  ;;  %v6316_v58 = vadd.f32 %v4892_v57, %v6297_v41  ;;  %v511_v59 = vpop.f32.mrb[5].mxu0 }
 0x1c9   : > { %5299 = vpow2.f32 %v4516_v56  ;;  %v6319_v60 = vadd.f32 %v511_v59, %v6297_v41 }
 0x1ca   : > { %v4519_v61 = vmul.f32 -1.442695, %v6316_v58 }
 0x1cb   : > { %v4518_v62 = vmul.f32 -1.442695, %v6319_v60  ;;  %v4895_v63 = vpop.f32.mrb[6].mxu0 }
 0x1cc   : > { %5301 = vpow2.f32 %v4519_v61  ;;  %v6324_v3 = vadd.f32 %v4895_v63, %v6297_v41  ;;  %v521_v4 = vpop.f32.mrb[7].mxu0 }
 0x1cd   : > { %5303 = vpow2.f32 %v4518_v62  ;;  %v6327_v6 = vadd.f32 %v521_v4, %v6297_v41 }
 0x1ce   : > { %v5294_v7 = vpop.eup %5293  ;;  %v4521_v10 = vmul.f32 -1.442695, %v6324_v3 }
 0x1cf   : > { %v5296_v11 = vpop.eup %5295  ;;  %v619_v12 = vadd.f32 1.0, %v5294_v7  ;;  %v4520_v13 = vmul.f32 -1.442695, %v6327_v6  ;;  %v4898_v14 = vpop.f32.mrb[8].mxu0 }
 0x1d0   : > { %v618_v15 = vadd.f32 1.0, %v5296_v11  ;;  %5305 = vpow2.f32 %v4521_v10  ;;  %v6332_v16 = vadd.f32 %v4898_v14, %v6297_v41  ;;  %v531_v0 = vpop.f32.mrb[9].mxu0 }
 0x1d1   : > { %5307 = vrcp.f32 %v619_v12  ;;  %v6335_v17 = vadd.f32 %v531_v0, %v6297_v41 }
 0x1d2   : > { %v5298_v18 = vpop.eup %5297  ;;  %5309 = vrcp.f32 %v618_v15  ;;  %v4523_v19 = vmul.f32 -1.442695, %v6332_v16 }
 0x1d3   : > { %v5300_v1 = vpop.eup %5299  ;;  %v621_v2 = vadd.f32 1.0, %v5298_v18  ;;  %5311 = vpow2.f32 %v4520_v13  ;;  %v4522_v22 = vmul.f32 -1.442695, %v6335_v17  ;;  %v4901_v23 = vpop.f32.mrb[10].mxu0 }
 0x1d4   : > { %v620_v24 = vadd.f32 1.0, %v5300_v1  ;;  %5313 = vpow2.f32 %v4523_v19  ;;  %v6340_v25 = vadd.f32 %v4901_v23, %v6297_v41  ;;  %v541_v5 = vpop.f32.mrb[11].mxu0 }
 0x1d5   : > { %5315 = vrcp.f32 %v621_v2  ;;  %v6343_v26 = vadd.f32 %v541_v5, %v6297_v41 }
 0x1d6   : > { %v5302_v8 = vpop.eup %5301  ;;  %5317 = vrcp.f32 %v620_v24  ;;  %v4525_v29 = vmul.f32 -1.442695, %v6340_v25 }
 0x1d7   : > { %v5304_v30 = vpop.eup %5303  ;;  %v623_v31 = vadd.f32 1.0, %v5302_v8  ;;  %5319 = vpow2.f32 %v4522_v22  ;;  %v4524_v9 = vmul.f32 -1.442695, %v6343_v26  ;;  %v4904_v32 = vpop.f32.mrb[12].mxu0 }
 0x1d8   : > { %v622_v20 = vadd.f32 1.0, %v5304_v30  ;;  %5321 = vpow2.f32 %v4525_v29  ;;  %v6348_v33 = vadd.f32 %v4904_v32, %v6297_v41  ;;  %v551_v21 = vpop.f32.mrb[13].mxu0 }
 0x1d9   : > { %5323 = vrcp.f32 %v623_v31  ;;  %v6351_v36 = vadd.f32 %v551_v21, %v6297_v41 }
 0x1da   : > { %v5306_v37 = vpop.eup %5305  ;;  %5325 = vrcp.f32 %v622_v20  ;;  %v4527_v38 = vmul.f32 -1.442695, %v6348_v33 }
 0x1db   : > { %v5308_v27 = vpop.eup %5307  ;;  %v625_v39 = vadd.f32 1.0, %v5306_v37  ;;  %5327 = vpow2.f32 %v4524_v9  ;;  %v4526_v40 = vmul.f32 -1.442695, %v6351_v36  ;;  %v4907_v28 = vpop.f32.mrb[14].mxu0 }
 0x1dc   : > { %v5310_v43 = vpop.eup %5309  ;;  %5329 = vpow2.f32 %v4527_v38  ;;  %v6356_v34 = vadd.f32 %v4907_v28, %v6297_v41  ;;  %v561_v42 = vpop.f32.mrb[15].mxu0  ;;  %v6359_v47 = vmul.f32 %v5308_v27, %v6300_v46 }
 0x1dd   : > { %v5312_v49 = vpop.eup %5311  ;;  %5331 = vrcp.f32 %v625_v39  ;;  %v6362_v50 = vadd.f32 %v561_v42, %v6297_v41  ;;  %v6365_v51 = vmul.f32 %v5310_v43, %v6303_v48 }
 0x1de   : > { %v5314_v53 = vpop.eup %5313  ;;  %v624_v55 = vadd.f32 1.0, %v5312_v49  ;;  %5333 = vpow2.f32 %v4526_v40  ;;  %v4529_v56 = vmul.f32 -1.442695, %v6356_v34  ;;  %v686_v57 = vsel %vm682_vm0, %v6359_v47, 0.0 }
 0x1df   : > { %v5316_v59 = vpop.eup %5315  ;;  %v627_v61 = vadd.f32 1.0, %v5314_v53  ;;  %v4528_v46 = vmul.f32 -1.442695, %v6362_v50  ;;  %687 = vadd.xlane.f32.xlu1 %v686_v57  ;;  %v683_v41 = vsel %vm682_vm0, %v6365_v51, 0.0 }
 0x1e0   : > { %v5318_v62 = vpop.eup %5317  ;;  %5335 = vrcp.f32 %v624_v55  ;;  %684 = vadd.xlane.f32.xlu0 %v683_v41  ;;  %v6374_v48 = vmul.f32 %v5316_v59, %v6308_v52 }
 0x1e1   : > { %v5320_v63 = vpop.eup %5319  ;;  %5337 = vrcp.f32 %v627_v61  ;;  %v6377_v4 = vmul.f32 %v5318_v62, %v6311_v54 }
 0x1e2   : > { %v5322_v7 = vpop.eup %5321  ;;  %v626_v10 = vadd.f32 1.0, %v5320_v63  ;;  %5339 = vpow2.f32 %v4529_v56  ;;  %v692_v11 = vsel %vm682_vm0, %v6374_v48, 0.0 }
 0x1e3   : > { %v5324_v12 = vpop.eup %5323  ;;  %v629_v13 = vadd.f32 1.0, %v5322_v7  ;;  %5341 = vpow2.f32 %v4528_v46  ;;  %693 = vadd.xlane.f32.xlu1 %v692_v11  ;;  %v689_v14 = vsel %vm682_vm0, %v6377_v4, 0.0 }
 0x1e4   : > { %v5326_v52 = vpop.eup %5325  ;;  %5343 = vrcp.f32 %v626_v10  ;;  %690 = vadd.xlane.f32.xlu0 %v689_v14  ;;  %v6384_v15 = vmul.f32 %v5324_v12, %v6316_v58 }
 0x1e5   : > { %v5328_v54 = vpop.eup %5327  ;;  %5345 = vrcp.f32 %v629_v13  ;;  %v6387_v0 = vmul.f32 %v5326_v52, %v6319_v60 }
 0x1e6   : > { %v5330_v18 = vpop.eup %5329  ;;  %v628_v19 = vadd.f32 1.0, %v5328_v54  ;;  %v698_v1 = vsel %vm682_vm0, %v6384_v15, 0.0 }
 0x1e7   : > { %v5332_v2 = vpop.eup %5331  ;;  %v631_v22 = vadd.f32 1.0, %v5330_v18  ;;  %699 = vadd.xlane.f32.xlu1 %v698_v1  ;;  %v695_v23 = vsel %vm682_vm0, %v6387_v0, 0.0 }
 0x1e8   : > { %v5334_v24 = vpop.eup %5333  ;;  %5347 = vrcp.f32 %v628_v19  ;;  %696 = vadd.xlane.f32.xlu0 %v695_v23  ;;  %v6394_v58 = vmul.f32 %v5332_v2, %v6324_v3 }
 0x1e9   : > { %5349 = vrcp.f32 %v631_v22  ;;  %v630_v60 = vadd.f32 1.0, %v5334_v24 }
 0x1ea   : > { %v5336_v5 = vpop.eup %5335  ;;  %v704_v8 = vsel %vm682_vm0, %v6394_v58, 0.0 }
 0x1eb   : > { %v5338_v29 = vpop.eup %5337  ;;  %5351 = vrcp.f32 %v630_v60  ;;  %705 = vadd.xlane.f32.xlu1 %v704_v8  ;;  %v6399_v30 = vmul.f32 %v5336_v5, %v6327_v6 }
 0x1ec   : > { %v5340_v31 = vpop.eup %5339  ;;  %v6402_v9 = vmul.f32 %v5338_v29, %v6332_v16 }
 0x1ed   : > { %v5342_v32 = vpop.eup %5341  ;;  %v633_v20 = vadd.f32 1.0, %v5340_v31  ;;  %v701_v3 = vsel %vm682_vm0, %v6399_v30, 0.0 }
 0x1ee   : > { %v5344_v21 = vpop.eup %5343  ;;  %v632_v37 = vadd.f32 1.0, %v5342_v32  ;;  %702 = vadd.xlane.f32.xlu0 %v701_v3  ;;  %v710_v38 = vsel %vm682_vm0, %v6402_v9, 0.0 }
 0x1ef   : > { %v5346_v27 = vpop.eup %5345  ;;  %5353 = vrcp.f32 %v633_v20  ;;  %711 = vadd.xlane.f32.xlu1 %v710_v38  ;;  %v6409_v6 = vmul.f32 %v5344_v21, %v6335_v17 }
 0x1f0   : > { %5355 = vrcp.f32 %v632_v37  ;;  %v6412_v16 = vmul.f32 %v5346_v27, %v6340_v25 }
 0x1f1   : > { %v707_v39 = vsel %vm682_vm0, %v6409_v6, 0.0 }
 0x1f2   : > { %v5348_v40 = vpop.eup %5347  ;;  %708 = vadd.xlane.f32.xlu0 %v707_v39  ;;  %v716_v28 = vsel %vm682_vm0, %v6412_v16, 0.0 }
 0x1f3   : > { %v5350_v43 = vpop.eup %5349  ;;  %717 = vadd.xlane.f32.xlu1 %v716_v28  ;;  %v6419_v42 = vmul.f32 %v5348_v40, %v6343_v26 }
 0x1f4   : > { %v6422_v17 = vmul.f32 %v5350_v43, %v6348_v33 }
 0x1f5   : > { %v5352_v49 = vpop.eup %5351  ;;  %v713_v25 = vsel %vm682_vm0, %v6419_v42, 0.0 }
 0x1f6   : > { %714 = vadd.xlane.f32.xlu0 %v713_v25  ;;  %v722_v53 = vsel %vm682_vm0, %v6422_v17, 0.0  ;;  %v6429_v55 = vmul.f32 %v5352_v49, %v6351_v36 }
 0x1f7   : > { %723 = vadd.xlane.f32.xlu1 %v722_v53 }
 0x1f8   : > { %v719_v56 = vsel %vm682_vm0, %v6429_v55, 0.0 }
 0x1f9   : > { %v5354_v26 = vpop.eup %5353 }
 0x1fa   : > { %v5356_v57 = vpop.eup %5355  ;;  %720 = vadd.xlane.f32.xlu0 %v719_v56  ;;  %v6434_v33 = vmul.f32 %v5354_v26, %v6356_v34 }
 0x1fb   : > { %v6437_v59 = vmul.f32 %v5356_v57, %v6362_v50 }
 0x1fc   : > { %v728_v61 = vsel %vm682_vm0, %v6434_v33, 0.0 }
 0x1fd   : > { %729 = vadd.xlane.f32.xlu1 %v728_v61  ;;  %v725_v36 = vsel %vm682_vm0, %v6437_v59, 0.0 }
 0x1fe   : > { %726 = vadd.xlane.f32.xlu0 %v725_v36 }
 0x26c   : > { %v688_v46 = vpop.xlane.xlu1 %687 }
 0x26d   : > { %v733_v41 = vmul.f32 0.015625, %v688_v46  ;;  %v685_v62 = vpop.xlane.xlu0 %684 }
 0x26e   : > { %v732_v63 = vmul.f32 0.015625, %v685_v62 }
 0x26f   : > { %v6444_v7 = vsub.f32 %v6359_v47, %v733_v41 }
 0x270   : > { %v6447_v34 = vsub.f32 %v6365_v51, %v732_v63  ;;  %v694_v50 = vpop.xlane.xlu1 %693 }
 0x271   : > { %v735_v10 = vmul.f32 0.015625, %v694_v50  ;;  %v691_v11 = vpop.xlane.xlu0 %690  ;;  %v765_v12 = vmul.f32 %v6444_v7, %v6444_v7 }
 0x272   : > { %v734_v13 = vmul.f32 0.015625, %v691_v11  ;;  %v764_v14 = vmul.f32 %v6447_v34, %v6447_v34 }
 0x273   : > { %v6454_v52 = vsub.f32 %v6374_v48, %v735_v10  ;;  %v783_v54 = vsel %vm682_vm0, %v765_v12, 0.0 }
 0x274   : > { %v6458_v47 = vsub.f32 %v6377_v4, %v734_v13  ;;  %784 = vadd.xlane.f32.xlu1 %v783_v54  ;;  %v700_v51 = vpop.xlane.xlu1 %699  ;;  %v780_v18 = vsel %vm682_vm0, %v764_v14, 0.0  ;;  %v932_v13 = vld [vmem:[%s9017_s3] sm:$0xff] }
 0x275   : > { %v737_v19 = vmul.f32 0.015625, %v700_v51  ;;  %781 = vadd.xlane.f32.xlu0 %v780_v18  ;;  %v697_v1 = vpop.xlane.xlu0 %696  ;;  %v767_v2 = vmul.f32 %v6454_v52, %v6454_v52 }
 0x276   : > { %v736_v22 = vmul.f32 0.015625, %v697_v1  ;;  %v766_v48 = vmul.f32 %v6458_v47, %v6458_v47 }
 0x277   : > { %v6466_v23 = vsub.f32 %v6384_v15, %v737_v19  ;;  %v789_v4 = vsel %vm682_vm0, %v767_v2, 0.0 }
 0x278   : > { %v6470_v24 = vsub.f32 %v6387_v0, %v736_v22  ;;  %790 = vadd.xlane.f32.xlu1 %v789_v4  ;;  %v706_v60 = vpop.xlane.xlu1 %705  ;;  %v786_v5 = vsel %vm682_vm0, %v766_v48, 0.0  ;;  %v935_v4 = vld [vmem:[%s9017_s3 + $0x18] sm:$0xff] }
 0x279   : > { %v739_v8 = vmul.f32 0.015625, %v706_v60  ;;  %787 = vadd.xlane.f32.xlu0 %v786_v5  ;;  %v769_v29 = vmul.f32 %v6466_v23, %v6466_v23 }
 0x27a   : > { %v768_v31 = vmul.f32 %v6470_v24, %v6470_v24 }
 0x27b   : > { %v6478_v15 = vsub.f32 %v6394_v58, %v739_v8  ;;  %v703_v32 = vpop.xlane.xlu0 %702  ;;  %v795_v20 = vsel %vm682_vm0, %v769_v29, 0.0 }
 0x27c   : > { %v738_v0 = vmul.f32 0.015625, %v703_v32  ;;  %796 = vadd.xlane.f32.xlu1 %v795_v20  ;;  %v712_v3 = vpop.xlane.xlu1 %711  ;;  %v792_v21 = vsel %vm682_vm0, %v768_v31, 0.0 }
 0x27d   : > { %v741_v37 = vmul.f32 0.015625, %v712_v3  ;;  %793 = vadd.xlane.f32.xlu0 %v792_v21  ;;  %v771_v38 = vmul.f32 %v6478_v15, %v6478_v15  ;;  %v938_v21 = vld [vmem:[%s9017_s3 + $0x30] sm:$0xff] }
 0x27e   : > { %v6485_v27 = vsub.f32 %v6399_v30, %v738_v0 }
 0x27f   : > { %v6488_v39 = vsub.f32 %v6402_v9, %v741_v37  ;;  %v709_v58 = vpop.xlane.xlu0 %708  ;;  %v801_v40 = vsel %vm682_vm0, %v771_v38, 0.0  ;;  %v939_v37 = vld [vmem:[%s9017_s3 + $0x38] sm:$0xff] }
 0x280   : > { %v740_v28 = vmul.f32 0.015625, %v709_v58  ;;  %802 = vadd.xlane.f32.xlu1 %v801_v40  ;;  %v718_v43 = vpop.xlane.xlu1 %717  ;;  %v770_v49 = vmul.f32 %v6485_v27, %v6485_v27  ;;  %v5152_v38 = vpack.c.bf16 %v939_v37, %v938_v21 }
 0x281   : > { %v743_v25 = vmul.f32 0.015625, %v718_v43  ;;  %v773_v53 = vmul.f32 %v6488_v39, %v6488_v39 }
 0x282   : > { %v6496_v56 = vsub.f32 %v6409_v6, %v740_v28  ;;  %v798_v30 = vsel %vm682_vm0, %v770_v49, 0.0 }
 0x283   : > { %v6500_v9 = vsub.f32 %v6412_v16, %v743_v25  ;;  %799 = vadd.xlane.f32.xlu0 %v798_v30  ;;  %v715_v26 = vpop.xlane.xlu0 %714  ;;  %v807_v57 = vsel %vm682_vm0, %v773_v53, 0.0 }
 0x284   : > { %v742_v61 = vmul.f32 0.015625, %v715_v26  ;;  %808 = vadd.xlane.f32.xlu1 %v807_v57  ;;  %v724_v36 = vpop.xlane.xlu1 %723  ;;  %v772_v46 = vmul.f32 %v6496_v56, %v6496_v56 }
 0x285   : > { %v745_v41 = vmul.f32 0.015625, %v724_v36  ;;  %v775_v6 = vmul.f32 %v6500_v9, %v6500_v9 }
 0x286   : > { %v6508_v62 = vsub.f32 %v6419_v42, %v742_v61  ;;  %v804_v16 = vsel %vm682_vm0, %v772_v46, 0.0  ;;  %v933_v42 = vld [vmem:[%s9017_s3 + $0x8] sm:$0xff] }
 0x287   : > { %v6512_v63 = vsub.f32 %v6422_v17, %v745_v41  ;;  %805 = vadd.xlane.f32.xlu0 %v804_v16  ;;  %v721_v50 = vpop.xlane.xlu0 %720  ;;  %v813_v10 = vsel %vm682_vm0, %v775_v6, 0.0  ;;  %v5140_v14 = vpack.c.bf16 %v933_v42, %v932_v13  ;;  %v914_v42 = vsub.s32 2, %v6289_v35 }
 0x288   : > { %v744_v11 = vmul.f32 0.015625, %v721_v50  ;;  %814 = vadd.xlane.f32.xlu1 %v813_v10  ;;  %v774_v12 = vmul.f32 %v6508_v62, %v6508_v62  ;;  %v894_v50 = vsub.s32 5, %v6289_v35 }
 0x289   : > { %v777_v17 = vmul.f32 %v6512_v63, %v6512_v63  ;;  %5141 = vmatprep.subr.bf16.mxu1 %v5140_v14 }
 0x28a   : > { %v6526_v54 = vsub.f32 %v6429_v55, %v744_v11  ;;  %v730_v51 = vpop.xlane.xlu1 %729  ;;  %v810_v18 = vsel %vm682_vm0, %v774_v12, 0.0  ;;  %5143 = vmatpush3.bf16.msra.mxu1 %v5140_v14  ;;  %v934_v55 = vld [vmem:[%s9017_s3 + $0x10] sm:$0xff]  ;;  %v6570_v14 = vrot.slane %v6292_v45, %v894_v50 }
 0x28b   : > { %v747_v19 = vmul.f32 0.015625, %v730_v51  ;;  %811 = vadd.xlane.f32.xlu0 %v810_v18  ;;  %v727_v1 = vpop.xlane.xlu0 %726  ;;  %v819_v2 = vsel %vm682_vm0, %v777_v17, 0.0  ;;  %v5144_v5 = vpack.c.bf16 %v935_v4, %v934_v55  ;;  %v6565_v17 = vld [vmem:[#allocation4 + $0x8] sm:$0xff] }
 0x28c   : > { %v746_v22 = vmul.f32 0.015625, %v727_v1  ;;  %820 = vadd.xlane.f32.xlu1 %v819_v2  ;;  %v776_v48 = vmul.f32 %v6526_v54, %v6526_v54 }
 0x28d   : > { %v6539_v60 = vsub.f32 %v6434_v33, %v747_v19  ;;  %5145 = vmatprep.subr.bf16.mxu1 %v5144_v5  ;;  %v936_v33 = vld [vmem:[%s9017_s3 + $0x20] sm:$0xff] }
 0x28e   : > { %v6542_v8 = vsub.f32 %v6437_v59, %v746_v22  ;;  %v816_v29 = vsel %vm682_vm0, %v776_v48, 0.0  ;;  %5147 = vmatpush3.bf16.msra.mxu1 %v5144_v5  ;;  %v937_v59 = vld [vmem:[%s9017_s3 + $0x28] sm:$0xff]  ;;  %v6577_v5 = vrot.slane %v6565_v17, %v914_v42 }
 0x28f   : > { %817 = vadd.xlane.f32.xlu0 %v816_v29  ;;  %v779_v31 = vmul.f32 %v6539_v60, %v6539_v60  ;;  %v5148_v0 = vpack.c.bf16 %v937_v59, %v936_v33 }
 0x290   : > { %v778_v32 = vmul.f32 %v6542_v8, %v6542_v8 }
 0x291   : > { %v825_v20 = vsel %vm682_vm0, %v779_v31, 0.0  ;;  %5149 = vmatprep.subr.bf16.mxu1 %v5148_v0 }
 0x292   : > { %826 = vadd.xlane.f32.xlu1 %v825_v20  ;;  %v822_v3 = vsel %vm682_vm0, %v778_v32, 0.0  ;;  %5151 = vmatpush3.bf16.msra.mxu1 %v5148_v0 }
 0x293   : > { %823 = vadd.xlane.f32.xlu0 %v822_v3  ;;  %5153 = vmatprep.subr.bf16.mxu1 %v5152_v38 }
 0x296   : > { %5155 = vmatpush3.bf16.msra.mxu1 %v5152_v38 }
 0x301   : > { %v785_v58 = vpop.xlane.xlu1 %784 }
 0x302   : > { %v829_v40 = vmul.f32 0.015625, %v785_v58  ;;  %v782_v28 = vpop.xlane.xlu0 %781 }
 0x303   : > { %v828_v43 = vmul.f32 0.015625, %v782_v28 }
 0x304   : > { %v845_v49 = vadd.f32 0.1, %v829_v40 }
 0x305   : > { %v844_v25 = vadd.f32 0.1, %v828_v43  ;;  %v791_v53 = vpop.xlane.xlu1 %790 }
 0x306   : > { %5357 = vrsqrt.f32 %v845_v49  ;;  %v831_v30 = vmul.f32 0.015625, %v791_v53  ;;  %v788_v26 = vpop.xlane.xlu0 %787 }
 0x307   : > { %5359 = vrsqrt.f32 %v844_v25  ;;  %v830_v57 = vmul.f32 0.015625, %v788_v26 }
 0x308   : > { %v847_v61 = vadd.f32 0.1, %v831_v30 }
 0x309   : > { %v846_v36 = vadd.f32 0.1, %v830_v57  ;;  %v797_v46 = vpop.xlane.xlu1 %796 }
 0x30a   : > { %5361 = vrsqrt.f32 %v847_v61  ;;  %v833_v41 = vmul.f32 0.015625, %v797_v46  ;;  %v794_v6 = vpop.xlane.xlu0 %793 }
 0x30b   : > { %5363 = vrsqrt.f32 %v846_v36  ;;  %v832_v16 = vmul.f32 0.015625, %v794_v6 }
 0x30c   : > { %v849_v10 = vadd.f32 0.1, %v833_v41 }
 0x30d   : > { %v848_v11 = vadd.f32 0.1, %v832_v16  ;;  %v803_v12 = vpop.xlane.xlu1 %802 }
 0x30e   : > { %5365 = vrsqrt.f32 %v849_v10  ;;  %v835_v13 = vmul.f32 0.015625, %v803_v12 }
 0x30f   : > { %5367 = vrsqrt.f32 %v848_v11 }
 0x310   : > { %v5358_v51 = vpop.eup %5357  ;;  %v851_v18 = vadd.f32 0.1, %v835_v13  ;;  %v800_v19 = vpop.xlane.xlu0 %799 }
 0x311   : > { %v5360_v1 = vpop.eup %5359  ;;  %v834_v2 = vmul.f32 0.015625, %v800_v19  ;;  %v809_v22 = vpop.xlane.xlu1 %808  ;;  %v877_v48 = vmul.f32 %v5358_v51, %v6444_v7 }
 0x312   : > { %5369 = vrsqrt.f32 %v851_v18  ;;  %v837_v55 = vmul.f32 0.015625, %v809_v22  ;;  %v876_v4 = vmul.f32 %v5360_v1, %v6447_v34 }
 0x313   : > { %v850_v29 = vadd.f32 0.1, %v834_v2  ;;  %v897_v31 = vmul.f32 %v6570_v14, %v877_v48 }
 0x314   : > { %v5362_v32 = vpop.eup %5361  ;;  %v853_v33 = vadd.f32 0.1, %v837_v55  ;;  %v806_v59 = vpop.xlane.xlu0 %805  ;;  %v896_v20 = vmul.f32 %v6570_v14, %v876_v4 }
 0x315   : > { %v5364_v0 = vpop.eup %5363  ;;  %5371 = vrsqrt.f32 %v850_v29  ;;  %v836_v7 = vmul.f32 0.015625, %v806_v59  ;;  %v815_v3 = vpop.xlane.xlu1 %814  ;;  %v879_v21 = vmul.f32 %v5362_v32, %v6454_v52  ;;  %v6587_v40 = vadd.f32 %v6577_v5, %v897_v31 }
 0x316   : > { %5373 = vrsqrt.f32 %v853_v33  ;;  %v839_v34 = vmul.f32 0.015625, %v815_v3  ;;  %v6583_v37 = vadd.f32 %v6577_v5, %v896_v20  ;;  %v878_v38 = vmul.f32 %v5364_v0, %v6458_v47 }
 0x317   : > { %v852_v58 = vadd.f32 0.1, %v836_v7  ;;  %v899_v28 = vmul.f32 %v6570_v14, %v879_v21 }
 0x318   : > { %v5366_v43 = vpop.eup %5365  ;;  %v855_v49 = vadd.f32 0.1, %v839_v34  ;;  %v812_v25 = vpop.xlane.xlu0 %811  ;;  %4924 = vmatprep.mubr.msk.f32.mxu1 %vm682_vm0, %v6583_v37  ;;  %v898_v52 = vmul.f32 %v6570_v14, %v878_v38 }
 0x319   : > { %v5368_v53 = vpop.eup %5367  ;;  %5375 = vrsqrt.f32 %v852_v58  ;;  %v838_v30 = vmul.f32 0.015625, %v812_v25  ;;  %v821_v26 = vpop.xlane.xlu1 %820  ;;  %4925 = vmatmul.mubr.msk.f32.vlgmr.msra.gmra.mrb[0].mxu1 %vm682_vm0, %v6587_v40  ;;  %v881_v47 = vmul.f32 %v5366_v43, %v6466_v23  ;;  %v6601_v41 = vadd.f32 %v6577_v5, %v899_v28 }
 0x31a   : > { %5377 = vrsqrt.f32 %v855_v49  ;;  %v841_v57 = vmul.f32 0.015625, %v821_v26  ;;  %v6597_v61 = vadd.f32 %v6577_v5, %v898_v52  ;;  %v880_v36 = vmul.f32 %v5368_v53, %v6470_v24 }
 0x31b   : > { %v854_v46 = vadd.f32 0.1, %v838_v30  ;;  %v901_v6 = vmul.f32 %v6570_v14, %v881_v47 }
 0x31c   : > { %v5370_v16 = vpop.eup %5369  ;;  %v857_v10 = vadd.f32 0.1, %v841_v57  ;;  %v818_v11 = vpop.xlane.xlu0 %817  ;;  %4927 = vmatprep.mubr.msk.f32.mxu1 %vm682_vm0, %v6597_v61  ;;  %v900_v23 = vmul.f32 %v6570_v14, %v880_v36 }
 0x31d   : > { %5379 = vrsqrt.f32 %v854_v46  ;;  %v840_v12 = vmul.f32 0.015625, %v818_v11  ;;  %4928 = vmatmul.mubr.msk.f32.gmra.mrb[2].mxu1 %vm682_vm0, %v6601_v41  ;;  %v883_v24 = vmul.f32 %v5370_v16, %v6478_v15  ;;  %v6614_v1 = vadd.f32 %v6577_v5, %v901_v6 }
 0x31e   : > { %5381 = vrsqrt.f32 %v857_v10  ;;  %v6611_v13 = vadd.f32 %v6577_v5, %v900_v23 }
 0x31f   : > { %v5372_v51 = vpop.eup %5371  ;;  %v856_v18 = vadd.f32 0.1, %v840_v12  ;;  %v827_v19 = vpop.xlane.xlu1 %826  ;;  %v903_v4 = vmul.f32 %v6570_v14, %v883_v24 }
 0x320   : > { %v5374_v2 = vpop.eup %5373  ;;  %v843_v22 = vmul.f32 0.015625, %v827_v19  ;;  %v824_v48 = vpop.xlane.xlu0 %823  ;;  %4930 = vmatprep.mubr.msk.f32.mxu1 %vm682_vm0, %v6611_v13  ;;  %v882_v55 = vmul.f32 %v5372_v51, %v6485_v27 }
 0x321   : > { %5383 = vrsqrt.f32 %v856_v18  ;;  %v842_v15 = vmul.f32 0.015625, %v824_v48  ;;  %4931 = vmatmul.mubr.msk.f32.gmra.mrb[4].mxu1 %vm682_vm0, %v6614_v1  ;;  %v885_v29 = vmul.f32 %v5374_v2, %v6488_v39  ;;  %v6629_v7 = vadd.f32 %v6577_v5, %v903_v4 }
 0x322   : > { %v859_v31 = vadd.f32 0.1, %v843_v22  ;;  %v902_v32 = vmul.f32 %v6570_v14, %v882_v55 }
 0x323   : > { %v5376_v33 = vpop.eup %5375  ;;  %v858_v59 = vadd.f32 0.1, %v842_v15  ;;  %v905_v3 = vmul.f32 %v6570_v14, %v885_v29 }
 0x324   : > { %v5378_v20 = vpop.eup %5377  ;;  %5385 = vrsqrt.f32 %v859_v31  ;;  %v6625_v0 = vadd.f32 %v6577_v5, %v902_v32  ;;  %v884_v27 = vmul.f32 %v5376_v33, %v6496_v56 }
 0x325   : > { %5387 = vrsqrt.f32 %v858_v59  ;;  %v887_v39 = vmul.f32 %v5378_v20, %v6500_v9  ;;  %v6643_v28 = vadd.f32 %v6577_v5, %v905_v3 }
 0x326   : > { %4933 = vmatprep.mubr.msk.f32.mxu1 %vm682_vm0, %v6625_v0  ;;  %v904_v21 = vmul.f32 %v6570_v14, %v884_v27 }
 0x327   : > { %v5380_v34 = vpop.eup %5379  ;;  %4934 = vmatmul.mubr.msk.f32.gmra.mrb[6].mxu1 %vm682_vm0, %v6629_v7  ;;  %v907_v9 = vmul.f32 %v6570_v14, %v887_v39 }
 0x328   : > { %v5382_v38 = vpop.eup %5381  ;;  %v6639_v56 = vadd.f32 %v6577_v5, %v904_v21  ;;  %v886_v58 = vmul.f32 %v5380_v34, %v6508_v62 }
 0x329   : > { %v889_v43 = vmul.f32 %v5382_v38, %v6512_v63  ;;  %v6657_v53 = vadd.f32 %v6577_v5, %v907_v9 }
 0x32a   : > { %4936 = vmatprep.mubr.msk.f32.mxu1 %vm682_vm0, %v6639_v56  ;;  %v906_v49 = vmul.f32 %v6570_v14, %v886_v58 }
 0x32b   : > { %v5384_v25 = vpop.eup %5383  ;;  %4937 = vmatmul.mubr.msk.f32.gmra.mrb[8].mxu1 %vm682_vm0, %v6643_v28  ;;  %v909_v30 = vmul.f32 %v6570_v14, %v889_v43 }
 0x32c   : > { %v6653_v52 = vadd.f32 %v6577_v5, %v906_v49  ;;  %v888_v62 = vmul.f32 %v5384_v25, %v6526_v54 }
 0x32d   : > { %v6671_v46 = vadd.f32 %v6577_v5, %v909_v30 }
 0x32e   : > { %v5386_v63 = vpop.eup %5385  ;;  %4939 = vmatprep.mubr.msk.f32.mxu1 %vm682_vm0, %v6653_v52  ;;  %v908_v26 = vmul.f32 %v6570_v14, %v888_v62 }
 0x32f   : > { %v5388_v47 = vpop.eup %5387  ;;  %4940 = vmatmul.mubr.msk.f32.gmra.mrb[10].mxu1 %vm682_vm0, %v6657_v53  ;;  %v891_v57 = vmul.f32 %v5386_v63, %v6539_v60 }
 0x330   : > { %v6667_v36 = vadd.f32 %v6577_v5, %v908_v26  ;;  %v890_v54 = vmul.f32 %v5388_v47, %v6542_v8  ;;  %v942_v8 = vsub.s32 1, %v6289_v35 }
 0x331   : > { %v911_v6 = vmul.f32 %v6570_v14, %v891_v57 }
 0x332   : > { %4942 = vmatprep.mubr.msk.f32.mxu1 %vm682_vm0, %v6667_v36  ;;  %v910_v16 = vmul.f32 %v6570_v14, %v890_v54  ;;  %v6693_v14 = vrot.slane %v6292_v45, %v942_v8 }
 0x333   : > { %4943 = vmatmul.mubr.msk.f32.gmra.mrb[12].mxu1 %vm682_vm0, %v6671_v46  ;;  %v6683_v10 = vadd.f32 %v6577_v5, %v911_v6 }
 0x334   : > { %v6680_v60 = vadd.f32 %v6577_v5, %v910_v16 }
 0x336   : > { %4945 = vmatprep.mubr.msk.f32.mxu1 %vm682_vm0, %v6680_v60 }
 0x337   : > { %4946 = vmatmul.mubr.msk.f32.gmra.mrb[14].mxu1 %vm682_vm0, %v6683_v10 }
 0x3ec   : > { %v4926_v11 = vpop.f32.mrb[0].mxu1 }
 0x3ed   : > { %v1064_v23 = vadd.f32 %v4926_v11, %v6693_v14  ;;  %v1058_v12 = vpop.f32.mrb[1].mxu1 }
 0x3ee   : > { %v1059_v5 = vadd.f32 %v1058_v12, %v6693_v14 }
 0x3ef   : > { %v6698_v24 = vadd.f32 %v1064_v23, %v6587_v40 }
 0x3f0   : > { %v6701_v51 = vadd.f32 %v1059_v5, %v6583_v37  ;;  %v4929_v18 = vpop.f32.mrb[2].mxu1 }
 0x3f1   : > { %v4547_v19 = vmul.f32 -1.442695, %v6698_v24  ;;  %v1074_v2 = vadd.f32 %v4929_v18, %v6693_v14  ;;  %v1068_v22 = vpop.f32.mrb[3].mxu1 }
 0x3f2   : > { %v4546_v45 = vmul.f32 -1.442695, %v6701_v51  ;;  %v1069_v48 = vadd.f32 %v1068_v22, %v6693_v14 }
 0x3f3   : > { %5389 = vpow2.f32 %v4547_v19  ;;  %v6708_v55 = vadd.f32 %v1074_v2, %v6601_v41 }
 0x3f4   : > { %5391 = vpow2.f32 %v4546_v45  ;;  %v6711_v15 = vadd.f32 %v1069_v48, %v6597_v61  ;;  %v4932_v4 = vpop.f32.mrb[4].mxu1 }
 0x3f5   : > { %v4549_v29 = vmul.f32 -1.442695, %v6708_v55  ;;  %v1084_v31 = vadd.f32 %v4932_v4, %v6693_v14  ;;  %v1078_v32 = vpop.f32.mrb[5].mxu1 }
 0x3f6   : > { %v4548_v33 = vmul.f32 -1.442695, %v6711_v15  ;;  %v1079_v59 = vadd.f32 %v1078_v32, %v6693_v14 }
 0x3f7   : > { %5393 = vpow2.f32 %v4549_v29  ;;  %v6718_v20 = vadd.f32 %v1084_v31, %v6614_v1 }
 0x3f8   : > { %5395 = vpow2.f32 %v4548_v33  ;;  %v6721_v27 = vadd.f32 %v1079_v59, %v6611_v13 }
 0x3f9   : > { %v4551_v3 = vmul.f32 -1.442695, %v6718_v20 }
 0x3fa   : > { %v4550_v39 = vmul.f32 -1.442695, %v6721_v27  ;;  %v4935_v21 = vpop.f32.mrb[6].mxu1 }
 0x3fb   : > { %5397 = vpow2.f32 %v4551_v3  ;;  %v1094_v34 = vadd.f32 %v4935_v21, %v6693_v14  ;;  %v1088_v38 = vpop.f32.mrb[7].mxu1 }
 0x3fc   : > { %5399 = vpow2.f32 %v4550_v39  ;;  %v1089_v58 = vadd.f32 %v1088_v38, %v6693_v14 }
 0x3fd   : > { %v5390_v9 = vpop.eup %5389  ;;  %v6728_v43 = vadd.f32 %v1094_v34, %v6629_v7 }
 0x3fe   : > { %v5392_v49 = vpop.eup %5391  ;;  %v1202_v25 = vadd.f32 1.0, %v5390_v9  ;;  %v6731_v62 = vadd.f32 %v1089_v58, %v6625_v0  ;;  %v4938_v30 = vpop.f32.mrb[8].mxu1 }
 0x3ff   : > { %v1201_v63 = vadd.f32 1.0, %v5392_v49  ;;  %v4553_v26 = vmul.f32 -1.442695, %v6728_v43  ;;  %v1104_v47 = vadd.f32 %v4938_v30, %v6693_v14  ;;  %v1098_v57 = vpop.f32.mrb[9].mxu1 }
 0x400   : > { %5401 = vrcp.f32 %v1202_v25  ;;  %v4552_v54 = vmul.f32 -1.442695, %v6731_v62  ;;  %v1099_v6 = vadd.f32 %v1098_v57, %v6693_v14 }
 0x401   : > { %v5394_v16 = vpop.eup %5393  ;;  %5403 = vrcp.f32 %v1201_v63  ;;  %v6738_v11 = vadd.f32 %v1104_v47, %v6643_v28 }
 0x402   : > { %v5396_v23 = vpop.eup %5395  ;;  %v1204_v12 = vadd.f32 1.0, %v5394_v16  ;;  %5405 = vpow2.f32 %v4553_v26  ;;  %v6741_v5 = vadd.f32 %v1099_v6, %v6639_v56  ;;  %v4941_v18 = vpop.f32.mrb[10].mxu1 }
 0x403   : > { %v1203_v19 = vadd.f32 1.0, %v5396_v23  ;;  %5407 = vpow2.f32 %v4552_v54  ;;  %v4555_v2 = vmul.f32 -1.442695, %v6738_v11  ;;  %v1114_v22 = vadd.f32 %v4941_v18, %v6693_v14  ;;  %v1108_v45 = vpop.f32.mrb[11].mxu1 }
 0x404   : > { %5409 = vrcp.f32 %v1204_v12  ;;  %v4554_v48 = vmul.f32 -1.442695, %v6741_v5  ;;  %v1109_v4 = vadd.f32 %v1108_v45, %v6693_v14 }
 0x405   : > { %v5398_v29 = vpop.eup %5397  ;;  %5411 = vrcp.f32 %v1203_v19  ;;  %v6748_v31 = vadd.f32 %v1114_v22, %v6657_v53 }
 0x406   : > { %v5400_v32 = vpop.eup %5399  ;;  %v1206_v33 = vadd.f32 1.0, %v5398_v29  ;;  %5413 = vpow2.f32 %v4555_v2  ;;  %v6751_v59 = vadd.f32 %v1109_v4, %v6653_v52  ;;  %v4944_v3 = vpop.f32.mrb[12].mxu1 }
 0x407   : > { %v1205_v39 = vadd.f32 1.0, %v5400_v32  ;;  %5415 = vpow2.f32 %v4554_v48  ;;  %v4557_v21 = vmul.f32 -1.442695, %v6748_v31  ;;  %v1124_v34 = vadd.f32 %v4944_v3, %v6693_v14  ;;  %v1118_v38 = vpop.f32.mrb[13].mxu1 }
 0x408   : > { %5417 = vrcp.f32 %v1206_v33  ;;  %v4556_v58 = vmul.f32 -1.442695, %v6751_v59  ;;  %v1119_v9 = vadd.f32 %v1118_v38, %v6693_v14 }
 0x409   : > { %5419 = vrcp.f32 %v1205_v39  ;;  %v6758_v49 = vadd.f32 %v1124_v34, %v6671_v46 }
 0x40a   : > { %v5402_v25 = vpop.eup %5401  ;;  %5421 = vpow2.f32 %v4557_v21  ;;  %v6761_v30 = vadd.f32 %v1119_v9, %v6667_v36  ;;  %v4947_v63 = vpop.f32.mrb[14].mxu1 }
 0x40b   : > { %v5404_v26 = vpop.eup %5403  ;;  %5423 = vpow2.f32 %v4556_v58  ;;  %v4559_v47 = vmul.f32 -1.442695, %v6758_v49  ;;  %v1134_v57 = vadd.f32 %v4947_v63, %v6693_v14  ;;  %v1128_v54 = vpop.f32.mrb[15].mxu1  ;;  %v6766_v6 = vmul.f32 %v5402_v25, %v6698_v24 }
 0x40c   : > { %v5406_v16 = vpop.eup %5405  ;;  %v4558_v23 = vmul.f32 -1.442695, %v6761_v30  ;;  %v1129_v12 = vadd.f32 %v1128_v54, %v6693_v14  ;;  %v6771_v18 = vmul.f32 %v5404_v26, %v6701_v51 }
 0x40d   : > { %v5408_v19 = vpop.eup %5407  ;;  %v1208_v2 = vadd.f32 1.0, %v5406_v16  ;;  %5425 = vpow2.f32 %v4559_v47  ;;  %v6774_v22 = vadd.f32 %v1134_v57, %v6683_v10  ;;  %v1268_v45 = vsel %vm682_vm0, %v6766_v6, 0.0 }
 0x40e   : > { %v5410_v48 = vpop.eup %5409  ;;  %v1207_v24 = vadd.f32 1.0, %v5408_v19  ;;  %5427 = vpow2.f32 %v4558_v23  ;;  %v6779_v4 = vadd.f32 %v1129_v12, %v6680_v60  ;;  %1269 = vadd.xlane.f32.xlu1 %v1268_v45  ;;  %v1265_v14 = vsel %vm682_vm0, %v6771_v18, 0.0 }
 0x40f   : > { %v5412_v51 = vpop.eup %5411  ;;  %5429 = vrcp.f32 %v1208_v2  ;;  %v4561_v29 = vmul.f32 -1.442695, %v6774_v22  ;;  %1266 = vadd.xlane.f32.xlu0 %v1265_v14  ;;  %v6785_v32 = vmul.f32 %v5410_v48, %v6708_v55 }
 0x410   : > { %v5414_v33 = vpop.eup %5413  ;;  %5431 = vrcp.f32 %v1207_v24  ;;  %v4560_v3 = vmul.f32 -1.442695, %v6779_v4  ;;  %v6789_v39 = vmul.f32 %v5412_v51, %v6711_v15 }
 0x411   : > { %v5416_v21 = vpop.eup %5415  ;;  %v1210_v34 = vadd.f32 1.0, %v5414_v33  ;;  %5433 = vpow2.f32 %v4561_v29  ;;  %v1274_v38 = vsel %vm682_vm0, %v6785_v32, 0.0 }
 0x412   : > { %v5418_v58 = vpop.eup %5417  ;;  %v1209_v9 = vadd.f32 1.0, %v5416_v21  ;;  %5435 = vpow2.f32 %v4560_v3  ;;  %1275 = vadd.xlane.f32.xlu1 %v1274_v38  ;;  %v1271_v55 = vsel %vm682_vm0, %v6789_v39, 0.0 }
 0x413   : > { %v5420_v25 = vpop.eup %5419  ;;  %5437 = vrcp.f32 %v1210_v34  ;;  %1272 = vadd.xlane.f32.xlu0 %v1271_v55  ;;  %v6796_v63 = vmul.f32 %v5418_v58, %v6718_v20 }
 0x414   : > { %v5422_v15 = vpop.eup %5421  ;;  %5439 = vrcp.f32 %v1209_v9  ;;  %v6799_v26 = vmul.f32 %v5420_v25, %v6721_v27 }
 0x415   : > { %v5424_v47 = vpop.eup %5423  ;;  %v1212_v57 = vadd.f32 1.0, %v5422_v15  ;;  %v1280_v54 = vsel %vm682_vm0, %v6796_v63, 0.0 }
 0x416   : > { %v1211_v16 = vadd.f32 1.0, %v5424_v47  ;;  %1281 = vadd.xlane.f32.xlu1 %v1280_v54  ;;  %v1277_v23 = vsel %vm682_vm0, %v6799_v26, 0.0 }
 0x417   : > { %v5426_v12 = vpop.eup %5425  ;;  %5441 = vrcp.f32 %v1212_v57  ;;  %1278 = vadd.xlane.f32.xlu0 %v1277_v23 }
 0x418   : > { %v5428_v20 = vpop.eup %5427  ;;  %5443 = vrcp.f32 %v1211_v16  ;;  %v1214_v19 = vadd.f32 1.0, %v5426_v12 }
 0x419   : > { %v5430_v2 = vpop.eup %5429  ;;  %v1213_v45 = vadd.f32 1.0, %v5428_v20 }
 0x41a   : > { %v5432_v27 = vpop.eup %5431  ;;  %5445 = vrcp.f32 %v1214_v19  ;;  %v6806_v48 = vmul.f32 %v5430_v2, %v6728_v43 }
 0x41b   : > { %v5434_v24 = vpop.eup %5433  ;;  %5447 = vrcp.f32 %v1213_v45  ;;  %v6809_v14 = vmul.f32 %v5432_v27, %v6731_v62  ;;  %v4562_v45 = vld [vmem:[%s9017_s3 + $0x40] sm:$0xff] }
 0x41c   : > { %v5436_v51 = vpop.eup %5435  ;;  %v1216_v29 = vadd.f32 1.0, %v5434_v24  ;;  %v1286_v33 = vsel %vm682_vm0, %v6806_v48, 0.0  ;;  %v4565_v24 = vld [vmem:[%s9017_s3 + $0x58] sm:$0xff] }
 0x41d   : > { %v5438_v3 = vpop.eup %5437  ;;  %v1215_v21 = vadd.f32 1.0, %v5436_v51  ;;  %1287 = vadd.xlane.f32.xlu1 %v1286_v33  ;;  %v1283_v34 = vsel %vm682_vm0, %v6809_v14, 0.0 }
 0x41e   : > { %v5440_v38 = vpop.eup %5439  ;;  %5449 = vrcp.f32 %v1216_v29  ;;  %1284 = vadd.xlane.f32.xlu0 %v1283_v34  ;;  %v6816_v43 = vmul.f32 %v5438_v3, %v6738_v11 }
 0x41f   : > { %5451 = vrcp.f32 %v1215_v21  ;;  %v6819_v62 = vmul.f32 %v5440_v38, %v6741_v5 }
 0x420   : > { %v1292_v58 = vsel %vm682_vm0, %v6816_v43, 0.0 }
 0x421   : > { %v5442_v9 = vpop.eup %5441  ;;  %1293 = vadd.xlane.f32.xlu1 %v1292_v58  ;;  %v1289_v55 = vsel %vm682_vm0, %v6819_v62, 0.0 }
 0x422   : > { %v5444_v25 = vpop.eup %5443  ;;  %1290 = vadd.xlane.f32.xlu0 %v1289_v55  ;;  %v6826_v15 = vmul.f32 %v5442_v9, %v6748_v31 }
 0x423   : > { %v6829_v11 = vmul.f32 %v5444_v25, %v6751_v59 }
 0x424   : > { %v5446_v47 = vpop.eup %5445  ;;  %v1298_v5 = vsel %vm682_vm0, %v6826_v15, 0.0 }
 0x425   : > { %v5448_v57 = vpop.eup %5447  ;;  %1299 = vadd.xlane.f32.xlu1 %v1298_v5  ;;  %v1295_v54 = vsel %vm682_vm0, %v6829_v11, 0.0  ;;  %v6836_v16 = vmul.f32 %v5446_v47, %v6758_v49 }
 0x426   : > { %1296 = vadd.xlane.f32.xlu0 %v1295_v54  ;;  %v6839_v23 = vmul.f32 %v5448_v57, %v6761_v30 }
 0x427   : > { %v1304_v31 = vsel %vm682_vm0, %v6836_v16, 0.0 }
 0x428   : > { %v5450_v59 = vpop.eup %5449  ;;  %v1301_v12 = vsel %vm682_vm0, %v6839_v23, 0.0 }
 0x429   : > { %v5452_v20 = vpop.eup %5451  ;;  %1305 = vadd.xlane.f32.xlu1 %v1304_v31  ;;  %v6846_v19 = vmul.f32 %v5450_v59, %v6774_v22  ;;  %v4563_v22 = vld [vmem:[%s9017_s3 + $0x48] sm:$0xff] }
 0x42a   : > { %1302 = vadd.xlane.f32.xlu0 %v1301_v12  ;;  %v6849_v49 = vmul.f32 %v5452_v20, %v6779_v4  ;;  %v4564_v4 = vld [vmem:[%s9017_s3 + $0x50] sm:$0xff]  ;;  %v5156_v27 = vpack.c.bf16 %v4563_v22, %v4562_v45 }
 0x42b   : > { %v1310_v30 = vsel %vm682_vm0, %v6846_v19, 0.0  ;;  %v5160_v51 = vpack.c.bf16 %v4565_v24, %v4564_v4 }
 0x42c   : > { %v1307_v2 = vsel %vm682_vm0, %v6849_v49, 0.0  ;;  %5157 = vmatprep.subr.bf16.mxu1 %v5156_v27 }
 0x42d   : > { %1311 = vadd.xlane.f32.xlu1 %v1310_v30  ;;  %5159 = vmatpush3.bf16.msra.mxu1 %v5156_v27 }
 0x42e   : > { %1308 = vadd.xlane.f32.xlu0 %v1307_v2  ;;  %5161 = vmatprep.subr.bf16.mxu1 %v5160_v51 }
 0x431   : > { %5163 = vmatpush3.bf16.msra.mxu1 %v5160_v51 }
 0x49b   : > { %v1270_v29 = vpop.xlane.xlu1 %1269 }
 0x49c   : > { %v1314_v33 = vmul.f32 0.015625, %v1270_v29  ;;  %v1267_v3 = vpop.xlane.xlu0 %1266 }
 0x49d   : > { %v1313_v21 = vmul.f32 0.015625, %v1267_v3 }
 0x49e   : > { %v6868_v34 = vsub.f32 %v6766_v6, %v1314_v33 }
 0x49f   : > { %v6871_v38 = vsub.f32 %v6771_v18, %v1313_v21  ;;  %v1276_v58 = vpop.xlane.xlu1 %1275 }
 0x4a0   : > { %v1316_v9 = vmul.f32 0.015625, %v1276_v58  ;;  %v1273_v55 = vpop.xlane.xlu0 %1272  ;;  %v1346_v25 = vmul.f32 %v6868_v34, %v6868_v34 }
 0x4a1   : > { %v1315_v47 = vmul.f32 0.015625, %v1273_v55  ;;  %v1345_v5 = vmul.f32 %v6871_v38, %v6871_v38 }
 0x4a2   : > { %v6878_v57 = vsub.f32 %v6785_v32, %v1316_v9  ;;  %v1364_v54 = vsel %vm682_vm0, %v1346_v25, 0.0 }
 0x4a3   : > { %v6882_v6 = vsub.f32 %v6789_v39, %v1315_v47  ;;  %v1282_v18 = vpop.xlane.xlu1 %1281  ;;  %1365 = vadd.xlane.f32.xlu1 %v1364_v54  ;;  %v1361_v31 = vsel %vm682_vm0, %v1345_v5, 0.0 }
 0x4a4   : > { %v1318_v59 = vmul.f32 0.015625, %v1282_v18  ;;  %1362 = vadd.xlane.f32.xlu0 %v1361_v31  ;;  %v1279_v12 = vpop.xlane.xlu0 %1278  ;;  %v1348_v20 = vmul.f32 %v6878_v57, %v6878_v57 }
 0x4a5   : > { %v1317_v30 = vmul.f32 0.015625, %v1279_v12  ;;  %v1347_v32 = vmul.f32 %v6882_v6, %v6882_v6 }
 0x4a6   : > { %v6890_v2 = vsub.f32 %v6796_v63, %v1318_v59  ;;  %v1370_v39 = vsel %vm682_vm0, %v1348_v20, 0.0 }
 0x4a7   : > { %v6894_v45 = vsub.f32 %v6799_v26, %v1317_v30  ;;  %1371 = vadd.xlane.f32.xlu1 %v1370_v39  ;;  %v1367_v22 = vsel %vm682_vm0, %v1347_v32, 0.0 }
 0x4a8   : > { %1368 = vadd.xlane.f32.xlu0 %v1367_v22  ;;  %v1350_v4 = vmul.f32 %v6890_v2, %v6890_v2 }
 0x4a9   : > { %v1349_v27 = vmul.f32 %v6894_v45, %v6894_v45 }
 0x4aa   : > { %v1288_v24 = vpop.xlane.xlu1 %1287  ;;  %v1376_v51 = vsel %vm682_vm0, %v1350_v4, 0.0 }
 0x4ab   : > { %v1320_v63 = vmul.f32 0.015625, %v1288_v24  ;;  %v1285_v29 = vpop.xlane.xlu0 %1284  ;;  %1377 = vadd.xlane.f32.xlu1 %v1376_v51  ;;  %v1373_v33 = vsel %vm682_vm0, %v1349_v27, 0.0 }
 0x4ac   : > { %v1319_v26 = vmul.f32 0.015625, %v1285_v29  ;;  %1374 = vadd.xlane.f32.xlu0 %v1373_v33 }
 0x4ad   : > { %v6904_v3 = vsub.f32 %v6806_v48, %v1320_v63 }
 0x4ae   : > { %v6907_v21 = vsub.f32 %v6809_v14, %v1319_v26  ;;  %v1294_v58 = vpop.xlane.xlu1 %1293 }
 0x4af   : > { %v1322_v9 = vmul.f32 0.015625, %v1294_v58  ;;  %v1291_v55 = vpop.xlane.xlu0 %1290  ;;  %v1352_v25 = vmul.f32 %v6904_v3, %v6904_v3 }
 0x4b0   : > { %v1321_v47 = vmul.f32 0.015625, %v1291_v55  ;;  %v1351_v5 = vmul.f32 %v6907_v21, %v6907_v21 }
 0x4b1   : > { %v6914_v54 = vsub.f32 %v6816_v43, %v1322_v9  ;;  %v1382_v18 = vsel %vm682_vm0, %v1352_v25, 0.0 }
 0x4b2   : > { %v6918_v48 = vsub.f32 %v6819_v62, %v1321_v47  ;;  %v1300_v14 = vpop.xlane.xlu1 %1299  ;;  %1383 = vadd.xlane.f32.xlu1 %v1382_v18  ;;  %v1379_v31 = vsel %vm682_vm0, %v1351_v5, 0.0 }
 0x4b3   : > { %v1324_v59 = vmul.f32 0.015625, %v1300_v14  ;;  %1380 = vadd.xlane.f32.xlu0 %v1379_v31  ;;  %v1297_v12 = vpop.xlane.xlu0 %1296  ;;  %v1354_v20 = vmul.f32 %v6914_v54, %v6914_v54 }
 0x4b4   : > { %v1323_v30 = vmul.f32 0.015625, %v1297_v12  ;;  %v1353_v43 = vmul.f32 %v6918_v48, %v6918_v48  ;;  %v4567_v12 = vld [vmem:[%s9017_s3 + $0x68] sm:$0xff] }
 0x4b5   : > { %v6926_v32 = vsub.f32 %v6826_v15, %v1324_v59  ;;  %v1388_v62 = vsel %vm682_vm0, %v1354_v20, 0.0 }
 0x4b6   : > { %v6930_v39 = vsub.f32 %v6829_v11, %v1323_v30  ;;  %v1306_v22 = vpop.xlane.xlu1 %1305  ;;  %1389 = vadd.xlane.f32.xlu1 %v1388_v62  ;;  %v1385_v4 = vsel %vm682_vm0, %v1353_v43, 0.0  ;;  %v4568_v43 = vld [vmem:[%s9017_s3 + $0x70] sm:$0xff]  ;;  %v4569_v62 = vld [vmem:[%s9017_s3 + $0x78] sm:$0xff] }
 0x4b7   : > { %v1326_v27 = vmul.f32 0.015625, %v1306_v22  ;;  %1386 = vadd.xlane.f32.xlu0 %v1385_v4  ;;  %v1303_v24 = vpop.xlane.xlu0 %1302  ;;  %v1356_v51 = vmul.f32 %v6926_v32, %v6926_v32  ;;  %v5168_v22 = vpack.c.bf16 %v4569_v62, %v4568_v43 }
 0x4b8   : > { %v1325_v63 = vmul.f32 0.015625, %v1303_v24  ;;  %v1355_v15 = vmul.f32 %v6930_v39, %v6930_v39 }
 0x4b9   : > { %v6938_v29 = vsub.f32 %v6836_v16, %v1326_v27  ;;  %v1394_v11 = vsel %vm682_vm0, %v1356_v51, 0.0 }
 0x4ba   : > { %v6942_v33 = vsub.f32 %v6839_v23, %v1325_v63  ;;  %1395 = vadd.xlane.f32.xlu1 %v1394_v11  ;;  %v1312_v26 = vpop.xlane.xlu1 %1311  ;;  %v1391_v58 = vsel %vm682_vm0, %v1355_v15, 0.0 }
 0x4bb   : > { %v1328_v9 = vmul.f32 0.015625, %v1312_v26  ;;  %1392 = vadd.xlane.f32.xlu0 %v1391_v58  ;;  %v1309_v55 = vpop.xlane.xlu0 %1308  ;;  %v1358_v25 = vmul.f32 %v6938_v29, %v6938_v29 }
 0x4bc   : > { %v1327_v47 = vmul.f32 0.015625, %v1309_v55  ;;  %v1357_v16 = vmul.f32 %v6942_v33, %v6942_v33 }
 0x4bd   : > { %v6950_v5 = vsub.f32 %v6846_v19, %v1328_v9  ;;  %v1400_v23 = vsel %vm682_vm0, %v1358_v25, 0.0  ;;  %v4566_v19 = vld [vmem:[%s9017_s3 + $0x60] sm:$0xff] }
 0x4be   : > { %v6954_v18 = vsub.f32 %v6849_v49, %v1327_v47  ;;  %1401 = vadd.xlane.f32.xlu1 %v1400_v23  ;;  %v1397_v14 = vsel %vm682_vm0, %v1357_v16, 0.0  ;;  %v5164_v20 = vpack.c.bf16 %v4567_v12, %v4566_v19  ;;  %v1495_v12 = vsub.s32 3, %v6289_v35 }
 0x4bf   : > { %1398 = vadd.xlane.f32.xlu0 %v1397_v14  ;;  %v1360_v31 = vmul.f32 %v6950_v5, %v6950_v5  ;;  %v1475_v14 = vsub.s32 6, %v6289_v35 }
 0x4c0   : > { %v1359_v59 = vmul.f32 %v6954_v18, %v6954_v18  ;;  %5165 = vmatprep.subr.bf16.mxu1 %v5164_v20 }
 0x4c1   : > { %v1406_v49 = vsel %vm682_vm0, %v1360_v31, 0.0  ;;  %5167 = vmatpush3.bf16.msra.mxu1 %v5164_v20 }
 0x4c2   : > { %1407 = vadd.xlane.f32.xlu1 %v1406_v49  ;;  %v1403_v30 = vsel %vm682_vm0, %v1359_v59, 0.0  ;;  %5169 = vmatprep.subr.bf16.mxu1 %v5168_v22  ;;  %v6977_v49 = vld [vmem:[#allocation4] sm:$0xff] }
 0x4c3   : > { %1404 = vadd.xlane.f32.xlu0 %v1403_v30  ;;  %v6982_v20 = vrot.slane %v6977_v49, %v1475_v14 }
 0x4c5   : > { %5171 = vmatpush3.bf16.msra.mxu1 %v5168_v22 }
 0x530   : > { %v1366_v4 = vpop.xlane.xlu1 %1365 }
 0x531   : > { %v1410_v27 = vmul.f32 0.015625, %v1366_v4  ;;  %v1363_v24 = vpop.xlane.xlu0 %1362 }
 0x532   : > { %v1409_v51 = vmul.f32 0.015625, %v1363_v24 }
 0x533   : > { %v1426_v63 = vadd.f32 0.1, %v1410_v27 }
 0x534   : > { %v1425_v15 = vadd.f32 0.1, %v1409_v51  ;;  %v1372_v11 = vpop.xlane.xlu1 %1371 }
 0x535   : > { %5453 = vrsqrt.f32 %v1426_v63  ;;  %v1412_v26 = vmul.f32 0.015625, %v1372_v11  ;;  %v1369_v58 = vpop.xlane.xlu0 %1368  ;;  %v6989_v63 = vrot.slane %v6565_v17, %v1495_v12 }
 0x536   : > { %5455 = vrsqrt.f32 %v1425_v15  ;;  %v1411_v9 = vmul.f32 0.015625, %v1369_v58 }
 0x537   : > { %v1428_v55 = vadd.f32 0.1, %v1412_v26 }
 0x538   : > { %v1427_v25 = vadd.f32 0.1, %v1411_v9  ;;  %v1378_v47 = vpop.xlane.xlu1 %1377 }
 0x539   : > { %5457 = vrsqrt.f32 %v1428_v55  ;;  %v1414_v16 = vmul.f32 0.015625, %v1378_v47  ;;  %v1375_v23 = vpop.xlane.xlu0 %1374 }
 0x53a   : > { %5459 = vrsqrt.f32 %v1427_v25  ;;  %v1413_v31 = vmul.f32 0.015625, %v1375_v23 }
 0x53b   : > { %v1430_v59 = vadd.f32 0.1, %v1414_v16 }
 0x53c   : > { %v1429_v19 = vadd.f32 0.1, %v1413_v31 }
 0x53d   : > { %5461 = vrsqrt.f32 %v1430_v59 }
 0x53e   : > { %5463 = vrsqrt.f32 %v1429_v19 }
 0x53f   : > { %v5454_v30 = vpop.eup %5453  ;;  %v1384_v43 = vpop.xlane.xlu1 %1383 }
 0x540   : > { %v5456_v62 = vpop.eup %5455  ;;  %v1458_v22 = vmul.f32 %v5454_v30, %v6868_v34  ;;  %v1416_v4 = vmul.f32 0.015625, %v1384_v43  ;;  %v1381_v27 = vpop.xlane.xlu0 %1380 }
 0x541   : > { %v1415_v24 = vmul.f32 0.015625, %v1381_v27  ;;  %v1457_v51 = vmul.f32 %v5456_v62, %v6871_v38 }
 0x542   : > { %v1478_v15 = vmul.f32 %v6982_v20, %v1458_v22  ;;  %v1432_v11 = vadd.f32 0.1, %v1416_v4 }
 0x543   : > { %v5458_v26 = vpop.eup %5457  ;;  %v1431_v58 = vadd.f32 0.1, %v1415_v24  ;;  %v1390_v9 = vpop.xlane.xlu1 %1389  ;;  %v1477_v55 = vmul.f32 %v6982_v20, %v1457_v51 }
 0x544   : > { %v5460_v25 = vpop.eup %5459  ;;  %5465 = vrsqrt.f32 %v1432_v11  ;;  %v1418_v34 = vmul.f32 0.015625, %v1390_v9  ;;  %v1387_v47 = vpop.xlane.xlu0 %1386  ;;  %v1460_v16 = vmul.f32 %v5458_v26, %v6878_v57  ;;  %v6999_v59 = vadd.f32 %v6989_v63, %v1478_v15 }
 0x545   : > { %5467 = vrsqrt.f32 %v1431_v58  ;;  %v1417_v38 = vmul.f32 0.015625, %v1387_v47  ;;  %v6995_v23 = vadd.f32 %v6989_v63, %v1477_v55  ;;  %v1459_v17 = vmul.f32 %v5460_v25, %v6882_v6 }
 0x546   : > { %v1434_v31 = vadd.f32 0.1, %v1418_v34  ;;  %v1480_v19 = vmul.f32 %v6982_v20, %v1460_v16 }
 0x547   : > { %v5462_v30 = vpop.eup %5461  ;;  %v1433_v43 = vadd.f32 0.1, %v1417_v38  ;;  %v1396_v62 = vpop.xlane.xlu1 %1395  ;;  %4964 = vmatprep.mubr.msk.f32.mxu1 %vm682_vm0, %v6995_v23  ;;  %v1479_v57 = vmul.f32 %v6982_v20, %v1459_v17 }
 0x548   : > { %v5464_v22 = vpop.eup %5463  ;;  %5469 = vrsqrt.f32 %v1434_v31  ;;  %v1420_v4 = vmul.f32 0.015625, %v1396_v62  ;;  %v1393_v27 = vpop.xlane.xlu0 %1392  ;;  %4965 = vmatmul.mubr.msk.f32.vlgmr.msra.gmra.mrb[16].mxu1 %vm682_vm0, %v6999_v59  ;;  %v1462_v6 = vmul.f32 %v5462_v30, %v6890_v2  ;;  %v7013_v26 = vadd.f32 %v6989_v63, %v1480_v19 }
 0x549   : > { %5471 = vrsqrt.f32 %v1433_v43  ;;  %v1419_v24 = vmul.f32 0.015625, %v1393_v27  ;;  %v7009_v51 = vadd.f32 %v6989_v63, %v1479_v57  ;;  %v1461_v15 = vmul.f32 %v5464_v22, %v6894_v45 }
 0x54a   : > { %v1436_v11 = vadd.f32 0.1, %v1420_v4  ;;  %v1482_v58 = vmul.f32 %v6982_v20, %v1462_v6 }
 0x54b   : > { %v1435_v9 = vadd.f32 0.1, %v1419_v24  ;;  %v1402_v55 = vpop.xlane.xlu1 %1401  ;;  %4967 = vmatprep.mubr.msk.f32.mxu1 %vm682_vm0, %v7009_v51  ;;  %v1481_v2 = vmul.f32 %v6982_v20, %v1461_v15 }
 0x54c   : > { %5473 = vrsqrt.f32 %v1436_v11  ;;  %v1422_v25 = vmul.f32 0.015625, %v1402_v55  ;;  %v1399_v34 = vpop.xlane.xlu0 %1398  ;;  %4968 = vmatmul.mubr.msk.f32.gmra.mrb[18].mxu1 %vm682_vm0, %v7013_v26  ;;  %v7025_v17 = vadd.f32 %v6989_v63, %v1482_v58 }
 0x54d   : > { %5475 = vrsqrt.f32 %v1435_v9  ;;  %v1421_v45 = vmul.f32 0.015625, %v1399_v34  ;;  %v7022_v47 = vadd.f32 %v6989_v63, %v1481_v2 }
 0x54e   : > { %v5466_v16 = vpop.eup %5465  ;;  %v1438_v38 = vadd.f32 0.1, %v1422_v25 }
 0x54f   : > { %v5468_v31 = vpop.eup %5467  ;;  %v1437_v19 = vadd.f32 0.1, %v1421_v45  ;;  %v1408_v30 = vpop.xlane.xlu1 %1407  ;;  %4970 = vmatprep.mubr.msk.f32.mxu1 %vm682_vm0, %v7022_v47  ;;  %v1464_v43 = vmul.f32 %v5466_v16, %v6904_v3 }
 0x550   : > { %5477 = vrsqrt.f32 %v1438_v38  ;;  %v1424_v62 = vmul.f32 0.015625, %v1408_v30  ;;  %v1405_v57 = vpop.xlane.xlu0 %1404  ;;  %4971 = vmatmul.mubr.msk.f32.gmra.mrb[20].mxu1 %vm682_vm0, %v7025_v17  ;;  %v1463_v22 = vmul.f32 %v5468_v31, %v6907_v21 }
 0x551   : > { %5479 = vrsqrt.f32 %v1437_v19  ;;  %v1423_v4 = vmul.f32 0.015625, %v1405_v57  ;;  %v1484_v27 = vmul.f32 %v6982_v20, %v1464_v43 }
 0x552   : > { %v5470_v6 = vpop.eup %5469  ;;  %v1440_v24 = vadd.f32 0.1, %v1424_v62  ;;  %v1483_v15 = vmul.f32 %v6982_v20, %v1463_v22 }
 0x553   : > { %v5472_v11 = vpop.eup %5471  ;;  %v1439_v58 = vadd.f32 0.1, %v1423_v4  ;;  %v1466_v3 = vmul.f32 %v5470_v6, %v6914_v54  ;;  %v7041_v21 = vadd.f32 %v6989_v63, %v1484_v27 }
 0x554   : > { %5481 = vrsqrt.f32 %v1440_v24  ;;  %v7037_v9 = vadd.f32 %v6989_v63, %v1483_v15  ;;  %v1465_v55 = vmul.f32 %v5472_v11, %v6918_v48 }
 0x555   : > { %5483 = vrsqrt.f32 %v1439_v58  ;;  %v1486_v2 = vmul.f32 %v6982_v20, %v1466_v3 }
 0x556   : > { %v5474_v25 = vpop.eup %5473  ;;  %4973 = vmatprep.mubr.msk.f32.mxu1 %vm682_vm0, %v7037_v9  ;;  %v1485_v34 = vmul.f32 %v6982_v20, %v1465_v55  ;;  %v7108_v55 = vadd.f32 %v6999_v59, %v6587_v40  ;;  %v7125_v40 = vadd.f32 %v7013_v26, %v6601_v41 }
 0x557   : > { %v5476_v45 = vpop.eup %5475  ;;  %4974 = vmatmul.mubr.msk.f32.gmra.mrb[22].mxu1 %vm682_vm0, %v7041_v21  ;;  %v1468_v54 = vmul.f32 %v5474_v25, %v6926_v32  ;;  %v7055_v38 = vadd.f32 %v6989_v63, %v1486_v2  ;;  %v7113_v25 = vadd.f32 %v6995_v23, %v6583_v37  ;;  %v7131_v23 = vadd.f32 %v7009_v51, %v6597_v61 }
 0x558   : > { %v7051_v48 = vadd.f32 %v6989_v63, %v1485_v34  ;;  %v1467_v16 = vmul.f32 %v5476_v45, %v6930_v39 }
 0x559   : > { %v1488_v31 = vmul.f32 %v6982_v20, %v1468_v54 }
 0x55a   : > { %v5478_v19 = vpop.eup %5477  ;;  %4976 = vmatprep.mubr.msk.f32.mxu1 %vm682_vm0, %v7051_v48  ;;  %v1487_v30 = vmul.f32 %v6982_v20, %v1467_v16 }
 0x55b   : > { %v5480_v43 = vpop.eup %5479  ;;  %4977 = vmatmul.mubr.msk.f32.gmra.mrb[24].mxu1 %vm682_vm0, %v7055_v38  ;;  %v1470_v32 = vmul.f32 %v5478_v19, %v6938_v29  ;;  %v7069_v57 = vadd.f32 %v6989_v63, %v1488_v31 }
 0x55c   : > { %v7065_v62 = vadd.f32 %v6989_v63, %v1487_v30  ;;  %v1469_v39 = vmul.f32 %v5480_v43, %v6942_v33 }
 0x55d   : > { %v1490_v22 = vmul.f32 %v6982_v20, %v1470_v32  ;;  %v7143_v32 = vadd.f32 %v7025_v17, %v6614_v1 }
 0x55e   : > { %v5482_v4 = vpop.eup %5481  ;;  %4979 = vmatprep.mubr.msk.f32.mxu1 %vm682_vm0, %v7065_v62  ;;  %v1489_v27 = vmul.f32 %v6982_v20, %v1469_v39 }
 0x55f   : > { %v5484_v6 = vpop.eup %5483  ;;  %4980 = vmatmul.mubr.msk.f32.gmra.mrb[26].mxu1 %vm682_vm0, %v7069_v57  ;;  %v1472_v29 = vmul.f32 %v5482_v4, %v6950_v5  ;;  %v7083_v15 = vadd.f32 %v6989_v63, %v1490_v22  ;;  %v7149_v22 = vadd.f32 %v7022_v47, %v6611_v13  ;;  %v7162_v13 = vadd.f32 %v7041_v21, %v6629_v7 }
 0x560   : > { %v7079_v24 = vadd.f32 %v6989_v63, %v1489_v27  ;;  %v1471_v33 = vmul.f32 %v5484_v6, %v6954_v18  ;;  %v7104_v18 = vrot.slane %v6977_v49, %v914_v42 }
 0x561   : > { %v1492_v11 = vmul.f32 %v6982_v20, %v1472_v29 }
 0x562   : > { %4982 = vmatprep.mubr.msk.f32.mxu1 %vm682_vm0, %v7079_v24  ;;  %v1491_v58 = vmul.f32 %v6982_v20, %v1471_v33 }
 0x563   : > { %4983 = vmatmul.mubr.msk.f32.gmra.mrb[28].mxu1 %vm682_vm0, %v7083_v15  ;;  %v7095_v3 = vadd.f32 %v6989_v63, %v1492_v11 }
 0x564   : > { %v7092_v5 = vadd.f32 %v6989_v63, %v1491_v58  ;;  %v7167_v58 = vadd.f32 %v7037_v9, %v6625_v0 }
 0x566   : > { %4985 = vmatprep.mubr.msk.f32.mxu1 %vm682_vm0, %v7092_v5 }
 0x567   : > { %4986 = vmatmul.mubr.msk.f32.gmra.mrb[30].mxu1 %vm682_vm0, %v7095_v3 }
 0x61b   : > { %v4966_v20 = vpop.f32.mrb[16].mxu1 }
 0x61c   : > { %v1662_v2 = vadd.f32 %v4966_v20, %v7104_v18  ;;  %v1656_v63 = vpop.f32.mrb[17].mxu1 }
 0x61d   : > { %v1657_v34 = vadd.f32 %v1656_v63, %v7104_v18 }
 0x61e   : > { %v7117_v45 = vadd.f32 %v1662_v2, %v7108_v55 }
 0x61f   : > { %v7120_v42 = vadd.f32 %v1657_v34, %v7113_v25  ;;  %v4969_v54 = vpop.f32.mrb[18].mxu1 }
 0x620   : > { %v4587_v16 = vmul.f32 -1.442695, %v7117_v45  ;;  %v1672_v59 = vadd.f32 %v4969_v54, %v7104_v18  ;;  %v1666_v31 = vpop.f32.mrb[19].mxu1 }
 0x621   : > { %v4586_v37 = vmul.f32 -1.442695, %v7120_v42  ;;  %v1667_v19 = vadd.f32 %v1666_v31, %v7104_v18 }
 0x622   : > { %5485 = vpow2.f32 %v4587_v16  ;;  %v7135_v30 = vadd.f32 %v1672_v59, %v7125_v40  ;;  %v7179_v59 = vadd.f32 %v7055_v38, %v6643_v28 }
 0x623   : > { %5487 = vpow2.f32 %v4586_v37  ;;  %v7138_v43 = vadd.f32 %v1667_v19, %v7131_v23  ;;  %v4972_v41 = vpop.f32.mrb[20].mxu1  ;;  %v7185_v19 = vadd.f32 %v7051_v48, %v6639_v56  ;;  %v7197_v56 = vadd.f32 %v7069_v57, %v6657_v53 }
 0x624   : > { %v4589_v26 = vmul.f32 -1.442695, %v7135_v30  ;;  %v1682_v61 = vadd.f32 %v4972_v41, %v7104_v18  ;;  %v1676_v51 = vpop.f32.mrb[21].mxu1 }
 0x625   : > { %v4588_v39 = vmul.f32 -1.442695, %v7138_v43  ;;  %v1677_v4 = vadd.f32 %v1676_v51, %v7104_v18 }
 0x626   : > { %5489 = vpow2.f32 %v4589_v26  ;;  %v7153_v27 = vadd.f32 %v1682_v61, %v7143_v32 }
 0x627   : > { %5491 = vpow2.f32 %v4588_v39  ;;  %v7156_v6 = vadd.f32 %v1677_v4, %v7149_v22 }
 0x628   : > { %v4591_v1 = vmul.f32 -1.442695, %v7153_v27 }
 0x629   : > { %v4590_v17 = vmul.f32 -1.442695, %v7156_v6 }
 0x62a   : > { %5493 = vpow2.f32 %v4591_v1  ;;  %v4975_v29 = vpop.f32.mrb[22].mxu1 }
 0x62b   : > { %5495 = vpow2.f32 %v4590_v17  ;;  %v1692_v47 = vadd.f32 %v4975_v29, %v7104_v18  ;;  %v1686_v33 = vpop.f32.mrb[23].mxu1 }
 0x62c   : > { %v5486_v11 = vpop.eup %5485  ;;  %v1687_v20 = vadd.f32 %v1686_v33, %v7104_v18 }
 0x62d   : > { %v5488_v2 = vpop.eup %5487  ;;  %v1800_v63 = vadd.f32 1.0, %v5486_v11  ;;  %v7171_v34 = vadd.f32 %v1692_v47, %v7162_v13  ;;  %v7203_v47 = vadd.f32 %v7065_v62, %v6653_v52  ;;  %v7215_v52 = vadd.f32 %v7083_v15, %v6671_v46 }
 0x62e   : > { %v1799_v54 = vadd.f32 1.0, %v5488_v2  ;;  %v7174_v16 = vadd.f32 %v1687_v20, %v7167_v58  ;;  %v4978_v7 = vpop.f32.mrb[24].mxu1  ;;  %v7232_v15 = vadd.f32 %v7095_v3, %v6683_v10 }
 0x62f   : > { %5497 = vrcp.f32 %v1800_v63  ;;  %v4593_v21 = vmul.f32 -1.442695, %v7171_v34  ;;  %v1702_v0 = vadd.f32 %v4978_v7, %v7104_v18  ;;  %v1696_v9 = vpop.f32.mrb[25].mxu1 }
 0x630   : > { %v5490_v31 = vpop.eup %5489  ;;  %5499 = vrcp.f32 %v1799_v54  ;;  %v4592_v37 = vmul.f32 -1.442695, %v7174_v16  ;;  %v1697_v41 = vadd.f32 %v1696_v9, %v7104_v18 }
 0x631   : > { %v5492_v26 = vpop.eup %5491  ;;  %v1802_v61 = vadd.f32 1.0, %v5490_v31  ;;  %5501 = vpow2.f32 %v4593_v21  ;;  %v7189_v51 = vadd.f32 %v1702_v0, %v7179_v59  ;;  %v7221_v0 = vadd.f32 %v7079_v24, %v6667_v36 }
 0x632   : > { %v1801_v28 = vadd.f32 1.0, %v5492_v26  ;;  %5503 = vpow2.f32 %v4592_v37  ;;  %v7192_v38 = vadd.f32 %v1697_v41, %v7185_v19  ;;  %v4981_v39 = vpop.f32.mrb[26].mxu1 }
 0x633   : > { %5505 = vrcp.f32 %v1802_v61  ;;  %v4595_v4 = vmul.f32 -1.442695, %v7189_v51  ;;  %v1712_v48 = vadd.f32 %v4981_v39, %v7104_v18  ;;  %v1706_v1 = vpop.f32.mrb[27].mxu1  ;;  %v7241_v39 = vadd.f32 %v7092_v5, %v6680_v60 }
 0x634   : > { %v5494_v17 = vpop.eup %5493  ;;  %5507 = vrcp.f32 %v1801_v28  ;;  %v4594_v29 = vmul.f32 -1.442695, %v7192_v38  ;;  %v1707_v33 = vadd.f32 %v1706_v1, %v7104_v18 }
 0x635   : > { %v5496_v11 = vpop.eup %5495  ;;  %v1804_v20 = vadd.f32 1.0, %v5494_v17  ;;  %5509 = vpow2.f32 %v4595_v4  ;;  %v7207_v2 = vadd.f32 %v1712_v48, %v7197_v56 }
 0x636   : > { %v1803_v53 = vadd.f32 1.0, %v5496_v11  ;;  %5511 = vpow2.f32 %v4594_v29  ;;  %v7210_v57 = vadd.f32 %v1707_v33, %v7203_v47  ;;  %v4984_v63 = vpop.f32.mrb[28].mxu1 }
 0x637   : > { %5513 = vrcp.f32 %v1804_v20  ;;  %v4597_v54 = vmul.f32 -1.442695, %v7207_v2  ;;  %v1722_v62 = vadd.f32 %v4984_v63, %v7104_v18  ;;  %v1716_v7 = vpop.f32.mrb[29].mxu1 }
 0x638   : > { %5515 = vrcp.f32 %v1803_v53  ;;  %v4596_v21 = vmul.f32 -1.442695, %v7210_v57  ;;  %v1717_v9 = vadd.f32 %v1716_v7, %v7104_v18 }
 0x639   : > { %v5498_v31 = vpop.eup %5497  ;;  %5517 = vpow2.f32 %v4597_v54  ;;  %v7225_v37 = vadd.f32 %v1722_v62, %v7215_v52 }
 0x63a   : > { %v5500_v41 = vpop.eup %5499  ;;  %5519 = vpow2.f32 %v4596_v21  ;;  %v7228_v46 = vadd.f32 %v1717_v9, %v7221_v0  ;;  %v4987_v26 = vpop.f32.mrb[30].mxu1  ;;  %v7235_v36 = vmul.f32 %v5498_v31, %v7117_v45 }
 0x63b   : > { %v5502_v24 = vpop.eup %5501  ;;  %v4599_v61 = vmul.f32 -1.442695, %v7225_v37  ;;  %v1732_v28 = vadd.f32 %v4987_v26, %v7104_v18  ;;  %v1726_v4 = vpop.f32.mrb[31].mxu1  ;;  %v7244_v48 = vmul.f32 %v5500_v41, %v7120_v42 }
 0x63c   : > { %v5504_v1 = vpop.eup %5503  ;;  %v1806_v10 = vadd.f32 1.0, %v5502_v24  ;;  %v4598_v3 = vmul.f32 -1.442695, %v7228_v46  ;;  %v1727_v45 = vadd.f32 %v1726_v4, %v7104_v18  ;;  %v1866_v17 = vsel %vm682_vm0, %v7235_v36, 0.0 }
 0x63d   : > { %v5506_v29 = vpop.eup %5505  ;;  %v1805_v33 = vadd.f32 1.0, %v5504_v1  ;;  %5521 = vpow2.f32 %v4599_v61  ;;  %v7251_v11 = vadd.f32 %v1732_v28, %v7232_v15  ;;  %1867 = vadd.xlane.f32.xlu1 %v1866_v17  ;;  %v1863_v60 = vsel %vm682_vm0, %v7244_v48, 0.0 }
 0x63e   : > { %v5508_v5 = vpop.eup %5507  ;;  %5523 = vrcp.f32 %v1806_v10  ;;  %v7256_v42 = vadd.f32 %v1727_v45, %v7241_v39  ;;  %1864 = vadd.xlane.f32.xlu0 %v1863_v60  ;;  %v7259_v18 = vmul.f32 %v5506_v29, %v7135_v30 }
 0x63f   : > { %v5510_v20 = vpop.eup %5509  ;;  %5525 = vrcp.f32 %v1805_v33  ;;  %v4601_v53 = vmul.f32 -1.442695, %v7251_v11  ;;  %v7263_v63 = vmul.f32 %v5508_v5, %v7138_v43 }
 0x640   : > { %v5512_v54 = vpop.eup %5511  ;;  %v1808_v62 = vadd.f32 1.0, %v5510_v20  ;;  %5527 = vpow2.f32 %v4598_v3  ;;  %v4600_v7 = vmul.f32 -1.442695, %v7256_v42  ;;  %v1872_v21 = vsel %vm682_vm0, %v7259_v18, 0.0 }
 0x641   : > { %v5514_v9 = vpop.eup %5513  ;;  %v1807_v31 = vadd.f32 1.0, %v5512_v54  ;;  %5529 = vpow2.f32 %v4601_v53  ;;  %1873 = vadd.xlane.f32.xlu1 %v1872_v21  ;;  %v1869_v30 = vsel %vm682_vm0, %v7263_v63, 0.0 }
 0x642   : > { %v5516_v41 = vpop.eup %5515  ;;  %5531 = vrcp.f32 %v1808_v62  ;;  %1870 = vadd.xlane.f32.xlu0 %v1869_v30  ;;  %v7271_v43 = vmul.f32 %v5514_v9, %v7153_v27 }
 0x643   : > { %v5518_v26 = vpop.eup %5517  ;;  %5533 = vrcp.f32 %v1807_v31  ;;  %v7274_v24 = vmul.f32 %v5516_v41, %v7156_v6 }
 0x644   : > { %v5520_v61 = vpop.eup %5519  ;;  %v1810_v28 = vadd.f32 1.0, %v5518_v26  ;;  %5535 = vpow2.f32 %v4600_v7  ;;  %v1878_v4 = vsel %vm682_vm0, %v7271_v43, 0.0 }
 0x645   : > { %v1809_v1 = vadd.f32 1.0, %v5520_v61  ;;  %1879 = vadd.xlane.f32.xlu1 %v1878_v4  ;;  %v1875_v10 = vsel %vm682_vm0, %v7274_v24, 0.0 }
 0x646   : > { %5537 = vrcp.f32 %v1810_v28  ;;  %1876 = vadd.xlane.f32.xlu0 %v1875_v10 }
 0x647   : > { %v5522_v27 = vpop.eup %5521  ;;  %5539 = vrcp.f32 %v1809_v1 }
 0x648   : > { %v5524_v3 = vpop.eup %5523  ;;  %v1812_v45 = vadd.f32 1.0, %v5522_v27 }
 0x649   : > { %v5526_v17 = vpop.eup %5525  ;;  %v7281_v6 = vmul.f32 %v5524_v3, %v7171_v34 }
 0x64a   : > { %v5528_v29 = vpop.eup %5527  ;;  %5541 = vrcp.f32 %v1812_v45  ;;  %v7284_v33 = vmul.f32 %v5526_v17, %v7174_v16 }
 0x64b   : > { %v5530_v60 = vpop.eup %5529  ;;  %v1811_v5 = vadd.f32 1.0, %v5528_v29  ;;  %v1884_v20 = vsel %vm682_vm0, %v7281_v6, 0.0 }
 0x64c   : > { %v5532_v53 = vpop.eup %5531  ;;  %v1814_v54 = vadd.f32 1.0, %v5530_v60  ;;  %1885 = vadd.xlane.f32.xlu1 %v1884_v20  ;;  %v1881_v62 = vsel %vm682_vm0, %v7284_v33, 0.0 }
 0x64d   : > { %v5534_v7 = vpop.eup %5533  ;;  %5543 = vrcp.f32 %v1811_v5  ;;  %1882 = vadd.xlane.f32.xlu0 %v1881_v62  ;;  %v7291_v34 = vmul.f32 %v5532_v53, %v7189_v51  ;;  %v4604_v5 = vld [vmem:[%s9017_s3 + $0x90] sm:$0xff] }
 0x64e   : > { %v5536_v21 = vpop.eup %5535  ;;  %5545 = vrcp.f32 %v1814_v54  ;;  %v7294_v16 = vmul.f32 %v5534_v7, %v7192_v38 }
 0x64f   : > { %v1813_v9 = vadd.f32 1.0, %v5536_v21  ;;  %v1890_v31 = vsel %vm682_vm0, %v7291_v34, 0.0 }
 0x650   : > { %v5538_v30 = vpop.eup %5537  ;;  %1891 = vadd.xlane.f32.xlu1 %v1890_v31  ;;  %v1887_v41 = vsel %vm682_vm0, %v7294_v16, 0.0 }
 0x651   : > { %v5540_v26 = vpop.eup %5539  ;;  %5547 = vrcp.f32 %v1813_v9  ;;  %1888 = vadd.xlane.f32.xlu0 %v1887_v41  ;;  %v7301_v51 = vmul.f32 %v5538_v30, %v7207_v2 }
 0x652   : > { %v7304_v61 = vmul.f32 %v5540_v26, %v7210_v57 }
 0x653   : > { %v1896_v38 = vsel %vm682_vm0, %v7301_v51, 0.0 }
 0x654   : > { %v5542_v28 = vpop.eup %5541  ;;  %1897 = vadd.xlane.f32.xlu1 %v1896_v38  ;;  %v1893_v4 = vsel %vm682_vm0, %v7304_v61, 0.0 }
 0x655   : > { %1894 = vadd.xlane.f32.xlu0 %v1893_v4  ;;  %v7311_v1 = vmul.f32 %v5542_v28, %v7225_v37 }
 0x657   : > { %v5544_v10 = vpop.eup %5543  ;;  %v1902_v2 = vsel %vm682_vm0, %v7311_v1, 0.0 }
 0x658   : > { %v5546_v27 = vpop.eup %5545  ;;  %1903 = vadd.xlane.f32.xlu1 %v1902_v2  ;;  %v7316_v57 = vmul.f32 %v5544_v10, %v7228_v46  ;;  %v4602_v46 = vld [vmem:[%s9017_s3 + $0x80] sm:$0xff] }
 0x659   : > { %v7319_v3 = vmul.f32 %v5546_v27, %v7251_v11  ;;  %v4603_v11 = vld [vmem:[%s9017_s3 + $0x88] sm:$0xff] }
 0x65a   : > { %v1899_v45 = vsel %vm682_vm0, %v7316_v57, 0.0  ;;  %v5172_v20 = vpack.c.bf16 %v4603_v11, %v4602_v46 }
 0x65b   : > { %v5548_v17 = vpop.eup %5547  ;;  %1900 = vadd.xlane.f32.xlu0 %v1899_v45  ;;  %v1908_v37 = vsel %vm682_vm0, %v7319_v3, 0.0 }
 0x65c   : > { %1909 = vadd.xlane.f32.xlu1 %v1908_v37  ;;  %v7326_v29 = vmul.f32 %v5548_v17, %v7256_v42  ;;  %v4605_v42 = vld [vmem:[%s9017_s3 + $0x98] sm:$0xff]  ;;  %5173 = vmatprep.subr.bf16.mxu0 %v5172_v20 }
 0x65d   : > { %v5176_v53 = vpack.c.bf16 %v4605_v42, %v4604_v5  ;;  %5175 = vmatpush3.bf16.msra.mxu0 %v5172_v20 }
 0x65e   : > { %v1905_v60 = vsel %vm682_vm0, %v7326_v29, 0.0 }
 0x65f   : > { %1906 = vadd.xlane.f32.xlu0 %v1905_v60  ;;  %5177 = vmatprep.subr.bf16.mxu0 %v5176_v53 }
 0x661   : > { %5179 = vmatpush3.bf16.msra.mxu0 %v5176_v53 }
 0x6ca   : > { %v1868_v54 = vpop.xlane.xlu1 %1867 }
 0x6cb   : > { %v1912_v62 = vmul.f32 0.015625, %v1868_v54  ;;  %v1865_v7 = vpop.xlane.xlu0 %1864 }
 0x6cc   : > { %v1911_v21 = vmul.f32 0.015625, %v1865_v7 }
 0x6cd   : > { %v7343_v9 = vsub.f32 %v7235_v36, %v1912_v62 }
 0x6ce   : > { %v7346_v31 = vsub.f32 %v7244_v48, %v1911_v21  ;;  %v1874_v30 = vpop.xlane.xlu1 %1873 }
 0x6cf   : > { %v1914_v41 = vmul.f32 0.015625, %v1874_v30  ;;  %v1871_v26 = vpop.xlane.xlu0 %1870  ;;  %v1944_v38 = vmul.f32 %v7343_v9, %v7343_v9 }
 0x6d0   : > { %v1913_v28 = vmul.f32 0.015625, %v1871_v26  ;;  %v1943_v4 = vmul.f32 %v7346_v31, %v7346_v31 }
 0x6d1   : > { %v7353_v10 = vsub.f32 %v7259_v18, %v1914_v41  ;;  %v1962_v2 = vsel %vm682_vm0, %v1944_v38, 0.0 }
 0x6d2   : > { %v7357_v36 = vsub.f32 %v7263_v63, %v1913_v28  ;;  %v1880_v48 = vpop.xlane.xlu1 %1879  ;;  %1963 = vadd.xlane.f32.xlu1 %v1962_v2  ;;  %v1959_v27 = vsel %vm682_vm0, %v1943_v4, 0.0 }
 0x6d3   : > { %v1916_v45 = vmul.f32 0.015625, %v1880_v48  ;;  %1960 = vadd.xlane.f32.xlu0 %v1959_v27  ;;  %v1877_v17 = vpop.xlane.xlu0 %1876  ;;  %v1946_v37 = vmul.f32 %v7353_v10, %v7353_v10 }
 0x6d4   : > { %v1915_v60 = vmul.f32 0.015625, %v1877_v17  ;;  %v1945_v18 = vmul.f32 %v7357_v36, %v7357_v36 }
 0x6d5   : > { %v7365_v46 = vsub.f32 %v7271_v43, %v1916_v45  ;;  %v1968_v63 = vsel %vm682_vm0, %v1946_v37, 0.0 }
 0x6d6   : > { %v7369_v11 = vsub.f32 %v7274_v24, %v1915_v60  ;;  %1969 = vadd.xlane.f32.xlu1 %v1968_v63  ;;  %v1965_v5 = vsel %vm682_vm0, %v1945_v18, 0.0 }
 0x6d7   : > { %1966 = vadd.xlane.f32.xlu0 %v1965_v5  ;;  %v1948_v20 = vmul.f32 %v7365_v46, %v7365_v46 }
 0x6d8   : > { %v1947_v42 = vmul.f32 %v7369_v11, %v7369_v11 }
 0x6d9   : > { %v1886_v53 = vpop.xlane.xlu1 %1885  ;;  %v1974_v54 = vsel %vm682_vm0, %v1948_v20, 0.0 }
 0x6da   : > { %v1918_v43 = vmul.f32 0.015625, %v1886_v53  ;;  %v1883_v62 = vpop.xlane.xlu0 %1882  ;;  %1975 = vadd.xlane.f32.xlu1 %v1974_v54  ;;  %v1971_v7 = vsel %vm682_vm0, %v1947_v42, 0.0 }
 0x6db   : > { %v1917_v24 = vmul.f32 0.015625, %v1883_v62  ;;  %1972 = vadd.xlane.f32.xlu0 %v1971_v7 }
 0x6dc   : > { %v7379_v21 = vsub.f32 %v7281_v6, %v1918_v43 }
 0x6dd   : > { %v7382_v30 = vsub.f32 %v7284_v33, %v1917_v24  ;;  %v1892_v41 = vpop.xlane.xlu1 %1891 }
 0x6de   : > { %v1920_v26 = vmul.f32 0.015625, %v1892_v41  ;;  %v1889_v38 = vpop.xlane.xlu0 %1888  ;;  %v1950_v28 = vmul.f32 %v7379_v21, %v7379_v21 }
 0x6df   : > { %v1919_v4 = vmul.f32 0.015625, %v1889_v38  ;;  %v1949_v2 = vmul.f32 %v7382_v30, %v7382_v30 }
 0x6e0   : > { %v7389_v48 = vsub.f32 %v7291_v34, %v1920_v26  ;;  %v1980_v27 = vsel %vm682_vm0, %v1950_v28, 0.0 }
 0x6e1   : > { %v7393_v6 = vsub.f32 %v7294_v16, %v1919_v4  ;;  %v1898_v33 = vpop.xlane.xlu1 %1897  ;;  %1981 = vadd.xlane.f32.xlu1 %v1980_v27  ;;  %v1977_v45 = vsel %vm682_vm0, %v1949_v2, 0.0 }
 0x6e2   : > { %v1922_v17 = vmul.f32 0.015625, %v1898_v33  ;;  %1978 = vadd.xlane.f32.xlu0 %v1977_v45  ;;  %v1895_v37 = vpop.xlane.xlu0 %1894  ;;  %v1952_v60 = vmul.f32 %v7389_v48, %v7389_v48 }
 0x6e3   : > { %v1921_v18 = vmul.f32 0.015625, %v1895_v37  ;;  %v1951_v34 = vmul.f32 %v7393_v6, %v7393_v6 }
 0x6e4   : > { %v7401_v63 = vsub.f32 %v7301_v51, %v1922_v17  ;;  %v1986_v16 = vsel %vm682_vm0, %v1952_v60, 0.0  ;;  %v4606_v60 = vld [vmem:[%s9017_s3 + $0xa0] sm:$0xff] }
 0x6e5   : > { %v7405_v5 = vsub.f32 %v7304_v61, %v1921_v18  ;;  %v1904_v20 = vpop.xlane.xlu1 %1903  ;;  %1987 = vadd.xlane.f32.xlu1 %v1986_v16  ;;  %v1983_v42 = vsel %vm682_vm0, %v1951_v34, 0.0  ;;  %v4607_v18 = vld [vmem:[%s9017_s3 + $0xa8] sm:$0xff]  ;;  %v4608_v16 = vld [vmem:[%s9017_s3 + $0xb0] sm:$0xff] }
 0x6e6   : > { %v1924_v53 = vmul.f32 0.015625, %v1904_v20  ;;  %1984 = vadd.xlane.f32.xlu0 %v1983_v42  ;;  %v1954_v54 = vmul.f32 %v7401_v63, %v7401_v63  ;;  %v5180_v34 = vpack.c.bf16 %v4607_v18, %v4606_v60  ;;  %v4609_v20 = vld [vmem:[%s9017_s3 + $0xb8] sm:$0xff]  ;;  %v2093_v18 = vsub.s32 4, %v6289_v35 }
 0x6e7   : > { %v1953_v43 = vmul.f32 %v7405_v5, %v7405_v5  ;;  %v5184_v42 = vpack.c.bf16 %v4609_v20, %v4608_v16 }
 0x6e8   : > { %v7413_v51 = vsub.f32 %v7311_v1, %v1924_v53  ;;  %v1901_v62 = vpop.xlane.xlu0 %1900  ;;  %v1992_v7 = vsel %vm682_vm0, %v1954_v54, 0.0  ;;  %5181 = vmatprep.subr.bf16.mxu0 %v5180_v34 }
 0x6e9   : > { %v1923_v61 = vmul.f32 0.015625, %v1901_v62  ;;  %1993 = vadd.xlane.f32.xlu1 %v1992_v7  ;;  %v1910_v24 = vpop.xlane.xlu1 %1909  ;;  %v1989_v41 = vsel %vm682_vm0, %v1953_v43, 0.0  ;;  %5183 = vmatpush3.bf16.msra.mxu0 %v5180_v34 }
 0x6ea   : > { %v1926_v26 = vmul.f32 0.015625, %v1910_v24  ;;  %1990 = vadd.xlane.f32.xlu0 %v1989_v41  ;;  %v1956_v38 = vmul.f32 %v7413_v51, %v7413_v51  ;;  %5185 = vmatprep.subr.bf16.mxu0 %v5184_v42 }
 0x6eb   : > { %v7420_v28 = vsub.f32 %v7316_v57, %v1923_v61 }
 0x6ec   : > { %v7423_v4 = vsub.f32 %v7319_v3, %v1926_v26  ;;  %v1907_v1 = vpop.xlane.xlu0 %1906  ;;  %v1998_v2 = vsel %vm682_vm0, %v1956_v38, 0.0 }
 0x6ed   : > { %v1925_v27 = vmul.f32 0.015625, %v1907_v1  ;;  %1999 = vadd.xlane.f32.xlu1 %v1998_v2  ;;  %v1955_v33 = vmul.f32 %v7420_v28, %v7420_v28  ;;  %5187 = vmatpush3.bf16.msra.mxu0 %v5184_v42 }
 0x6ee   : > { %v1958_v45 = vmul.f32 %v7423_v4, %v7423_v4 }
 0x6ef   : > { %v7431_v17 = vsub.f32 %v7326_v29, %v1925_v27  ;;  %v1995_v57 = vsel %vm682_vm0, %v1955_v33, 0.0 }
 0x6f0   : > { %1996 = vadd.xlane.f32.xlu0 %v1995_v57  ;;  %v2004_v3 = vsel %vm682_vm0, %v1958_v45, 0.0  ;;  %v2073_v57 = vsub.s32 7, %v6289_v35 }
 0x6f1   : > { %2005 = vadd.xlane.f32.xlu1 %v2004_v3  ;;  %v1957_v37 = vmul.f32 %v7431_v17, %v7431_v17 }
 0x6f2   : > { %v7455_v34 = vrot.slane %v6977_v49, %v2073_v57 }
 0x6f3   : > { %v2001_v29 = vsel %vm682_vm0, %v1957_v37, 0.0 }
 0x6f4   : > { %2002 = vadd.xlane.f32.xlu0 %v2001_v29 }
 0x75f   : > { %v1964_v53 = vpop.xlane.xlu1 %1963 }
 0x760   : > { %v2008_v54 = vmul.f32 0.015625, %v1964_v53  ;;  %v1961_v43 = vpop.xlane.xlu0 %1960 }
 0x761   : > { %v2007_v62 = vmul.f32 0.015625, %v1961_v43 }
 0x762   : > { %v2024_v7 = vadd.f32 0.1, %v2008_v54 }
 0x763   : > { %v2023_v61 = vadd.f32 0.1, %v2007_v62  ;;  %v1970_v24 = vpop.xlane.xlu1 %1969 }
 0x764   : > { %5549 = vrsqrt.f32 %v2024_v7  ;;  %v2010_v41 = vmul.f32 0.015625, %v1970_v24  ;;  %v1967_v26 = vpop.xlane.xlu0 %1966  ;;  %v7459_v7 = vld [vmem:[#allocation4 + $0x8] sm:$0xff] }
 0x765   : > { %5551 = vrsqrt.f32 %v2023_v61  ;;  %v2009_v38 = vmul.f32 0.015625, %v1967_v26  ;;  %v7464_v61 = vrot.slane %v7459_v7, %v2093_v18 }
 0x766   : > { %v2026_v1 = vadd.f32 0.1, %v2010_v41 }
 0x767   : > { %v2025_v2 = vadd.f32 0.1, %v2009_v38  ;;  %v1976_v27 = vpop.xlane.xlu1 %1975 }
 0x768   : > { %5553 = vrsqrt.f32 %v2026_v1  ;;  %v2012_v33 = vmul.f32 0.015625, %v1976_v27  ;;  %v1973_v45 = vpop.xlane.xlu0 %1972 }
 0x769   : > { %5555 = vrsqrt.f32 %v2025_v2  ;;  %v2011_v3 = vmul.f32 0.015625, %v1973_v45 }
 0x76a   : > { %v2028_v37 = vadd.f32 0.1, %v2012_v33 }
 0x76b   : > { %v2027_v60 = vadd.f32 0.1, %v2011_v3 }
 0x76c   : > { %5557 = vrsqrt.f32 %v2028_v37 }
 0x76d   : > { %5559 = vrsqrt.f32 %v2027_v60 }
 0x76e   : > { %v5550_v29 = vpop.eup %5549  ;;  %v1982_v16 = vpop.xlane.xlu1 %1981 }
 0x76f   : > { %v5552_v20 = vpop.eup %5551  ;;  %v2056_v42 = vmul.f32 %v5550_v29, %v7343_v9  ;;  %v2014_v53 = vmul.f32 0.015625, %v1982_v16  ;;  %v1979_v54 = vpop.xlane.xlu0 %1978 }
 0x770   : > { %v2013_v43 = vmul.f32 0.015625, %v1979_v54  ;;  %v2055_v62 = vmul.f32 %v5552_v20, %v7346_v31 }
 0x771   : > { %v2076_v49 = vmul.f32 %v7455_v34, %v2056_v42  ;;  %v2030_v24 = vadd.f32 0.1, %v2014_v53 }
 0x772   : > { %v5554_v41 = vpop.eup %5553  ;;  %v2029_v26 = vadd.f32 0.1, %v2013_v43  ;;  %v1988_v38 = vpop.xlane.xlu1 %1987  ;;  %v2075_v9 = vmul.f32 %v7455_v34, %v2055_v62 }
 0x773   : > { %v5556_v1 = vpop.eup %5555  ;;  %5561 = vrsqrt.f32 %v2030_v24  ;;  %v2016_v2 = vmul.f32 0.015625, %v1988_v38  ;;  %v1985_v27 = vpop.xlane.xlu0 %1984  ;;  %v2058_v31 = vmul.f32 %v5554_v41, %v7353_v10  ;;  %v7474_v60 = vadd.f32 %v7464_v61, %v2076_v49 }
 0x774   : > { %5563 = vrsqrt.f32 %v2029_v26  ;;  %v2015_v33 = vmul.f32 0.015625, %v1985_v27  ;;  %v7470_v45 = vadd.f32 %v7464_v61, %v2075_v9  ;;  %v2057_v3 = vmul.f32 %v5556_v1, %v7357_v36 }
 0x775   : > { %v2032_v37 = vadd.f32 0.1, %v2016_v2  ;;  %v2078_v29 = vmul.f32 %v7455_v34, %v2058_v31 }
 0x776   : > { %v5558_v16 = vpop.eup %5557  ;;  %v2031_v20 = vadd.f32 0.1, %v2015_v33  ;;  %v1994_v42 = vpop.xlane.xlu1 %1993  ;;  %5004 = vmatprep.mubr.msk.f32.mxu0 %vm682_vm0, %v7470_v45  ;;  %v2077_v10 = vmul.f32 %v7455_v34, %v2057_v3 }
 0x777   : > { %v5560_v53 = vpop.eup %5559  ;;  %5565 = vrsqrt.f32 %v2032_v37  ;;  %v2018_v54 = vmul.f32 0.015625, %v1994_v42  ;;  %v1991_v43 = vpop.xlane.xlu0 %1990  ;;  %5005 = vmatmul.mubr.msk.f32.vlgmr.msra.gmra.mrb[16].mxu0 %vm682_vm0, %v7474_v60  ;;  %v2060_v36 = vmul.f32 %v5558_v16, %v7365_v46  ;;  %v7488_v26 = vadd.f32 %v7464_v61, %v2078_v29 }
 0x778   : > { %5567 = vrsqrt.f32 %v2031_v20  ;;  %v2017_v62 = vmul.f32 0.015625, %v1991_v43  ;;  %v7484_v49 = vadd.f32 %v7464_v61, %v2077_v10  ;;  %v2059_v24 = vmul.f32 %v5560_v53, %v7369_v11 }
 0x779   : > { %v2034_v41 = vadd.f32 0.1, %v2018_v54  ;;  %v2080_v38 = vmul.f32 %v7455_v34, %v2060_v36 }
 0x77a   : > { %v2033_v9 = vadd.f32 0.1, %v2017_v62  ;;  %v2000_v1 = vpop.xlane.xlu1 %1999  ;;  %5007 = vmatprep.mubr.msk.f32.mxu0 %vm682_vm0, %v7484_v49  ;;  %v2079_v46 = vmul.f32 %v7455_v34, %v2059_v24 }
 0x77b   : > { %5569 = vrsqrt.f32 %v2034_v41  ;;  %v2020_v2 = vmul.f32 0.015625, %v2000_v1  ;;  %5008 = vmatmul.mubr.msk.f32.gmra.mrb[18].mxu0 %vm682_vm0, %v7488_v26  ;;  %v7500_v3 = vadd.f32 %v7464_v61, %v2080_v38 }
 0x77c   : > { %5571 = vrsqrt.f32 %v2033_v9  ;;  %v7497_v11 = vadd.f32 %v7464_v61, %v2079_v46 }
 0x77d   : > { %v5562_v27 = vpop.eup %5561  ;;  %v2036_v31 = vadd.f32 0.1, %v2020_v2  ;;  %v1997_v33 = vpop.xlane.xlu0 %1996 }
 0x77e   : > { %v5564_v37 = vpop.eup %5563  ;;  %v2019_v29 = vmul.f32 0.015625, %v1997_v33  ;;  %v2006_v16 = vpop.xlane.xlu1 %2005  ;;  %5010 = vmatprep.mubr.msk.f32.mxu0 %vm682_vm0, %v7497_v11  ;;  %v2062_v20 = vmul.f32 %v5562_v27, %v7379_v21 }
 0x77f   : > { %5573 = vrsqrt.f32 %v2036_v31  ;;  %v2022_v42 = vmul.f32 0.015625, %v2006_v16  ;;  %5011 = vmatmul.mubr.msk.f32.gmra.mrb[20].mxu0 %vm682_vm0, %v7500_v3  ;;  %v2061_v10 = vmul.f32 %v5564_v37, %v7382_v30 }
 0x780   : > { %v2035_v53 = vadd.f32 0.1, %v2019_v29  ;;  %v2082_v54 = vmul.f32 %v7455_v34, %v2062_v20 }
 0x781   : > { %v5566_v43 = vpop.eup %5565  ;;  %v2038_v36 = vadd.f32 0.1, %v2022_v42  ;;  %v2003_v62 = vpop.xlane.xlu0 %2002  ;;  %v2081_v24 = vmul.f32 %v7455_v34, %v2061_v10 }
 0x782   : > { %v5568_v41 = vpop.eup %5567  ;;  %5575 = vrsqrt.f32 %v2035_v53  ;;  %v2021_v38 = vmul.f32 0.015625, %v2003_v62  ;;  %v2064_v21 = vmul.f32 %v5566_v43, %v7389_v48  ;;  %v7516_v46 = vadd.f32 %v7464_v61, %v2082_v54 }
 0x783   : > { %5577 = vrsqrt.f32 %v2038_v36  ;;  %v7512_v9 = vadd.f32 %v7464_v61, %v2081_v24  ;;  %v2063_v1 = vmul.f32 %v5568_v41, %v7393_v6 }
 0x784   : > { %v2037_v30 = vadd.f32 0.1, %v2021_v38  ;;  %v2084_v2 = vmul.f32 %v7455_v34, %v2064_v21 }
 0x785   : > { %v5570_v27 = vpop.eup %5569  ;;  %5013 = vmatprep.mubr.msk.f32.mxu0 %vm682_vm0, %v7512_v9  ;;  %v2083_v31 = vmul.f32 %v7455_v34, %v2063_v1 }
 0x786   : > { %v5572_v33 = vpop.eup %5571  ;;  %5579 = vrsqrt.f32 %v2037_v30  ;;  %5014 = vmatmul.mubr.msk.f32.gmra.mrb[22].mxu0 %vm682_vm0, %v7516_v46  ;;  %v2066_v48 = vmul.f32 %v5570_v27, %v7401_v63  ;;  %v7530_v29 = vadd.f32 %v7464_v61, %v2084_v2  ;;  %v7585_v27 = vadd.f32 %v7474_v60, %v7108_v55 }
 0x787   : > { %v7526_v6 = vadd.f32 %v7464_v61, %v2083_v31  ;;  %v2065_v37 = vmul.f32 %v5572_v33, %v7405_v5  ;;  %v7590_v33 = vadd.f32 %v7470_v45, %v7113_v25  ;;  %v7602_v55 = vadd.f32 %v7488_v26, %v7125_v40 }
 0x788   : > { %v2086_v16 = vmul.f32 %v7455_v34, %v2066_v48  ;;  %v7608_v45 = vadd.f32 %v7484_v49, %v7131_v23 }
 0x789   : > { %v5574_v20 = vpop.eup %5573  ;;  %5016 = vmatprep.mubr.msk.f32.mxu0 %vm682_vm0, %v7526_v6  ;;  %v2085_v42 = vmul.f32 %v7455_v34, %v2065_v37 }
 0x78a   : > { %5017 = vmatmul.mubr.msk.f32.gmra.mrb[24].mxu0 %vm682_vm0, %v7530_v29  ;;  %v2068_v63 = vmul.f32 %v5574_v20, %v7413_v51  ;;  %v7543_v53 = vadd.f32 %v7464_v61, %v2086_v16 }
 0x78b   : > { %v7540_v10 = vadd.f32 %v7464_v61, %v2085_v42 }
 0x78c   : > { %v5576_v5 = vpop.eup %5575  ;;  %v2088_v36 = vmul.f32 %v7455_v34, %v2068_v63 }
 0x78d   : > { %v5578_v54 = vpop.eup %5577  ;;  %5019 = vmatprep.mubr.msk.f32.mxu0 %vm682_vm0, %v7540_v10  ;;  %v2067_v43 = vmul.f32 %v5576_v5, %v7420_v28 }
 0x78e   : > { %5020 = vmatmul.mubr.msk.f32.gmra.mrb[26].mxu0 %vm682_vm0, %v7543_v53  ;;  %v2070_v51 = vmul.f32 %v5578_v54, %v7423_v4  ;;  %v7558_v21 = vadd.f32 %v7464_v61, %v2088_v36 }
 0x78f   : > { %v2087_v62 = vmul.f32 %v7455_v34, %v2067_v43  ;;  %v7620_v43 = vadd.f32 %v7500_v3, %v7143_v32 }
 0x790   : > { %v5580_v24 = vpop.eup %5579  ;;  %v2090_v28 = vmul.f32 %v7455_v34, %v2070_v51  ;;  %v7626_v51 = vadd.f32 %v7497_v11, %v7149_v22  ;;  %v7639_v22 = vadd.f32 %v7516_v46, %v7162_v13 }
 0x791   : > { %v7554_v41 = vadd.f32 %v7464_v61, %v2087_v62  ;;  %v2069_v38 = vmul.f32 %v5580_v24, %v7431_v17  ;;  %v7576_v17 = vld [vmem:[#allocation4] sm:$0xff] }
 0x792   : > { %v7570_v30 = vadd.f32 %v7464_v61, %v2090_v28 }
 0x793   : > { %5022 = vmatprep.mubr.msk.f32.mxu0 %vm682_vm0, %v7554_v41  ;;  %v2089_v1 = vmul.f32 %v7455_v34, %v2069_v38  ;;  %v7581_v34 = vrot.slane %v7576_v17, %v1495_v12 }
 0x794   : > { %5023 = vmatmul.mubr.msk.f32.gmra.mrb[28].mxu0 %vm682_vm0, %v7558_v21 }
 0x795   : > { %v7567_v4 = vadd.f32 %v7464_v61, %v2089_v1 }
 0x797   : > { %5025 = vmatprep.mubr.msk.f32.mxu0 %vm682_vm0, %v7567_v4 }
 0x798   : > { %5026 = vmatmul.mubr.msk.f32.gmra.mrb[30].mxu0 %vm682_vm0, %v7570_v30 }
 0x84a   : > { %v5006_v2 = vpop.f32.mrb[16].mxu0 }
 0x84b   : > { %v2260_v61 = vadd.f32 %v5006_v2, %v7581_v34  ;;  %v2254_v31 = vpop.f32.mrb[17].mxu0 }
 0x84c   : > { %v2255_v48 = vadd.f32 %v2254_v31, %v7581_v34 }
 0x84d   : > { %v7594_v37 = vadd.f32 %v2260_v61, %v7585_v27  ;;  %v7644_v61 = vadd.f32 %v7512_v9, %v7167_v58 }
 0x84e   : > { %v7597_v12 = vadd.f32 %v2255_v48, %v7590_v33  ;;  %v5009_v16 = vpop.f32.mrb[18].mxu0 }
 0x84f   : > { %v4627_v20 = vmul.f32 -1.442695, %v7594_v37  ;;  %v2270_v60 = vadd.f32 %v5009_v16, %v7581_v34  ;;  %v2264_v42 = vpop.f32.mrb[19].mxu0 }
 0x850   : > { %v4626_v25 = vmul.f32 -1.442695, %v7597_v12  ;;  %v2265_v63 = vadd.f32 %v2264_v42, %v7581_v34 }
 0x851   : > { %5581 = vpow2.f32 %v4627_v20  ;;  %v7612_v5 = vadd.f32 %v2270_v60, %v7602_v55 }
 0x852   : > { %5583 = vpow2.f32 %v4626_v25  ;;  %v7615_v54 = vadd.f32 %v2265_v63, %v7608_v45  ;;  %v5012_v40 = vpop.f32.mrb[20].mxu0  ;;  %v7656_v25 = vadd.f32 %v7530_v29, %v7179_v59 }
 0x853   : > { %v4629_v26 = vmul.f32 -1.442695, %v7612_v5  ;;  %v2280_v23 = vadd.f32 %v5012_v40, %v7581_v34  ;;  %v2274_v49 = vpop.f32.mrb[21].mxu0 }
 0x854   : > { %v4628_v36 = vmul.f32 -1.442695, %v7615_v54  ;;  %v2275_v62 = vadd.f32 %v2274_v49, %v7581_v34 }
 0x855   : > { %5585 = vpow2.f32 %v4629_v26  ;;  %v7630_v24 = vadd.f32 %v2280_v23, %v7620_v43  ;;  %v7662_v26 = vadd.f32 %v7526_v6, %v7185_v19  ;;  %v7674_v19 = vadd.f32 %v7543_v53, %v7197_v56 }
 0x856   : > { %5587 = vpow2.f32 %v4628_v36  ;;  %v7633_v38 = vadd.f32 %v2275_v62, %v7626_v51 }
 0x857   : > { %v4631_v32 = vmul.f32 -1.442695, %v7630_v24 }
 0x858   : > { %v4630_v3 = vmul.f32 -1.442695, %v7633_v38 }
 0x859   : > { %5589 = vpow2.f32 %v4631_v32  ;;  %v5015_v28 = vpop.f32.mrb[22].mxu0 }
 0x85a   : > { %5591 = vpow2.f32 %v4630_v3  ;;  %v2290_v11 = vadd.f32 %v5015_v28, %v7581_v34  ;;  %v2284_v1 = vpop.f32.mrb[23].mxu0 }
 0x85b   : > { %v5582_v2 = vpop.eup %5581  ;;  %v2285_v31 = vadd.f32 %v2284_v1, %v7581_v34 }
 0x85c   : > { %v5584_v48 = vpop.eup %5583  ;;  %v2398_v16 = vadd.f32 1.0, %v5582_v2  ;;  %v7648_v20 = vadd.f32 %v2290_v11, %v7639_v22  ;;  %v7680_v2 = vadd.f32 %v7540_v10, %v7203_v47 }
 0x85d   : > { %v2397_v60 = vadd.f32 1.0, %v5584_v48  ;;  %v7651_v42 = vadd.f32 %v2285_v31, %v7644_v61  ;;  %v5018_v13 = vpop.f32.mrb[24].mxu0 }
 0x85e   : > { %5593 = vrcp.f32 %v2398_v16  ;;  %v4633_v46 = vmul.f32 -1.442695, %v7648_v20  ;;  %v2300_v58 = vadd.f32 %v5018_v13, %v7581_v34  ;;  %v2294_v9 = vpop.f32.mrb[25].mxu0 }
 0x85f   : > { %v5586_v63 = vpop.eup %5585  ;;  %5595 = vrcp.f32 %v2397_v60  ;;  %v4632_v40 = vmul.f32 -1.442695, %v7651_v42  ;;  %v2295_v23 = vadd.f32 %v2294_v9, %v7581_v34 }
 0x860   : > { %v5588_v49 = vpop.eup %5587  ;;  %v2400_v36 = vadd.f32 1.0, %v5586_v63  ;;  %5597 = vpow2.f32 %v4633_v46  ;;  %v7666_v62 = vadd.f32 %v2300_v58, %v7656_v25  ;;  %v7693_v58 = vadd.f32 %v7558_v21, %v7215_v52 }
 0x861   : > { %v2399_v59 = vadd.f32 1.0, %v5588_v49  ;;  %5599 = vpow2.f32 %v4632_v40  ;;  %v7669_v29 = vadd.f32 %v2295_v23, %v7662_v26  ;;  %v5021_v32 = vpop.f32.mrb[26].mxu0  ;;  %v7698_v23 = vadd.f32 %v7554_v41, %v7221_v0 }
 0x862   : > { %5601 = vrcp.f32 %v2400_v36  ;;  %v4635_v3 = vmul.f32 -1.442695, %v7666_v62  ;;  %v2310_v6 = vadd.f32 %v5021_v32, %v7581_v34  ;;  %v2304_v28 = vpop.f32.mrb[27].mxu0  ;;  %v7709_v52 = vadd.f32 %v7570_v30, %v7232_v15 }
 0x863   : > { %v5590_v11 = vpop.eup %5589  ;;  %5603 = vrcp.f32 %v2399_v59  ;;  %v4634_v1 = vmul.f32 -1.442695, %v7669_v29  ;;  %v2305_v31 = vadd.f32 %v2304_v28, %v7581_v34 }
 0x864   : > { %v5592_v48 = vpop.eup %5591  ;;  %v2402_v16 = vadd.f32 1.0, %v5590_v11  ;;  %5605 = vpow2.f32 %v4635_v3  ;;  %v7684_v60 = vadd.f32 %v2310_v6, %v7674_v19 }
 0x865   : > { %v2401_v56 = vadd.f32 1.0, %v5592_v48  ;;  %5607 = vpow2.f32 %v4634_v1  ;;  %v7687_v53 = vadd.f32 %v2305_v31, %v7680_v2 }
 0x866   : > { %5609 = vrcp.f32 %v2402_v16  ;;  %v4637_v13 = vmul.f32 -1.442695, %v7684_v60 }
 0x867   : > { %5611 = vrcp.f32 %v2401_v56  ;;  %v4636_v47 = vmul.f32 -1.442695, %v7687_v53  ;;  %v5024_v10 = vpop.f32.mrb[28].mxu0 }
 0x868   : > { %v5594_v46 = vpop.eup %5593  ;;  %5613 = vpow2.f32 %v4637_v13  ;;  %v2320_v9 = vadd.f32 %v5024_v10, %v7581_v34  ;;  %v2314_v63 = vpop.f32.mrb[29].mxu0 }
 0x869   : > { %v5596_v40 = vpop.eup %5595  ;;  %5615 = vpow2.f32 %v4636_v47  ;;  %v2315_v49 = vadd.f32 %v2314_v63, %v7581_v34  ;;  %v7702_v36 = vmul.f32 %v5594_v46, %v7594_v37  ;;  %v7719_v37 = vadd.f32 %v7567_v4, %v7241_v39 }
 0x86a   : > { %v5598_v59 = vpop.eup %5597  ;;  %v7705_v32 = vadd.f32 %v2320_v9, %v7693_v58  ;;  %v7712_v21 = vmul.f32 %v5596_v40, %v7597_v12 }
 0x86b   : > { %v5600_v3 = vpop.eup %5599  ;;  %v2404_v6 = vadd.f32 1.0, %v5598_v59  ;;  %v7715_v0 = vadd.f32 %v2315_v49, %v7698_v23  ;;  %v5027_v41 = vpop.f32.mrb[30].mxu0  ;;  %v2464_v28 = vsel %vm682_vm0, %v7702_v36, 0.0 }
 0x86c   : > { %v5602_v11 = vpop.eup %5601  ;;  %v2403_v1 = vadd.f32 1.0, %v5600_v3  ;;  %v4639_v15 = vmul.f32 -1.442695, %v7705_v32  ;;  %v2330_v30 = vadd.f32 %v5027_v41, %v7581_v34  ;;  %v2324_v12 = vpop.f32.mrb[31].mxu0  ;;  %2465 = vadd.xlane.f32.xlu1 %v2464_v28  ;;  %v2461_v31 = vsel %vm682_vm0, %v7712_v21, 0.0 }
 0x86d   : > { %v5604_v48 = vpop.eup %5603  ;;  %5617 = vrcp.f32 %v2404_v6  ;;  %v4638_v16 = vmul.f32 -1.442695, %v7715_v0  ;;  %v2325_v39 = vadd.f32 %v2324_v12, %v7581_v34  ;;  %2462 = vadd.xlane.f32.xlu0 %v2461_v31  ;;  %v7730_v4 = vmul.f32 %v5602_v11, %v7612_v5 }
 0x86e   : > { %v5606_v56 = vpop.eup %5605  ;;  %5619 = vrcp.f32 %v2403_v1  ;;  %v7733_v13 = vadd.f32 %v2330_v30, %v7709_v52  ;;  %v7736_v47 = vmul.f32 %v5604_v48, %v7615_v54 }
 0x86f   : > { %v5608_v10 = vpop.eup %5607  ;;  %v2406_v46 = vadd.f32 1.0, %v5606_v56  ;;  %5621 = vpow2.f32 %v4639_v15  ;;  %v7739_v9 = vadd.f32 %v2325_v39, %v7719_v37  ;;  %v2470_v34 = vsel %vm682_vm0, %v7730_v4, 0.0 }
 0x870   : > { %v5610_v63 = vpop.eup %5609  ;;  %v2405_v5 = vadd.f32 1.0, %v5608_v10  ;;  %5623 = vpow2.f32 %v4638_v16  ;;  %v4641_v40 = vmul.f32 -1.442695, %v7733_v13  ;;  %2471 = vadd.xlane.f32.xlu1 %v2470_v34  ;;  %v2467_v49 = vsel %vm682_vm0, %v7736_v47, 0.0 }
 0x871   : > { %v5612_v54 = vpop.eup %5611  ;;  %5625 = vrcp.f32 %v2406_v46  ;;  %v4640_v59 = vmul.f32 -1.442695, %v7739_v9  ;;  %2468 = vadd.xlane.f32.xlu0 %v2467_v49  ;;  %v7748_v3 = vmul.f32 %v5610_v63, %v7630_v24 }
 0x872   : > { %v5614_v6 = vpop.eup %5613  ;;  %5627 = vrcp.f32 %v2405_v5  ;;  %v7751_v41 = vmul.f32 %v5612_v54, %v7633_v38 }
 0x873   : > { %v5616_v28 = vpop.eup %5615  ;;  %v2408_v11 = vadd.f32 1.0, %v5614_v6  ;;  %5629 = vpow2.f32 %v4641_v40  ;;  %v2476_v1 = vsel %vm682_vm0, %v7748_v3, 0.0 }
 0x874   : > { %v2407_v15 = vadd.f32 1.0, %v5616_v28  ;;  %5631 = vpow2.f32 %v4640_v59  ;;  %2477 = vadd.xlane.f32.xlu1 %v2476_v1  ;;  %v2473_v30 = vsel %vm682_vm0, %v7751_v41, 0.0 }
 0x875   : > { %5633 = vrcp.f32 %v2408_v11  ;;  %2474 = vadd.xlane.f32.xlu0 %v2473_v30 }
 0x876   : > { %5635 = vrcp.f32 %v2407_v15 }
 0x877   : > { %v5618_v24 = vpop.eup %5617 }
 0x878   : > { %v5620_v12 = vpop.eup %5619  ;;  %v7758_v38 = vmul.f32 %v5618_v24, %v7648_v20 }
 0x879   : > { %v5622_v31 = vpop.eup %5621  ;;  %v7761_v48 = vmul.f32 %v5620_v12, %v7651_v42 }
 0x87a   : > { %v5624_v16 = vpop.eup %5623  ;;  %v2410_v39 = vadd.f32 1.0, %v5622_v31  ;;  %v2482_v56 = vsel %vm682_vm0, %v7758_v38, 0.0 }
 0x87b   : > { %v5626_v10 = vpop.eup %5625  ;;  %v2409_v46 = vadd.f32 1.0, %v5624_v16  ;;  %2483 = vadd.xlane.f32.xlu1 %v2482_v56  ;;  %v2479_v34 = vsel %vm682_vm0, %v7761_v48, 0.0 }
 0x87c   : > { %v5628_v63 = vpop.eup %5627  ;;  %5637 = vrcp.f32 %v2410_v39  ;;  %2480 = vadd.xlane.f32.xlu0 %v2479_v34  ;;  %v7768_v20 = vmul.f32 %v5626_v10, %v7666_v62 }
 0x87d   : > { %v5630_v5 = vpop.eup %5629  ;;  %5639 = vrcp.f32 %v2409_v46  ;;  %v7771_v42 = vmul.f32 %v5628_v63, %v7669_v29  ;;  %v4642_v46 = vld [vmem:[%s9017_s3 + $0xc0] sm:$0xff]  ;;  %v4645_v63 = vld [vmem:[%s9017_s3 + $0xd8] sm:$0xff] }
 0x87e   : > { %v5632_v40 = vpop.eup %5631  ;;  %v2412_v49 = vadd.f32 1.0, %v5630_v5  ;;  %v2488_v54 = vsel %vm682_vm0, %v7768_v20, 0.0 }
 0x87f   : > { %v5634_v59 = vpop.eup %5633  ;;  %v2411_v6 = vadd.f32 1.0, %v5632_v40  ;;  %2489 = vadd.xlane.f32.xlu1 %v2488_v54  ;;  %v2485_v28 = vsel %vm682_vm0, %v7771_v42, 0.0 }
 0x880   : > { %v5636_v11 = vpop.eup %5635  ;;  %5641 = vrcp.f32 %v2412_v49  ;;  %2486 = vadd.xlane.f32.xlu0 %v2485_v28  ;;  %v7778_v62 = vmul.f32 %v5634_v59, %v7684_v60 }
 0x881   : > { %5643 = vrcp.f32 %v2411_v6  ;;  %v7781_v29 = vmul.f32 %v5636_v11, %v7687_v53 }
 0x882   : > { %v2494_v1 = vsel %vm682_vm0, %v7778_v62, 0.0 }
 0x883   : > { %2495 = vadd.xlane.f32.xlu1 %v2494_v1  ;;  %v2491_v15 = vsel %vm682_vm0, %v7781_v29, 0.0 }
 0x884   : > { %2492 = vadd.xlane.f32.xlu0 %v2491_v15 }
 0x886   : > { %v5638_v30 = vpop.eup %5637 }
 0x887   : > { %v5640_v24 = vpop.eup %5639  ;;  %v7788_v12 = vmul.f32 %v5638_v30, %v7705_v32 }
 0x888   : > { %v7791_v60 = vmul.f32 %v5640_v24, %v7715_v0 }
 0x889   : > { %v2500_v53 = vsel %vm682_vm0, %v7788_v12, 0.0 }
 0x88a   : > { %v5642_v31 = vpop.eup %5641  ;;  %2501 = vadd.xlane.f32.xlu1 %v2500_v53  ;;  %v2497_v16 = vsel %vm682_vm0, %v7791_v60, 0.0 }
 0x88b   : > { %v5644_v39 = vpop.eup %5643  ;;  %2498 = vadd.xlane.f32.xlu0 %v2497_v16  ;;  %v7798_v56 = vmul.f32 %v5642_v31, %v7733_v13  ;;  %v4643_v13 = vld [vmem:[%s9017_s3 + $0xc8] sm:$0xff] }
 0x88c   : > { %v7801_v10 = vmul.f32 %v5644_v39, %v7739_v9  ;;  %v4644_v9 = vld [vmem:[%s9017_s3 + $0xd0] sm:$0xff]  ;;  %v5188_v34 = vpack.c.bf16 %v4643_v13, %v4642_v46 }
 0x88d   : > { %v2506_v32 = vsel %vm682_vm0, %v7798_v56, 0.0  ;;  %v5192_v5 = vpack.c.bf16 %v4645_v63, %v4644_v9 }
 0x88e   : > { %2507 = vadd.xlane.f32.xlu1 %v2506_v32  ;;  %v2503_v0 = vsel %vm682_vm0, %v7801_v10, 0.0  ;;  %5189 = vmatprep.subr.bf16.mxu1 %v5188_v34 }
 0x88f   : > { %2504 = vadd.xlane.f32.xlu0 %v2503_v0  ;;  %5191 = vmatpush3.bf16.msra.mxu1 %v5188_v34 }
 0x890   : > { %5193 = vmatprep.subr.bf16.mxu1 %v5192_v5 }
 0x893   : > { %5195 = vmatpush3.bf16.msra.mxu1 %v5192_v5 }
 0x8f9   : > { %v2466_v40 = vpop.xlane.xlu1 %2465 }
 0x8fa   : > { %v2510_v49 = vmul.f32 0.015625, %v2466_v40  ;;  %v2463_v54 = vpop.xlane.xlu0 %2462 }
 0x8fb   : > { %v2509_v59 = vmul.f32 0.015625, %v2463_v54 }
 0x8fc   : > { %v7820_v6 = vsub.f32 %v7702_v36, %v2510_v49 }
 0x8fd   : > { %v7823_v28 = vsub.f32 %v7712_v21, %v2509_v59  ;;  %v2472_v11 = vpop.xlane.xlu1 %2471 }
 0x8fe   : > { %v2512_v1 = vmul.f32 0.015625, %v2472_v11  ;;  %v2469_v15 = vpop.xlane.xlu0 %2468  ;;  %v2542_v30 = vmul.f32 %v7820_v6, %v7820_v6 }
 0x8ff   : > { %v2511_v24 = vmul.f32 0.015625, %v2469_v15  ;;  %v2541_v53 = vmul.f32 %v7823_v28, %v7823_v28 }
 0x900   : > { %v7830_v31 = vsub.f32 %v7730_v4, %v2512_v1  ;;  %v2560_v16 = vsel %vm682_vm0, %v2542_v30, 0.0 }
 0x901   : > { %v7834_v36 = vsub.f32 %v7736_v47, %v2511_v24  ;;  %v2478_v21 = vpop.xlane.xlu1 %2477  ;;  %2561 = vadd.xlane.f32.xlu1 %v2560_v16  ;;  %v2557_v39 = vsel %vm682_vm0, %v2541_v53, 0.0 }
 0x902   : > { %v2514_v32 = vmul.f32 0.015625, %v2478_v21  ;;  %2558 = vadd.xlane.f32.xlu0 %v2557_v39  ;;  %v2475_v0 = vpop.xlane.xlu0 %2474  ;;  %v2544_v46 = vmul.f32 %v7830_v31, %v7830_v31 }
 0x903   : > { %v2513_v13 = vmul.f32 0.015625, %v2475_v0  ;;  %v2543_v4 = vmul.f32 %v7834_v36, %v7834_v36 }
 0x904   : > { %v7842_v9 = vsub.f32 %v7748_v3, %v2514_v32  ;;  %v2566_v47 = vsel %vm682_vm0, %v2544_v46, 0.0 }
 0x905   : > { %v7846_v34 = vsub.f32 %v7751_v41, %v2513_v13  ;;  %2567 = vadd.xlane.f32.xlu1 %v2566_v47  ;;  %v2563_v63 = vsel %vm682_vm0, %v2543_v4, 0.0 }
 0x906   : > { %2564 = vadd.xlane.f32.xlu0 %v2563_v63  ;;  %v2546_v5 = vmul.f32 %v7842_v9, %v7842_v9 }
 0x907   : > { %v2545_v40 = vmul.f32 %v7846_v34, %v7846_v34 }
 0x908   : > { %v2484_v49 = vpop.xlane.xlu1 %2483  ;;  %v2572_v54 = vsel %vm682_vm0, %v2546_v5, 0.0 }
 0x909   : > { %v2516_v3 = vmul.f32 0.015625, %v2484_v49  ;;  %v2481_v59 = vpop.xlane.xlu0 %2480  ;;  %2573 = vadd.xlane.f32.xlu1 %v2572_v54  ;;  %v2569_v11 = vsel %vm682_vm0, %v2545_v40, 0.0 }
 0x90a   : > { %v2515_v41 = vmul.f32 0.015625, %v2481_v59  ;;  %2570 = vadd.xlane.f32.xlu0 %v2569_v11 }
 0x90b   : > { %v7856_v1 = vsub.f32 %v7758_v38, %v2516_v3 }
 0x90c   : > { %v7859_v15 = vsub.f32 %v7761_v48, %v2515_v41  ;;  %v2490_v30 = vpop.xlane.xlu1 %2489 }
 0x90d   : > { %v2518_v24 = vmul.f32 0.015625, %v2490_v30  ;;  %v2487_v53 = vpop.xlane.xlu0 %2486  ;;  %v2548_v16 = vmul.f32 %v7856_v1, %v7856_v1 }
 0x90e   : > { %v2517_v21 = vmul.f32 0.015625, %v2487_v53  ;;  %v2547_v39 = vmul.f32 %v7859_v15, %v7859_v15 }
 0x90f   : > { %v7866_v32 = vsub.f32 %v7768_v20, %v2518_v24  ;;  %v2578_v0 = vsel %vm682_vm0, %v2548_v16, 0.0 }
 0x910   : > { %v7870_v38 = vsub.f32 %v7771_v42, %v2517_v21  ;;  %v2496_v48 = vpop.xlane.xlu1 %2495  ;;  %2579 = vadd.xlane.f32.xlu1 %v2578_v0  ;;  %v2575_v46 = vsel %vm682_vm0, %v2547_v39, 0.0 }
 0x911   : > { %v2520_v13 = vmul.f32 0.015625, %v2496_v48  ;;  %2576 = vadd.xlane.f32.xlu0 %v2575_v46  ;;  %v2493_v4 = vpop.xlane.xlu0 %2492  ;;  %v2550_v47 = vmul.f32 %v7866_v32, %v7866_v32 }
 0x912   : > { %v2519_v63 = vmul.f32 0.015625, %v2493_v4  ;;  %v2549_v20 = vmul.f32 %v7870_v38, %v7870_v38 }
 0x913   : > { %v7878_v5 = vsub.f32 %v7778_v62, %v2520_v13  ;;  %v2584_v42 = vsel %vm682_vm0, %v2550_v47, 0.0 }
 0x914   : > { %v7882_v40 = vsub.f32 %v7781_v29, %v2519_v63  ;;  %2585 = vadd.xlane.f32.xlu1 %v2584_v42  ;;  %v2581_v49 = vsel %vm682_vm0, %v2549_v20, 0.0  ;;  %v4646_v63 = vld [vmem:[%s9017_s3 + $0xe0] sm:$0xff] }
 0x915   : > { %2582 = vadd.xlane.f32.xlu0 %v2581_v49  ;;  %v2552_v54 = vmul.f32 %v7878_v5, %v7878_v5 }
 0x916   : > { %v2551_v3 = vmul.f32 %v7882_v40, %v7882_v40 }
 0x917   : > { %v2502_v59 = vpop.xlane.xlu1 %2501  ;;  %v2590_v11 = vsel %vm682_vm0, %v2552_v54, 0.0  ;;  %v4648_v54 = vld [vmem:[%s9017_s3 + $0xf0] sm:$0xff] }
 0x918   : > { %v2522_v62 = vmul.f32 0.015625, %v2502_v59  ;;  %v2499_v41 = vpop.xlane.xlu0 %2498  ;;  %2591 = vadd.xlane.f32.xlu1 %v2590_v11  ;;  %v2587_v30 = vsel %vm682_vm0, %v2551_v3, 0.0  ;;  %v4649_v3 = vld [vmem:[%s9017_s3 + $0xf8] sm:$0xff] }
 0x919   : > { %v2521_v29 = vmul.f32 0.015625, %v2499_v41  ;;  %2588 = vadd.xlane.f32.xlu0 %v2587_v30  ;;  %v5200_v59 = vpack.c.bf16 %v4649_v3, %v4648_v54 }
 0x91a   : > { %v7892_v24 = vsub.f32 %v7788_v12, %v2522_v62 }
 0x91b   : > { %v7895_v53 = vsub.f32 %v7791_v60, %v2521_v29  ;;  %v2508_v16 = vpop.xlane.xlu1 %2507 }
 0x91c   : > { %v2524_v21 = vmul.f32 0.015625, %v2508_v16  ;;  %v2505_v39 = vpop.xlane.xlu0 %2504  ;;  %v2554_v0 = vmul.f32 %v7892_v24, %v7892_v24 }
 0x91d   : > { %v2523_v48 = vmul.f32 0.015625, %v2505_v39  ;;  %v2553_v46 = vmul.f32 %v7895_v53, %v7895_v53 }
 0x91e   : > { %v7902_v13 = vsub.f32 %v7798_v56, %v2524_v21  ;;  %v2596_v4 = vsel %vm682_vm0, %v2554_v0, 0.0  ;;  %v4647_v56 = vld [vmem:[%s9017_s3 + $0xe8] sm:$0xff] }
 0x91f   : > { %v7906_v12 = vsub.f32 %v7801_v10, %v2523_v48  ;;  %2597 = vadd.xlane.f32.xlu1 %v2596_v4  ;;  %v2593_v60 = vsel %vm682_vm0, %v2553_v46, 0.0  ;;  %v5196_v10 = vpack.c.bf16 %v4647_v56, %v4646_v63 }
 0x920   : > { %2594 = vadd.xlane.f32.xlu0 %v2593_v60  ;;  %v2556_v47 = vmul.f32 %v7902_v13, %v7902_v13 }
 0x921   : > { %v2555_v20 = vmul.f32 %v7906_v12, %v7906_v12  ;;  %5197 = vmatprep.subr.bf16.mxu1 %v5196_v10 }
 0x922   : > { %v2602_v42 = vsel %vm682_vm0, %v2556_v47, 0.0  ;;  %5199 = vmatpush3.bf16.msra.mxu1 %v5196_v10 }
 0x923   : > { %2603 = vadd.xlane.f32.xlu1 %v2602_v42  ;;  %v2599_v49 = vsel %vm682_vm0, %v2555_v20, 0.0  ;;  %5201 = vmatprep.subr.bf16.mxu1 %v5200_v59  ;;  %v7930_v42 = vrot.slane %v7459_v7, %v423_v44 }
 0x924   : > { %2600 = vadd.xlane.f32.xlu0 %v2599_v49 }
 0x926   : > { %5203 = vmatpush3.bf16.msra.mxu1 %v5200_v59 }
 0x98e   : > { %v2562_v11 = vpop.xlane.xlu1 %2561 }
 0x98f   : > { %v2606_v62 = vmul.f32 0.015625, %v2562_v11  ;;  %v2559_v41 = vpop.xlane.xlu0 %2558 }
 0x990   : > { %v2605_v30 = vmul.f32 0.015625, %v2559_v41 }
 0x991   : > { %v2622_v29 = vadd.f32 0.1, %v2606_v62 }
 0x992   : > { %v2621_v16 = vadd.f32 0.1, %v2605_v30  ;;  %v2568_v21 = vpop.xlane.xlu1 %2567 }
 0x993   : > { %5645 = vrsqrt.f32 %v2622_v29  ;;  %v2608_v39 = vmul.f32 0.015625, %v2568_v21  ;;  %v2565_v0 = vpop.xlane.xlu0 %2564  ;;  %v7937_v29 = vrot.slane %v7459_v7, %v894_v50 }
 0x994   : > { %5647 = vrsqrt.f32 %v2621_v16  ;;  %v2607_v48 = vmul.f32 0.015625, %v2565_v0 }
 0x995   : > { %v2624_v46 = vadd.f32 0.1, %v2608_v39 }
 0x996   : > { %v2623_v4 = vadd.f32 0.1, %v2607_v48  ;;  %v2574_v60 = vpop.xlane.xlu1 %2573 }
 0x997   : > { %5649 = vrsqrt.f32 %v2624_v46  ;;  %v2610_v47 = vmul.f32 0.015625, %v2574_v60  ;;  %v2571_v63 = vpop.xlane.xlu0 %2570 }
 0x998   : > { %5651 = vrsqrt.f32 %v2623_v4  ;;  %v2609_v56 = vmul.f32 0.015625, %v2571_v63 }
 0x999   : > { %v2626_v20 = vadd.f32 0.1, %v2610_v47 }
 0x99a   : > { %v2625_v10 = vadd.f32 0.1, %v2609_v56 }
 0x99b   : > { %5653 = vrsqrt.f32 %v2626_v20 }
 0x99c   : > { %5655 = vrsqrt.f32 %v2625_v10 }
 0x99d   : > { %v5646_v49 = vpop.eup %5645  ;;  %v2580_v54 = vpop.xlane.xlu1 %2579 }
 0x99e   : > { %v5648_v3 = vpop.eup %5647  ;;  %v2654_v59 = vmul.f32 %v5646_v49, %v7820_v6  ;;  %v2612_v11 = vmul.f32 0.015625, %v2580_v54  ;;  %v2577_v62 = vpop.xlane.xlu0 %2576 }
 0x99f   : > { %v2611_v41 = vmul.f32 0.015625, %v2577_v62  ;;  %v2653_v30 = vmul.f32 %v5648_v3, %v7823_v28 }
 0x9a0   : > { %v2674_v16 = vmul.f32 %v7930_v42, %v2654_v59  ;;  %v2628_v44 = vadd.f32 0.1, %v2612_v11 }
 0x9a1   : > { %v5650_v21 = vpop.eup %5649  ;;  %v2627_v39 = vadd.f32 0.1, %v2611_v41  ;;  %v2586_v0 = vpop.xlane.xlu1 %2585  ;;  %v2673_v48 = vmul.f32 %v7930_v42, %v2653_v30 }
 0x9a2   : > { %v5652_v46 = vpop.eup %5651  ;;  %5657 = vrsqrt.f32 %v2628_v44  ;;  %v2614_v6 = vmul.f32 0.015625, %v2586_v0  ;;  %v2583_v4 = vpop.xlane.xlu0 %2582  ;;  %v2656_v60 = vmul.f32 %v5650_v21, %v7830_v31  ;;  %v7947_v63 = vadd.f32 %v7937_v29, %v2674_v16 }
 0x9a3   : > { %5659 = vrsqrt.f32 %v2627_v39  ;;  %v2613_v28 = vmul.f32 0.015625, %v2583_v4  ;;  %v7943_v47 = vadd.f32 %v7937_v29, %v2673_v48  ;;  %v2655_v50 = vmul.f32 %v5652_v46, %v7834_v36 }
 0x9a4   : > { %v2630_v7 = vadd.f32 0.1, %v2614_v6  ;;  %v2676_v56 = vmul.f32 %v7930_v42, %v2656_v60 }
 0x9a5   : > { %v5654_v20 = vpop.eup %5653  ;;  %v2629_v10 = vadd.f32 0.1, %v2613_v28  ;;  %v2592_v49 = vpop.xlane.xlu1 %2591  ;;  %5044 = vmatprep.mubr.msk.f32.mxu1 %vm682_vm0, %v7943_v47  ;;  %v2675_v31 = vmul.f32 %v7930_v42, %v2655_v50 }
 0x9a6   : > { %v5656_v54 = vpop.eup %5655  ;;  %5661 = vrsqrt.f32 %v2630_v7  ;;  %v2616_v3 = vmul.f32 0.015625, %v2592_v49  ;;  %v2589_v59 = vpop.xlane.xlu0 %2588  ;;  %5045 = vmatmul.mubr.msk.f32.vlgmr.msra.gmra.mrb[32].mxu1 %vm682_vm0, %v7947_v63  ;;  %v2658_v36 = vmul.f32 %v5654_v20, %v7842_v9  ;;  %v7961_v16 = vadd.f32 %v7937_v29, %v2676_v56 }
 0x9a7   : > { %5663 = vrsqrt.f32 %v2629_v10  ;;  %v2615_v11 = vmul.f32 0.015625, %v2589_v59  ;;  %v7957_v62 = vadd.f32 %v7937_v29, %v2675_v31  ;;  %v2657_v41 = vmul.f32 %v5656_v54, %v7846_v34 }
 0x9a8   : > { %v2632_v30 = vadd.f32 0.1, %v2616_v3  ;;  %v2678_v44 = vmul.f32 %v7930_v42, %v2658_v36 }
 0x9a9   : > { %v2631_v21 = vadd.f32 0.1, %v2615_v11  ;;  %5047 = vmatprep.mubr.msk.f32.mxu1 %vm682_vm0, %v7957_v62  ;;  %v2677_v39 = vmul.f32 %v7930_v42, %v2657_v41 }
 0x9aa   : > { %5665 = vrsqrt.f32 %v2632_v30  ;;  %5048 = vmatmul.mubr.msk.f32.gmra.mrb[34].mxu1 %vm682_vm0, %v7961_v16  ;;  %v7973_v48 = vadd.f32 %v7937_v29, %v2678_v44 }
 0x9ab   : > { %5667 = vrsqrt.f32 %v2631_v21  ;;  %v7970_v9 = vadd.f32 %v7937_v29, %v2677_v39 }
 0x9ac   : > { %v5658_v34 = vpop.eup %5657  ;;  %v2598_v0 = vpop.xlane.xlu1 %2597 }
 0x9ad   : > { %v5660_v46 = vpop.eup %5659  ;;  %v2618_v6 = vmul.f32 0.015625, %v2598_v0  ;;  %v2595_v4 = vpop.xlane.xlu0 %2594  ;;  %5050 = vmatprep.mubr.msk.f32.mxu1 %vm682_vm0, %v7970_v9  ;;  %v2660_v60 = vmul.f32 %v5658_v34, %v7856_v1 }
 0x9ae   : > { %v2617_v28 = vmul.f32 0.015625, %v2595_v4  ;;  %5051 = vmatmul.mubr.msk.f32.gmra.mrb[36].mxu1 %vm682_vm0, %v7973_v48  ;;  %v2659_v50 = vmul.f32 %v5660_v46, %v7859_v15 }
 0x9af   : > { %v2634_v7 = vadd.f32 0.1, %v2618_v6  ;;  %v2680_v56 = vmul.f32 %v7930_v42, %v2660_v60 }
 0x9b0   : > { %v5662_v20 = vpop.eup %5661  ;;  %v2633_v10 = vadd.f32 0.1, %v2617_v28  ;;  %v2604_v49 = vpop.xlane.xlu1 %2603  ;;  %v2679_v31 = vmul.f32 %v7930_v42, %v2659_v50 }
 0x9b1   : > { %v5664_v54 = vpop.eup %5663  ;;  %5669 = vrsqrt.f32 %v2634_v7  ;;  %v2620_v3 = vmul.f32 0.015625, %v2604_v49  ;;  %v2601_v59 = vpop.xlane.xlu0 %2600  ;;  %v2662_v1 = vmul.f32 %v5662_v20, %v7866_v32  ;;  %v7989_v30 = vadd.f32 %v7937_v29, %v2680_v56 }
 0x9b2   : > { %5671 = vrsqrt.f32 %v2633_v10  ;;  %v2619_v36 = vmul.f32 0.015625, %v2601_v59  ;;  %v7985_v11 = vadd.f32 %v7937_v29, %v2679_v31  ;;  %v2661_v15 = vmul.f32 %v5664_v54, %v7870_v38 }
 0x9b3   : > { %v2636_v41 = vadd.f32 0.1, %v2620_v3  ;;  %v2682_v44 = vmul.f32 %v7930_v42, %v2662_v1 }
 0x9b4   : > { %v5666_v21 = vpop.eup %5665  ;;  %v2635_v39 = vadd.f32 0.1, %v2619_v36  ;;  %5053 = vmatprep.mubr.msk.f32.mxu1 %vm682_vm0, %v7985_v11  ;;  %v2681_v32 = vmul.f32 %v7930_v42, %v2661_v15  ;;  %v2710_v15 = vadd.f32 %v7947_v63, %v7585_v27 }
 0x9b5   : > { %v5668_v34 = vpop.eup %5667  ;;  %5673 = vrsqrt.f32 %v2636_v41  ;;  %5054 = vmatmul.mubr.msk.f32.gmra.mrb[38].mxu1 %vm682_vm0, %v7989_v30  ;;  %v2664_v38 = vmul.f32 %v5666_v21, %v7878_v5  ;;  %v8003_v6 = vadd.f32 %v7937_v29, %v2682_v44 }
 0x9b6   : > { %5675 = vrsqrt.f32 %v2635_v39  ;;  %v7999_v0 = vadd.f32 %v7937_v29, %v2681_v32  ;;  %v2663_v46 = vmul.f32 %v5668_v34, %v7882_v40 }
 0x9b7   : > { %v2684_v4 = vmul.f32 %v7930_v42, %v2664_v38 }
 0x9b8   : > { %5056 = vmatprep.mubr.msk.f32.mxu1 %vm682_vm0, %v7999_v0  ;;  %v2683_v60 = vmul.f32 %v7930_v42, %v2663_v46 }
 0x9b9   : > { %5057 = vmatmul.mubr.msk.f32.gmra.mrb[40].mxu1 %vm682_vm0, %v8003_v6  ;;  %v8015_v50 = vadd.f32 %v7937_v29, %v2684_v4 }
 0x9ba   : > { %v8012_v5 = vadd.f32 %v7937_v29, %v2683_v60 }
 0x9bb   : > { %v5670_v28 = vpop.eup %5669 }
 0x9bc   : > { %v5672_v40 = vpop.eup %5671  ;;  %5059 = vmatprep.mubr.msk.f32.mxu1 %vm682_vm0, %v8012_v5  ;;  %v2666_v7 = vmul.f32 %v5670_v28, %v7892_v24 }
 0x9bd   : > { %5060 = vmatmul.mubr.msk.f32.gmra.mrb[42].mxu1 %vm682_vm0, %v8015_v50  ;;  %v2665_v56 = vmul.f32 %v5672_v40, %v7895_v53 }
 0x9be   : > { %v2686_v20 = vmul.f32 %v7930_v42, %v2666_v7 }
 0x9bf   : > { %v5674_v10 = vpop.eup %5673  ;;  %v2685_v49 = vmul.f32 %v7930_v42, %v2665_v56 }
 0x9c0   : > { %v5676_v31 = vpop.eup %5675  ;;  %v2668_v54 = vmul.f32 %v5674_v10, %v7902_v13  ;;  %v8031_v24 = vadd.f32 %v7937_v29, %v2686_v20 }
 0x9c1   : > { %v8027_v3 = vadd.f32 %v7937_v29, %v2685_v49  ;;  %v2667_v59 = vmul.f32 %v5676_v31, %v7906_v12  ;;  %v8052_v12 = vrot.slane %v7576_v17, %v2093_v18  ;;  %v2712_v17 = vadd.f32 %v7961_v16, %v7602_v55 }
 0x9c2   : > { %v2688_v1 = vmul.f32 %v7930_v42, %v2668_v54  ;;  %v2714_v55 = vadd.f32 %v7973_v48, %v7620_v43  ;;  %v2716_v49 = vadd.f32 %v7989_v30, %v7639_v22  ;;  %v2715_v54 = vadd.f32 %v7985_v11, %v7644_v61 }
 0x9c3   : > { %5062 = vmatprep.mubr.msk.f32.mxu1 %vm682_vm0, %v8027_v3  ;;  %v2687_v53 = vmul.f32 %v7930_v42, %v2667_v59  ;;  %v2718_v30 = vadd.f32 %v8003_v6, %v7656_v25 }
 0x9c4   : > { %5063 = vmatmul.mubr.msk.f32.gmra.mrb[44].mxu1 %vm682_vm0, %v8031_v24  ;;  %v8043_v36 = vadd.f32 %v7937_v29, %v2688_v1 }
 0x9c5   : > { %v8040_v13 = vadd.f32 %v7937_v29, %v2687_v53  ;;  %v2709_v29 = vadd.f32 %v7943_v47, %v7590_v33  ;;  %v2711_v33 = vadd.f32 %v7957_v62, %v7608_v45  ;;  %v2713_v45 = vadd.f32 %v7970_v9, %v7626_v51 }
 0x9c7   : > { %5065 = vmatprep.mubr.msk.f32.mxu1 %vm682_vm0, %v8040_v13 }
 0x9c8   : > { %5066 = vmatmul.mubr.msk.f32.gmra.mrb[46].mxu1 %vm682_vm0, %v8043_v36 }
 0xa79   : > { %v5046_v42 = vpop.f32.mrb[32].mxu1 }
 0xa7a   : > { %v2858_v41 = vadd.f32 %v5046_v42, %v8052_v12  ;;  %v2852_v44 = vpop.f32.mrb[33].mxu1 }
 0xa7b   : > { %v2853_v21 = vadd.f32 %v2852_v44, %v8052_v12 }
 0xa7c   : > { %v8060_v39 = vadd.f32 %v2858_v41, %v2710_v15 }
 0xa7d   : > { %v8062_v32 = vadd.f32 %v2853_v21, %v2709_v29  ;;  %v5049_v34 = vpop.f32.mrb[34].mxu1 }
 0xa7e   : > { %v4667_v18 = vmul.f32 -1.442695, %v8060_v39  ;;  %v2868_v27 = vadd.f32 %v5049_v34, %v8052_v12  ;;  %v2862_v63 = vpop.f32.mrb[35].mxu1  ;;  %v2717_v34 = vadd.f32 %v7999_v0, %v7662_v26 }
 0xa7f   : > { %v4666_v38 = vmul.f32 -1.442695, %v8062_v32  ;;  %v2863_v47 = vadd.f32 %v2862_v63, %v8052_v12 }
 0xa80   : > { %5677 = vpow2.f32 %v4667_v18  ;;  %v8072_v46 = vadd.f32 %v2868_v27, %v2712_v17 }
 0xa81   : > { %5679 = vpow2.f32 %v4666_v38  ;;  %v8074_v4 = vadd.f32 %v2863_v47, %v2711_v33  ;;  %v5052_v60 = vpop.f32.mrb[36].mxu1  ;;  %v2720_v47 = vadd.f32 %v8015_v50, %v7674_v19 }
 0xa82   : > { %v4669_v28 = vmul.f32 -1.442695, %v8072_v46  ;;  %v2878_v16 = vadd.f32 %v5052_v60, %v8052_v12  ;;  %v2872_v40 = vpop.f32.mrb[37].mxu1 }
 0xa83   : > { %v4668_v7 = vmul.f32 -1.442695, %v8074_v4  ;;  %v2873_v62 = vadd.f32 %v2872_v40, %v8052_v12 }
 0xa84   : > { %5681 = vpow2.f32 %v4669_v28  ;;  %v8084_v56 = vadd.f32 %v2878_v16, %v2714_v55  ;;  %v2719_v55 = vadd.f32 %v8012_v5, %v7680_v2 }
 0xa85   : > { %5683 = vpow2.f32 %v4668_v7  ;;  %v8086_v20 = vadd.f32 %v2873_v62, %v2713_v45 }
 0xa86   : > { %v4671_v10 = vmul.f32 -1.442695, %v8084_v56 }
 0xa87   : > { %v4670_v43 = vmul.f32 -1.442695, %v8086_v20 }
 0xa88   : > { %5685 = vpow2.f32 %v4671_v10  ;;  %v5055_v48 = vpop.f32.mrb[38].mxu1 }
 0xa89   : > { %5687 = vpow2.f32 %v4670_v43  ;;  %v2888_v51 = vadd.f32 %v5055_v48, %v8052_v12  ;;  %v2882_v9 = vpop.f32.mrb[39].mxu1  ;;  %v2722_v48 = vadd.f32 %v8031_v24, %v7693_v58  ;;  %v2724_v58 = vadd.f32 %v8043_v36, %v7709_v52 }
 0xa8a   : > { %v5678_v31 = vpop.eup %5677  ;;  %v2883_v59 = vadd.f32 %v2882_v9, %v8052_v12 }
 0xa8b   : > { %v5680_v1 = vpop.eup %5679  ;;  %v2996_v53 = vadd.f32 1.0, %v5678_v31  ;;  %v8096_v42 = vadd.f32 %v2888_v51, %v2716_v49 }
 0xa8c   : > { %v2995_v15 = vadd.f32 1.0, %v5680_v1  ;;  %v8098_v41 = vadd.f32 %v2883_v59, %v2715_v54  ;;  %v5058_v44 = vpop.f32.mrb[40].mxu1  ;;  %v2721_v54 = vadd.f32 %v8027_v3, %v7698_v23  ;;  %v2723_v3 = vadd.f32 %v8040_v13, %v7719_v37 }
 0xa8d   : > { %5689 = vrcp.f32 %v2996_v53  ;;  %v4673_v22 = vmul.f32 -1.442695, %v8096_v42  ;;  %v2898_v29 = vadd.f32 %v5058_v44, %v8052_v12  ;;  %v2892_v21 = vpop.f32.mrb[41].mxu1 }
 0xa8e   : > { %v5682_v61 = vpop.eup %5681  ;;  %5691 = vrcp.f32 %v2995_v15  ;;  %v4672_v11 = vmul.f32 -1.442695, %v8098_v41  ;;  %v2893_v18 = vadd.f32 %v2892_v21, %v8052_v12 }
 0xa8f   : > { %v5684_v17 = vpop.eup %5683  ;;  %v2998_v27 = vadd.f32 1.0, %v5682_v61  ;;  %5693 = vpow2.f32 %v4673_v22  ;;  %v8108_v63 = vadd.f32 %v2898_v29, %v2718_v30 }
 0xa90   : > { %v2997_v38 = vadd.f32 1.0, %v5684_v17  ;;  %5695 = vpow2.f32 %v4672_v11  ;;  %v8110_v25 = vadd.f32 %v2893_v18, %v2717_v34  ;;  %v5061_v6 = vpop.f32.mrb[42].mxu1 }
 0xa91   : > { %5697 = vrcp.f32 %v2998_v27  ;;  %v4675_v33 = vmul.f32 -1.442695, %v8108_v63  ;;  %v2908_v26 = vadd.f32 %v5061_v6, %v8052_v12  ;;  %v2902_v0 = vpop.f32.mrb[43].mxu1 }
 0xa92   : > { %v5686_v60 = vpop.eup %5685  ;;  %5699 = vrcp.f32 %v2997_v38  ;;  %v4674_v28 = vmul.f32 -1.442695, %v8110_v25  ;;  %v2903_v16 = vadd.f32 %v2902_v0, %v8052_v12 }
 0xa93   : > { %v5688_v40 = vpop.eup %5687  ;;  %v3000_v7 = vadd.f32 1.0, %v5686_v60  ;;  %5701 = vpow2.f32 %v4675_v33  ;;  %v8120_v45 = vadd.f32 %v2908_v26, %v2720_v47 }
 0xa94   : > { %v2999_v62 = vadd.f32 1.0, %v5688_v40  ;;  %5703 = vpow2.f32 %v4674_v28  ;;  %v8122_v19 = vadd.f32 %v2903_v16, %v2719_v55 }
 0xa95   : > { %5705 = vrcp.f32 %v3000_v7  ;;  %v4677_v50 = vmul.f32 -1.442695, %v8120_v45 }
 0xa96   : > { %5707 = vrcp.f32 %v2999_v62  ;;  %v4676_v10 = vmul.f32 -1.442695, %v8122_v19 }
 0xa97   : > { %v5690_v43 = vpop.eup %5689  ;;  %5709 = vpow2.f32 %v4677_v50  ;;  %v5064_v2 = vpop.f32.mrb[44].mxu1 }
 0xa98   : > { %v5692_v5 = vpop.eup %5691  ;;  %5711 = vpow2.f32 %v4676_v10  ;;  %v2918_v49 = vadd.f32 %v5064_v2, %v8052_v12  ;;  %v2912_v51 = vpop.f32.mrb[45].mxu1  ;;  %v8130_v9 = vmul.f32 %v5690_v43, %v8060_v39 }
 0xa99   : > { %v5694_v31 = vpop.eup %5693  ;;  %v2913_v59 = vadd.f32 %v2912_v51, %v8052_v12  ;;  %v8136_v1 = vmul.f32 %v5692_v5, %v8062_v32 }
 0xa9a   : > { %v5696_v53 = vpop.eup %5695  ;;  %v3002_v15 = vadd.f32 1.0, %v5694_v31  ;;  %v8138_v44 = vadd.f32 %v2918_v49, %v2722_v48  ;;  %v3062_v24 = vsel %vm682_vm0, %v8130_v9, 0.0 }
 0xa9b   : > { %v5698_v39 = vpop.eup %5697  ;;  %v3001_v22 = vadd.f32 1.0, %v5696_v53  ;;  %v8144_v30 = vadd.f32 %v2913_v59, %v2721_v54  ;;  %v5067_v23 = vpop.f32.mrb[46].mxu1  ;;  %3063 = vadd.xlane.f32.xlu1 %v3062_v24  ;;  %v3059_v32 = vsel %vm682_vm0, %v8136_v1, 0.0 }
 0xa9c   : > { %v5700_v29 = vpop.eup %5699  ;;  %5713 = vrcp.f32 %v3002_v15  ;;  %v4679_v21 = vmul.f32 -1.442695, %v8138_v44  ;;  %v2928_v52 = vadd.f32 %v5067_v23, %v8052_v12  ;;  %v2922_v36 = vpop.f32.mrb[47].mxu1  ;;  %3060 = vadd.xlane.f32.xlu0 %v3059_v32  ;;  %v8153_v61 = vmul.f32 %v5698_v39, %v8072_v46 }
 0xa9d   : > { %v5702_v11 = vpop.eup %5701  ;;  %5715 = vrcp.f32 %v3001_v22  ;;  %v4678_v34 = vmul.f32 -1.442695, %v8144_v30  ;;  %v2923_v37 = vadd.f32 %v2922_v36, %v8052_v12  ;;  %v8158_v13 = vmul.f32 %v5700_v29, %v8074_v4 }
 0xa9e   : > { %v5704_v18 = vpop.eup %5703  ;;  %v3004_v17 = vadd.f32 1.0, %v5702_v11  ;;  %5717 = vpow2.f32 %v4679_v21  ;;  %v8160_v27 = vadd.f32 %v2928_v52, %v2724_v58  ;;  %v3068_v38 = vsel %vm682_vm0, %v8153_v61, 0.0 }
 0xa9f   : > { %v5706_v6 = vpop.eup %5705  ;;  %v3003_v46 = vadd.f32 1.0, %v5704_v18  ;;  %5719 = vpow2.f32 %v4678_v34  ;;  %v8164_v33 = vadd.f32 %v2923_v37, %v2723_v3  ;;  %3069 = vadd.xlane.f32.xlu1 %v3068_v38  ;;  %v3065_v12 = vsel %vm682_vm0, %v8158_v13, 0.0  ;;  %v3308_v38 = vld [vmem:[#allocation2 + $0x8] sm:$0xff] }
 0xaa0   : > { %v5708_v47 = vpop.eup %5707  ;;  %5721 = vrcp.f32 %v3004_v17  ;;  %v4681_v4 = vmul.f32 -1.442695, %v8160_v27  ;;  %3066 = vadd.xlane.f32.xlu0 %v3065_v12  ;;  %v8170_v26 = vmul.f32 %v5706_v6, %v8084_v56  ;;  %v3307_v17 = vld [vmem:[#allocation2] sm:$0xff] }
 0xaa1   : > { %v5710_v0 = vpop.eup %5709  ;;  %5723 = vrcp.f32 %v3003_v46  ;;  %v4680_v60 = vmul.f32 -1.442695, %v8164_v33  ;;  %v8174_v28 = vmul.f32 %v5708_v47, %v8086_v20  ;;  %v5204_v6 = vpack.c.bf16 %v3308_v38, %v3307_v17 }
 0xaa2   : > { %v5712_v55 = vpop.eup %5711  ;;  %5725 = vpow2.f32 %v4681_v4  ;;  %v3074_v16 = vsel %vm682_vm0, %v8170_v26, 0.0  ;;  %v3006_v56 = vadd.f32 1.0, %v5710_v0 }
 0xaa3   : > { %v3005_v40 = vadd.f32 1.0, %v5712_v55  ;;  %5727 = vpow2.f32 %v4680_v60  ;;  %3075 = vadd.xlane.f32.xlu1 %v3074_v16  ;;  %v3071_v7 = vsel %vm682_vm0, %v8174_v28, 0.0  ;;  %5205 = vmatprep.subr.bf16.mxu0 %v5204_v6 }
 0xaa4   : > { %3072 = vadd.xlane.f32.xlu0 %v3071_v7  ;;  %5220 = vmatprep.subr.bf16.mxu1 %v5204_v6 }
 0xaa5   : > { %5729 = vrcp.f32 %v3005_v40  ;;  %5207 = vmatpush3.bf16.msra.mxu0 %v5204_v6  ;;  %5224 = vmatpush3.bf16.msra.mxu1 %v5204_v6 }
 0xaa6   : > { %v5714_v62 = vpop.eup %5713  ;;  %5731 = vrcp.f32 %v3006_v56 }
 0xaa7   : > { %v5716_v50 = vpop.eup %5715  ;;  %v8181_v10 = vmul.f32 %v5714_v62, %v8096_v42 }
 0xaa8   : > { %v5718_v20 = vpop.eup %5717  ;;  %v8184_v43 = vmul.f32 %v5716_v50, %v8098_v41 }
 0xaa9   : > { %v5720_v2 = vpop.eup %5719  ;;  %v3008_v5 = vadd.f32 1.0, %v5718_v20  ;;  %v3080_v48 = vsel %vm682_vm0, %v8181_v10, 0.0 }
 0xaaa   : > { %v5722_v49 = vpop.eup %5721  ;;  %v3007_v51 = vadd.f32 1.0, %v5720_v2  ;;  %3081 = vadd.xlane.f32.xlu1 %v3080_v48  ;;  %v3077_v31 = vsel %vm682_vm0, %v8184_v43, 0.0 }
 0xaab   : > { %v5724_v54 = vpop.eup %5723  ;;  %5733 = vrcp.f32 %v3008_v5  ;;  %3078 = vadd.xlane.f32.xlu0 %v3077_v31  ;;  %v8191_v42 = vmul.f32 %v5722_v49, %v8108_v63 }
 0xaac   : > { %v5726_v41 = vpop.eup %5725  ;;  %5735 = vrcp.f32 %v3007_v51  ;;  %v8196_v58 = vmul.f32 %v5724_v54, %v8110_v25 }
 0xaad   : > { %v5728_v59 = vpop.eup %5727  ;;  %v3086_v53 = vsel %vm682_vm0, %v8191_v42, 0.0  ;;  %v3010_v39 = vadd.f32 1.0, %v5726_v41 }
 0xaae   : > { %v3009_v15 = vadd.f32 1.0, %v5728_v59  ;;  %v3083_v22 = vsel %vm682_vm0, %v8196_v58, 0.0 }
 0xaaf   : > { %v5730_v24 = vpop.eup %5729  ;;  %3087 = vadd.xlane.f32.xlu0 %v3086_v53 }
 0xab0   : > { %5737 = vrcp.f32 %v3009_v15  ;;  %v8201_v63 = vmul.f32 %v5730_v24, %v8122_v19  ;;  %v5732_v23 = vpop.eup %5731 }
 0xab1   : > { %5739 = vrcp.f32 %v3010_v39  ;;  %v8209_v21 = vmul.f32 %v5732_v23, %v8120_v45 }
 0xab2   : > { %v3089_v25 = vsel %vm682_vm0, %v8201_v63, 0.0 }
 0xab3   : > { %3084 = vadd.xlane.f32.xlu0 %v3083_v22  ;;  %v3092_v11 = vsel %vm682_vm0, %v8209_v21, 0.0 }
 0xab5   : > { %v5734_v3 = vpop.eup %5733 }
 0xab6   : > { %v5736_v32 = vpop.eup %5735  ;;  %v8204_v29 = vmul.f32 %v5734_v3, %v8138_v44 }
 0xab7   : > { %3090 = vadd.xlane.f32.xlu0 %v3089_v25  ;;  %v8214_v19 = vmul.f32 %v5736_v32, %v8144_v30 }
 0xab8   : > { %v3098_v52 = vsel %vm682_vm0, %v8204_v29, 0.0 }
 0xab9   : > { %3099 = vadd.xlane.f32.xlu1 %v3098_v52  ;;  %v3095_v44 = vsel %vm682_vm0, %v8214_v19, 0.0 }
 0xaba   : > { %v5738_v36 = vpop.eup %5737 }
 0xabb   : > { %3093 = vadd.xlane.f32.xlu0 %v3092_v11  ;;  %v8221_v34 = vmul.f32 %v5738_v36, %v8164_v33  ;;  %v5740_v45 = vpop.eup %5739 }
 0xabc   : > { %v8226_v30 = vmul.f32 %v5740_v45, %v8160_v27 }
 0xabd   : > { %3096 = vadd.xlane.f32.xlu1 %v3095_v44  ;;  %v3101_v37 = vsel %vm682_vm0, %v8221_v34, 0.0 }
 0xabe   : > { %v3104_v18 = vsel %vm682_vm0, %v8226_v30, 0.0 }
 0xac1   : > { %3102 = vadd.xlane.f32.xlu1 %v3101_v37 }
 0xac5   : > { %3105 = vadd.xlane.f32.xlu1 %v3104_v18 }
 0xb28   : > { %v3064_v46 = vpop.xlane.xlu1 %3063 }
 0xb29   : > { %v3108_v33 = vmul.f32 0.015625, %v3064_v46  ;;  %v3061_v12 = vpop.xlane.xlu0 %3060 }
 0xb2a   : > { %v3107_v47 = vmul.f32 0.015625, %v3061_v12 }
 0xb2b   : > { %v8231_v4 = vsub.f32 %v8130_v9, %v3108_v33 }
 0xb2c   : > { %v8234_v27 = vsub.f32 %v8136_v1, %v3107_v47  ;;  %v3070_v0 = vpop.xlane.xlu1 %3069 }
 0xb2d   : > { %v3110_v60 = vmul.f32 0.015625, %v3070_v0  ;;  %v3067_v55 = vpop.xlane.xlu0 %3066  ;;  %v3140_v16 = vmul.f32 %v8231_v4, %v8231_v4 }
 0xb2e   : > { %v3109_v40 = vmul.f32 0.015625, %v3067_v55  ;;  %v3139_v7 = vmul.f32 %v8234_v27, %v8234_v27 }
 0xb2f   : > { %v8241_v56 = vsub.f32 %v8153_v61, %v3110_v60  ;;  %v3158_v62 = vsel %vm682_vm0, %v3140_v16, 0.0 }
 0xb30   : > { %v8245_v9 = vsub.f32 %v8158_v13, %v3109_v40  ;;  %v3076_v1 = vpop.xlane.xlu1 %3075  ;;  %3159 = vadd.xlane.f32.xlu1 %v3158_v62  ;;  %v3155_v50 = vsel %vm682_vm0, %v3139_v7, 0.0  ;;  %v3309_v7 = vld [vmem:[#allocation2 + $0x10] sm:$0xff]  ;;  %v3310_v62 = vld [vmem:[#allocation2 + $0x18] sm:$0xff] }
 0xb31   : > { %v3112_v20 = vmul.f32 0.015625, %v3076_v1  ;;  %3156 = vadd.xlane.f32.xlu0 %v3155_v50  ;;  %v3073_v2 = vpop.xlane.xlu0 %3072  ;;  %v3142_v5 = vmul.f32 %v8241_v56, %v8241_v56 }
 0xb32   : > { %v3111_v48 = vmul.f32 0.015625, %v3073_v2  ;;  %v3141_v61 = vmul.f32 %v8245_v9, %v8245_v9 }
 0xb33   : > { %v8253_v49 = vsub.f32 %v8170_v26, %v3112_v20  ;;  %v3164_v13 = vsel %vm682_vm0, %v3142_v5, 0.0  ;;  %v5208_v20 = vpack.c.bf16 %v3310_v62, %v3309_v7 }
 0xb34   : > { %v8257_v51 = vsub.f32 %v8174_v28, %v3111_v48  ;;  %3165 = vadd.xlane.f32.xlu1 %v3164_v13  ;;  %v3161_v31 = vsel %vm682_vm0, %v3141_v61, 0.0  ;;  %v3312_v61 = vld [vmem:[#allocation2 + $0x28] sm:$0xff] }
 0xb35   : > { %3162 = vadd.xlane.f32.xlu0 %v3161_v31  ;;  %v3144_v54 = vmul.f32 %v8253_v49, %v8253_v49  ;;  %5209 = vmatprep.subr.bf16.mxu0 %v5208_v20 }
 0xb36   : > { %v3143_v41 = vmul.f32 %v8257_v51, %v8257_v51  ;;  %5221 = vmatprep.subr.bf16.mxu1 %v5208_v20  ;;  %5211 = vmatpush3.bf16.msra.mxu0 %v5208_v20 }
 0xb37   : > { %v3082_v59 = vpop.xlane.xlu1 %3081  ;;  %v3170_v53 = vsel %vm682_vm0, %v3144_v54, 0.0  ;;  %5225 = vmatpush3.bf16.msra.mxu1 %v5208_v20 }
 0xb38   : > { %v3114_v26 = vmul.f32 0.015625, %v3082_v59  ;;  %v3079_v15 = vpop.xlane.xlu0 %3078  ;;  %3171 = vadd.xlane.f32.xlu1 %v3170_v53  ;;  %v3167_v24 = vsel %vm682_vm0, %v3143_v41, 0.0 }
 0xb39   : > { %v3113_v28 = vmul.f32 0.015625, %v3079_v15  ;;  %3168 = vadd.xlane.f32.xlu0 %v3167_v24  ;;  %v3314_v15 = vld [vmem:[#allocation2 + $0x38] sm:$0xff] }
 0xb3a   : > { %v8267_v39 = vsub.f32 %v8181_v10, %v3114_v26  ;;  %v3313_v26 = vld [vmem:[#allocation2 + $0x30] sm:$0xff] }
 0xb3b   : > { %v8270_v22 = vsub.f32 %v8184_v43, %v3113_v28  ;;  %v5216_v28 = vpack.c.bf16 %v3314_v15, %v3313_v26 }
 0xb3c   : > { %v3088_v23 = vpop.xlane.xlu0 %3087  ;;  %v3146_v3 = vmul.f32 %v8267_v39, %v8267_v39 }
 0xb3d   : > { %v3116_v32 = vmul.f32 0.015625, %v3088_v23  ;;  %v3145_v25 = vmul.f32 %v8270_v22, %v8270_v22 }
 0xb3e   : > { %v3176_v52 = vsel %vm682_vm0, %v3146_v3, 0.0 }
 0xb3f   : > { %v8278_v36 = vsub.f32 %v8191_v42, %v3116_v32  ;;  %3177 = vadd.xlane.f32.xlu1 %v3176_v52  ;;  %v3173_v10 = vsel %vm682_vm0, %v3145_v25, 0.0 }
 0xb40   : > { %3174 = vadd.xlane.f32.xlu0 %v3173_v10  ;;  %v3085_v11 = vpop.xlane.xlu0 %3084 }
 0xb41   : > { %v3115_v43 = vmul.f32 0.015625, %v3085_v11  ;;  %v3148_v44 = vmul.f32 %v8278_v36, %v8278_v36 }
 0xb43   : > { %v8284_v45 = vsub.f32 %v8196_v58, %v3115_v43  ;;  %v3182_v37 = vsel %vm682_vm0, %v3148_v44, 0.0 }
 0xb44   : > { %3183 = vadd.xlane.f32.xlu0 %v3182_v37  ;;  %v3091_v18 = vpop.xlane.xlu0 %3090 }
 0xb45   : > { %v3117_v17 = vmul.f32 0.015625, %v3091_v18  ;;  %v3147_v42 = vmul.f32 %v8284_v45, %v8284_v45 }
 0xb46   : > { %v3100_v38 = vpop.xlane.xlu1 %3099 }
 0xb47   : > { %v3120_v6 = vmul.f32 0.015625, %v3100_v38  ;;  %v8290_v46 = vsub.f32 %v8201_v63, %v3117_v17  ;;  %v3179_v33 = vsel %vm682_vm0, %v3147_v42, 0.0 }
 0xb48   : > { %3180 = vadd.xlane.f32.xlu0 %v3179_v33  ;;  %v3094_v12 = vpop.xlane.xlu0 %3093 }
 0xb49   : > { %v8294_v58 = vsub.f32 %v8204_v29, %v3120_v6  ;;  %v3118_v47 = vmul.f32 0.015625, %v3094_v12  ;;  %v3149_v0 = vmul.f32 %v8290_v46, %v8290_v46 }
 0xb4a   : > { %v3097_v60 = vpop.xlane.xlu1 %3096 }
 0xb4b   : > { %v3119_v55 = vmul.f32 0.015625, %v3097_v60  ;;  %v8299_v16 = vsub.f32 %v8209_v21, %v3118_v47  ;;  %v3152_v63 = vmul.f32 %v8294_v58, %v8294_v58  ;;  %v3185_v40 = vsel %vm682_vm0, %v3149_v0, 0.0  ;;  %v8326_v60 = vld [vmem:[#allocation4 + $0x8] sm:$0xff] }
 0xb4c   : > { %3186 = vadd.xlane.f32.xlu0 %v3185_v40  ;;  %v8337_v20 = vrot.slane %v8326_v60, %v1475_v14 }
 0xb4d   : > { %v8305_v29 = vsub.f32 %v8214_v19, %v3119_v55  ;;  %v3194_v1 = vsel %vm682_vm0, %v3152_v63, 0.0  ;;  %v3150_v50 = vmul.f32 %v8299_v16, %v8299_v16  ;;  %v3311_v19 = vld [vmem:[#allocation2 + $0x20] sm:$0xff]  ;;  %v8331_v55 = vrot.slane %v8326_v60, %v942_v8 }
 0xb4e   : > { %3195 = vadd.xlane.f32.xlu1 %v3194_v1  ;;  %v3103_v21 = vpop.xlane.xlu1 %3102  ;;  %v5212_v54 = vpack.c.bf16 %v3312_v61, %v3311_v19 }
 0xb4f   : > { %v3121_v2 = vmul.f32 0.015625, %v3103_v21  ;;  %v3151_v5 = vmul.f32 %v8305_v29, %v8305_v29  ;;  %v3188_v48 = vsel %vm682_vm0, %v3150_v50, 0.0 }
 0xb50   : > { %3189 = vadd.xlane.f32.xlu0 %v3188_v48  ;;  %5213 = vmatprep.subr.bf16.mxu0 %v5212_v54 }
 0xb51   : > { %v8314_v13 = vsub.f32 %v8221_v34, %v3121_v2  ;;  %v3191_v31 = vsel %vm682_vm0, %v3151_v5, 0.0  ;;  %5222 = vmatprep.subr.bf16.mxu1 %v5212_v54  ;;  %5215 = vmatpush3.bf16.msra.mxu0 %v5212_v54 }
 0xb52   : > { %3192 = vadd.xlane.f32.xlu1 %v3191_v31  ;;  %v3106_v41 = vpop.xlane.xlu1 %3105  ;;  %5226 = vmatpush3.bf16.msra.mxu1 %v5212_v54 }
 0xb53   : > { %v3122_v59 = vmul.f32 0.015625, %v3106_v41  ;;  %v3153_v53 = vmul.f32 %v8314_v13, %v8314_v13  ;;  %5217 = vmatprep.subr.bf16.mxu0 %v5216_v28  ;;  %5223 = vmatprep.subr.bf16.mxu1 %v5216_v28 }
 0xb55   : > { %v8320_v24 = vsub.f32 %v8226_v30, %v3122_v59  ;;  %v3197_v34 = vsel %vm682_vm0, %v3153_v53, 0.0  ;;  %5219 = vmatpush3.bf16.msra.mxu0 %v5216_v28 }
 0xb56   : > { %3198 = vadd.xlane.f32.xlu1 %v3197_v34  ;;  %5227 = vmatpush3.bf16.msra.mxu1 %v5216_v28 }
 0xb57   : > { %v3154_v23 = vmul.f32 %v8320_v24, %v8320_v24 }
 0xb59   : > { %v3200_v3 = vsel %vm682_vm0, %v3154_v23, 0.0 }
 0xb5a   : > { %3201 = vadd.xlane.f32.xlu1 %v3200_v3 }
 0xbbd   : > { %v3160_v32 = vpop.xlane.xlu1 %3159 }
 0xbbe   : > { %v3204_v25 = vmul.f32 0.015625, %v3160_v32  ;;  %v3157_v52 = vpop.xlane.xlu0 %3156 }
 0xbbf   : > { %v3203_v30 = vmul.f32 0.015625, %v3157_v52 }
 0xbc0   : > { %v3220_v10 = vadd.f32 0.1, %v3204_v25 }
 0xbc1   : > { %v3219_v11 = vadd.f32 0.1, %v3203_v30  ;;  %v3166_v43 = vpop.xlane.xlu1 %3165 }
 0xbc2   : > { %5741 = vrsqrt.f32 %v3220_v10  ;;  %v3206_v44 = vmul.f32 0.015625, %v3166_v43  ;;  %v3163_v37 = vpop.xlane.xlu0 %3162 }
 0xbc3   : > { %5743 = vrsqrt.f32 %v3219_v11  ;;  %v3205_v18 = vmul.f32 0.015625, %v3163_v37 }
 0xbc4   : > { %v3222_v17 = vadd.f32 0.1, %v3206_v44 }
 0xbc5   : > { %v3221_v42 = vadd.f32 0.1, %v3205_v18  ;;  %v3172_v38 = vpop.xlane.xlu1 %3171 }
 0xbc6   : > { %5745 = vrsqrt.f32 %v3222_v17  ;;  %v3208_v6 = vmul.f32 0.015625, %v3172_v38  ;;  %v3169_v33 = vpop.xlane.xlu0 %3168 }
 0xbc7   : > { %5747 = vrsqrt.f32 %v3221_v42  ;;  %v3207_v12 = vmul.f32 0.015625, %v3169_v33 }
 0xbc8   : > { %v3224_v47 = vadd.f32 0.1, %v3208_v6 }
 0xbc9   : > { %v3223_v0 = vadd.f32 0.1, %v3207_v12 }
 0xbca   : > { %5749 = vrsqrt.f32 %v3224_v47 }
 0xbcb   : > { %5751 = vrsqrt.f32 %v3223_v0 }
 0xbcc   : > { %v5742_v63 = vpop.eup %5741  ;;  %v3178_v40 = vpop.xlane.xlu1 %3177 }
 0xbcd   : > { %v5744_v7 = vpop.eup %5743  ;;  %v3252_v62 = vmul.f32 %v5742_v63, %v8231_v4  ;;  %v3210_v1 = vmul.f32 0.015625, %v3178_v40  ;;  %v3175_v50 = vpop.xlane.xlu0 %3174 }
 0xbce   : > { %v3209_v21 = vmul.f32 0.015625, %v3175_v50  ;;  %v3251_v2 = vmul.f32 %v5744_v7, %v8234_v27 }
 0xbcf   : > { %v3272_v5 = vmul.f32 %v8331_v55, %v3252_v62  ;;  %v3226_v8 = vadd.f32 0.1, %v3210_v1 }
 0xbd0   : > { %v5746_v48 = vpop.eup %5745  ;;  %v3225_v19 = vadd.f32 0.1, %v3209_v21  ;;  %v3271_v61 = vmul.f32 %v8331_v55, %v3251_v2 }
 0xbd1   : > { %v5748_v31 = vpop.eup %5747  ;;  %5753 = vrsqrt.f32 %v3226_v8  ;;  %v3184_v4 = vpop.xlane.xlu0 %3183  ;;  %v3254_v54 = vmul.f32 %v5746_v48, %v8241_v56  ;;  %v3292_v27 = vadd.f32 %v8337_v20, %v3272_v5 }
 0xbd2   : > { %5755 = vrsqrt.f32 %v3225_v19  ;;  %v3212_v41 = vmul.f32 0.015625, %v3184_v4  ;;  %v3291_v14 = vadd.f32 %v8337_v20, %v3271_v61  ;;  %v3253_v59 = vmul.f32 %v5748_v31, %v8245_v9 }
 0xbd3   : > { %v3274_v53 = vmul.f32 %v8331_v55, %v3254_v54 }
 0xbd4   : > { %v5750_v26 = vpop.eup %5749  ;;  %v3228_v15 = vadd.f32 0.1, %v3212_v41  ;;  %5084 = vmatprep.mubr.msk.f32.mxu0 %vm682_vm0, %v3291_v14  ;;  %v3273_v34 = vmul.f32 %v8331_v55, %v3253_v59 }
 0xbd5   : > { %v5752_v28 = vpop.eup %5751  ;;  %v3181_v23 = vpop.xlane.xlu0 %3180  ;;  %5085 = vmatmul.mubr.msk.f32.vlgmr.msra.gmra.mrb[32].mxu0 %vm682_vm0, %v3292_v27  ;;  %v3256_v56 = vmul.f32 %v5750_v26, %v8253_v49  ;;  %v3294_v25 = vadd.f32 %v8337_v20, %v3274_v53 }
 0xbd6   : > { %5757 = vrsqrt.f32 %v3228_v15  ;;  %v3211_v3 = vmul.f32 0.015625, %v3181_v23  ;;  %v3293_v9 = vadd.f32 %v8337_v20, %v3273_v34  ;;  %v3255_v32 = vmul.f32 %v5752_v28, %v8257_v51 }
 0xbd7   : > { %v3276_v52 = vmul.f32 %v8331_v55, %v3256_v56 }
 0xbd8   : > { %v3227_v30 = vadd.f32 0.1, %v3211_v3  ;;  %5087 = vmatprep.mubr.msk.f32.mxu0 %vm682_vm0, %v3293_v9  ;;  %v3275_v10 = vmul.f32 %v8331_v55, %v3255_v32 }
 0xbd9   : > { %v3187_v11 = vpop.xlane.xlu0 %3186  ;;  %5088 = vmatmul.mubr.msk.f32.gmra.mrb[34].mxu0 %vm682_vm0, %v3294_v25  ;;  %v3296_v51 = vadd.f32 %v8337_v20, %v3276_v52 }
 0xbda   : > { %5759 = vrsqrt.f32 %v3227_v30  ;;  %v3213_v49 = vmul.f32 0.015625, %v3187_v11  ;;  %v3295_v43 = vadd.f32 %v8337_v20, %v3275_v10 }
 0xbdb   : > { %v5754_v44 = vpop.eup %5753  ;;  %v3196_v37 = vpop.xlane.xlu1 %3195 }
 0xbdc   : > { %v5756_v18 = vpop.eup %5755  ;;  %v3216_v17 = vmul.f32 0.015625, %v3196_v37  ;;  %v3229_v42 = vadd.f32 0.1, %v3213_v49  ;;  %5090 = vmatprep.mubr.msk.f32.mxu0 %vm682_vm0, %v3295_v43  ;;  %v3258_v38 = vmul.f32 %v5754_v44, %v8267_v39 }
 0xbdd   : > { %v3190_v6 = vpop.xlane.xlu0 %3189  ;;  %5091 = vmatmul.mubr.msk.f32.gmra.mrb[36].mxu0 %vm682_vm0, %v3296_v51  ;;  %v3257_v33 = vmul.f32 %v5756_v18, %v8270_v22 }
 0xbde   : > { %v3232_v12 = vadd.f32 0.1, %v3216_v17  ;;  %5761 = vrsqrt.f32 %v3229_v42  ;;  %v3214_v47 = vmul.f32 0.015625, %v3190_v6  ;;  %v3278_v0 = vmul.f32 %v8331_v55, %v3258_v38 }
 0xbdf   : > { %v3193_v63 = vpop.xlane.xlu1 %3192  ;;  %v3277_v40 = vmul.f32 %v8331_v55, %v3257_v33 }
 0xbe0   : > { %v5758_v7 = vpop.eup %5757  ;;  %5763 = vrsqrt.f32 %v3232_v12  ;;  %v3215_v62 = vmul.f32 0.015625, %v3193_v63  ;;  %v3230_v1 = vadd.f32 0.1, %v3214_v47  ;;  %v3298_v21 = vadd.f32 %v8337_v20, %v3278_v0 }
 0xbe1   : > { %v3297_v50 = vadd.f32 %v8337_v20, %v3277_v40  ;;  %v3260_v22 = vmul.f32 %v5758_v7, %v8278_v36 }
 0xbe2   : > { %v3231_v39 = vadd.f32 0.1, %v3215_v62  ;;  %5765 = vrsqrt.f32 %v3230_v1 }
 0xbe3   : > { %v3199_v2 = vpop.xlane.xlu1 %3198  ;;  %5093 = vmatprep.mubr.msk.f32.mxu0 %vm682_vm0, %v3297_v50  ;;  %v3280_v61 = vmul.f32 %v8331_v55, %v3260_v22 }
 0xbe4   : > { %v5760_v5 = vpop.eup %5759  ;;  %5767 = vrsqrt.f32 %v3231_v39  ;;  %v3217_v8 = vmul.f32 0.015625, %v3199_v2  ;;  %5094 = vmatmul.mubr.msk.f32.gmra.mrb[38].mxu0 %vm682_vm0, %v3298_v21 }
 0xbe5   : > { %v3259_v48 = vmul.f32 %v5760_v5, %v8284_v45  ;;  %v3300_v53 = vadd.f32 %v8337_v20, %v3280_v61 }
 0xbe6   : > { %v3233_v19 = vadd.f32 0.1, %v3217_v8 }
 0xbe7   : > { %v3202_v31 = vpop.xlane.xlu1 %3201  ;;  %v3279_v4 = vmul.f32 %v8331_v55, %v3259_v48 }
 0xbe8   : > { %v5762_v54 = vpop.eup %5761  ;;  %5769 = vrsqrt.f32 %v3233_v19  ;;  %v3218_v41 = vmul.f32 0.015625, %v3202_v31 }
 0xbe9   : > { %v3299_v36 = vadd.f32 %v8337_v20, %v3279_v4  ;;  %v3261_v14 = vmul.f32 %v5762_v54, %v8290_v46 }
 0xbea   : > { %v5764_v59 = vpop.eup %5763  ;;  %v3234_v27 = vadd.f32 0.1, %v3218_v41 }
 0xbeb   : > { %5096 = vmatprep.mubr.msk.f32.mxu0 %vm682_vm0, %v3299_v36  ;;  %v3281_v45 = vmul.f32 %v8331_v55, %v3261_v14  ;;  %v3264_v15 = vmul.f32 %v5764_v59, %v8294_v58 }
 0xbec   : > { %v5766_v26 = vpop.eup %5765  ;;  %5771 = vrsqrt.f32 %v3234_v27  ;;  %5097 = vmatmul.mubr.msk.f32.gmra.mrb[40].mxu0 %vm682_vm0, %v3300_v53 }
 0xbed   : > { %v3301_v34 = vadd.f32 %v8337_v20, %v3281_v45  ;;  %v3262_v28 = vmul.f32 %v5766_v26, %v8299_v16  ;;  %v3284_v3 = vmul.f32 %v8331_v55, %v3264_v15 }
 0xbee   : > { %v5768_v23 = vpop.eup %5767 }
 0xbef   : > { %5099 = vmatprep.mubr.msk.f32.mxu0 %vm682_vm0, %v3301_v34  ;;  %v3263_v46 = vmul.f32 %v5768_v23, %v8305_v29  ;;  %v3282_v56 = vmul.f32 %v8331_v55, %v3262_v28  ;;  %v3304_v52 = vadd.f32 %v8337_v20, %v3284_v3 }
 0xbf1   : > { %v3283_v9 = vmul.f32 %v8331_v55, %v3263_v46  ;;  %v3302_v58 = vadd.f32 %v8337_v20, %v3282_v56 }
 0xbf2   : > { %v5770_v32 = vpop.eup %5769 }
 0xbf3   : > { %v3303_v25 = vadd.f32 %v8337_v20, %v3283_v9  ;;  %5100 = vmatmul.mubr.msk.f32.gmra.mrb[42].mxu0 %vm682_vm0, %v3302_v58  ;;  %v3265_v16 = vmul.f32 %v5770_v32, %v8314_v13  ;;  %v8405_v13 = vrot.slane %v8326_v60, %v2073_v57 }
 0xbf5   : > { %5102 = vmatprep.mubr.msk.f32.mxu1 %vm682_vm0, %v3303_v25  ;;  %v3285_v29 = vmul.f32 %v8331_v55, %v3265_v16 }
 0xbf6   : > { %v5772_v30 = vpop.eup %5771  ;;  %5103 = vmatmul.mubr.msk.f32.vlgmr.msra.gmra.mrb[48].mxu1 %vm682_vm0, %v3304_v52 }
 0xbf7   : > { %v3305_v10 = vadd.f32 %v8337_v20, %v3285_v29  ;;  %v3266_v11 = vmul.f32 %v5772_v30, %v8320_v24 }
 0xbf9   : > { %5105 = vmatprep.mubr.msk.f32.mxu1 %vm682_vm0, %v3305_v10  ;;  %v3286_v49 = vmul.f32 %v8331_v55, %v3266_v11 }
 0xbfb   : > { %v3306_v43 = vadd.f32 %v8337_v20, %v3286_v49 }
 0xbfd   : > { %5106 = vmatmul.mubr.msk.f32.gmra.mrb[50].mxu1 %vm682_vm0, %v3306_v43 }
 0xca8   : > { %v5086_v44 = vpop.f32.mrb[32].mxu0 }
 0xca9   : > { %v8408_v37 = vadd.f32 %v5086_v44, %v8405_v13  ;;  %v3433_v51 = vpop.f32.mrb[33].mxu0 }
 0xcaa   : > { %v8411_v24 = vadd.f32 %v3433_v51, %v8405_v13 }
 0xcab   : > { %v3705_v18 = vsub.f32 0.0, %v8408_v37 }
 0xcac   : > { %v3704_v55 = vsub.f32 0.0, %v8411_v24  ;;  %v5089_v20 = vpop.f32.mrb[34].mxu0 }
 0xcad   : > { %v3722_v17 = vmul.f32 1.442695, %v3705_v18  ;;  %v8416_v42 = vadd.f32 %v5089_v20, %v8405_v13  ;;  %v3443_v35 = vpop.f32.mrb[35].mxu0 }
 0xcae   : > { %v3720_v57 = vmul.f32 1.442695, %v3704_v55  ;;  %v8419_v60 = vadd.f32 %v3443_v35, %v8405_v13 }
 0xcaf   : > { %5773 = vpow2.f32 %v3722_v17  ;;  %v3707_v38 = vsub.f32 0.0, %v8416_v42 }
 0xcb0   : > { %5775 = vpow2.f32 %v3720_v57  ;;  %v3706_v6 = vsub.f32 0.0, %v8419_v60  ;;  %v5092_v33 = vpop.f32.mrb[36].mxu0 }
 0xcb1   : > { %v3726_v12 = vmul.f32 1.442695, %v3707_v38  ;;  %v8424_v47 = vadd.f32 %v5092_v33, %v8405_v13  ;;  %v3453_v0 = vpop.f32.mrb[37].mxu0 }
 0xcb2   : > { %v8427_v63 = vadd.f32 %v3453_v0, %v8405_v13  ;;  %v3724_v40 = vmul.f32 1.442695, %v3706_v6 }
 0xcb3   : > { %5777 = vpow2.f32 %v3726_v12  ;;  %v3709_v7 = vsub.f32 0.0, %v8424_v47 }
 0xcb4   : > { %v3708_v62 = vsub.f32 0.0, %v8427_v63  ;;  %5779 = vpow2.f32 %v3724_v40 }
 0xcb5   : > { %v3730_v50 = vmul.f32 1.442695, %v3709_v7 }
 0xcb6   : > { %v3728_v1 = vmul.f32 1.442695, %v3708_v62 }
 0xcb7   : > { %v5095_v39 = vpop.f32.mrb[38].mxu0 }
 0xcb8   : > { %5781 = vpow2.f32 %v3728_v1  ;;  %v8432_v21 = vadd.f32 %v5095_v39, %v8405_v13  ;;  %v3463_v22 = vpop.f32.mrb[39].mxu0  ;;  %v8494_v1 = vld [vmem:[%s8491_s23 + $0x8] sm:$0xff] }
 0xcb9   : > { %v5774_v2 = vpop.eup %5773  ;;  %v8435_v5 = vadd.f32 %v3463_v22, %v8405_v13  ;;  %5783 = vpow2.f32 %v3730_v50  ;;  %v8497_v50 = vld [vmem:[%s8491_s23] sm:$0xff]  ;;  %v3545_v39 = vsub.f32 %v8494_v1, %v8408_v37 }
 0xcba   : > { %v5776_v8 = vpop.eup %5775  ;;  %v3711_v48 = vsub.f32 0.0, %v8432_v21  ;;  %3770 = vrot.lane.b32.xlu1 %v5774_v2, %s6013_s19  ;;  %v3544_v22 = vsub.f32 %v8497_v50, %v8411_v24  ;;  %v8504_v2 = vld [vmem:[%s8491_s23 + $0x18] sm:$0xff] }
 0xcbb   : > { %v3710_v19 = vsub.f32 0.0, %v8435_v5  ;;  %3768 = vrot.lane.b32.xlu0 %v5776_v8, %s6013_s19  ;;  %v3689_v8 = vmul.f32 %v3545_v39, %v3545_v39  ;;  %v8555_v39 = vld [vmem:[%s8491_s23 + $0x50] sm:$0xff] }
 0xcbc   : > { %v3734_v61 = vmul.f32 1.442695, %v3711_v48  ;;  %v3547_v48 = vsub.f32 %v8504_v2, %v8416_v42 }
 0xcbd   : > { %v5778_v31 = vpop.eup %5777  ;;  %v3732_v4 = vmul.f32 1.442695, %v3710_v19 }
 0xcbe   : > { %5785 = vpow2.f32 %v3734_v61  ;;  %3774 = vrot.lane.b32.xlu1 %v5778_v31, %s6013_s19  ;;  %v5780_v14 = vpop.eup %5779  ;;  %v3688_v61 = vmul.f32 %v3544_v22, %v3544_v22  ;;  %v8509_v31 = vld [vmem:[%s8491_s23 + $0x10] sm:$0xff] }
 0xcbf   : > { %5787 = vpow2.f32 %v3732_v4  ;;  %v5098_v54 = vpop.f32.mrb[40].mxu0 }
 0xcc0   : > { %v8443_v41 = vadd.f32 %v5098_v54, %v8405_v13  ;;  %v3473_v36 = vpop.f32.mrb[41].mxu0 }
 0xcc1   : > { %v8446_v59 = vadd.f32 %v3473_v36, %v8405_v13 }
 0xcc2   : > { %v5782_v27 = vpop.eup %5781  ;;  %v3713_v53 = vsub.f32 0.0, %v8443_v41  ;;  %3772 = vrot.lane.b32.xlu1 %v5780_v14, %s6013_s19  ;;  %v3691_v14 = vmul.f32 %v3547_v48, %v3547_v48 }
 0xcc3   : > { %v3712_v45 = vsub.f32 0.0, %v8446_v59  ;;  %3776 = vrot.lane.b32.xlu0 %v5782_v27, %s6013_s19  ;;  %v5784_v15 = vpop.eup %5783  ;;  %v3546_v27 = vsub.f32 %v8509_v31, %v8419_v60 }
 0xcc4   : > { %v3738_v26 = vmul.f32 1.442695, %v3713_v53 }
 0xcc5   : > { %v3736_v34 = vmul.f32 1.442695, %v3712_v45  ;;  %v8516_v45 = vld [vmem:[%s8491_s23 + $0x20] sm:$0xff] }
 0xcc6   : > { %5789 = vpow2.f32 %v3738_v26  ;;  %v5101_v28 = vpop.f32.mrb[42].mxu0  ;;  %3778 = vrot.lane.b32.xlu1 %v5784_v15, %s6013_s19  ;;  %v8519_v26 = vld [vmem:[%s8491_s23 + $0x28] sm:$0xff] }
 0xcc7   : > { %5791 = vpow2.f32 %v3736_v34  ;;  %v8454_v23 = vadd.f32 %v5101_v28, %v8405_v13  ;;  %v3483_v46 = vpop.f32.mrb[43].mxu0  ;;  %v3690_v34 = vmul.f32 %v3546_v27, %v3546_v27  ;;  %v3548_v28 = vsub.f32 %v8516_v45, %v8427_v63 }
 0xcc8   : > { %v5786_v56 = vpop.eup %5785  ;;  %v8457_v3 = vadd.f32 %v3483_v46, %v8405_v13  ;;  %v3549_v46 = vsub.f32 %v8519_v26, %v8424_v47 }
 0xcc9   : > { %v5788_v9 = vpop.eup %5787  ;;  %v5104_v58 = vpop.f32.mrb[48].mxu1  ;;  %v3715_v32 = vsub.f32 0.0, %v8454_v23 }
 0xcca   : > { %v8461_v25 = vadd.f32 %v5104_v58, %v8405_v13  ;;  %v3714_v16 = vsub.f32 0.0, %v8457_v3  ;;  %v3493_v52 = vpop.f32.mrb[49].mxu1  ;;  %3780 = vrot.lane.b32.xlu0 %v5788_v9, %s6013_s19  ;;  %3782 = vrot.lane.b32.xlu1 %v5786_v56, %s6013_s19  ;;  %v8527_v9 = vld [vmem:[%s8491_s23 + $0x30] sm:$0xff]  ;;  %v8530_v58 = vld [vmem:[%s8491_s23 + $0x38] sm:$0xff] }
 0xccb   : > { %v3742_v29 = vmul.f32 1.442695, %v3715_v32  ;;  %v8467_v30 = vadd.f32 %v3493_v52, %v8405_v13  ;;  %v3692_v52 = vmul.f32 %v3548_v28, %v3548_v28 }
 0xccc   : > { %v3717_v10 = vsub.f32 0.0, %v8461_v25  ;;  %v3740_v11 = vmul.f32 1.442695, %v3714_v16 }
 0xccd   : > { %5793 = vpow2.f32 %v3742_v29  ;;  %v3716_v49 = vsub.f32 0.0, %v8467_v30  ;;  %v3693_v29 = vmul.f32 %v3549_v46, %v3549_v46 }
 0xcce   : > { %v3746_v43 = vmul.f32 1.442695, %v3717_v10  ;;  %5795 = vpow2.f32 %v3740_v11  ;;  %v3550_v10 = vsub.f32 %v8527_v9, %v8435_v5  ;;  %v3551_v11 = vsub.f32 %v8530_v58, %v8432_v21 }
 0xccf   : > { %v3744_v44 = vmul.f32 1.442695, %v3716_v49 }
 0xcd0   : > { %v5790_v51 = vpop.eup %5789  ;;  %v5107_v18 = vpop.f32.mrb[50].mxu1  ;;  %5797 = vpow2.f32 %v3746_v43 }
 0xcd1   : > { %v5792_v55 = vpop.eup %5791  ;;  %v8472_v20 = vadd.f32 %v5107_v18, %v8405_v13  ;;  %v3503_v17 = vpop.f32.mrb[51].mxu1  ;;  %3786 = vrot.lane.b32.xlu1 %v5790_v51, %s6013_s19  ;;  %5799 = vpow2.f32 %v3744_v44  ;;  %v3694_v51 = vmul.f32 %v3550_v10, %v3550_v10  ;;  %v3695_v18 = vmul.f32 %v3551_v11, %v3551_v11 }
 0xcd2   : > { %v8476_v35 = vadd.f32 %v3503_v17, %v8405_v13  ;;  %3784 = vrot.lane.b32.xlu0 %v5792_v55, %s6013_s19  ;;  %v8540_v55 = vld [vmem:[%s8491_s23 + $0x48] sm:$0xff] }
 0xcd3   : > { %v3719_v57 = vsub.f32 0.0, %v8472_v20 }
 0xcd4   : > { %v3718_v38 = vsub.f32 0.0, %v8476_v35 }
 0xcd5   : > { %v3750_v6 = vmul.f32 1.442695, %v3719_v57 }
 0xcd6   : > { %v3748_v33 = vmul.f32 1.442695, %v3718_v38  ;;  %v8543_v38 = vld [vmem:[%s8491_s23 + $0x40] sm:$0xff] }
 0xcd7   : > { %v5794_v12 = vpop.eup %5793  ;;  %5801 = vpow2.f32 %v3750_v6 }
 0xcd8   : > { %v5796_v0 = vpop.eup %5795  ;;  %5803 = vpow2.f32 %v3748_v33  ;;  %3790 = vrot.lane.b32.xlu1 %v5794_v12, %s6013_s19  ;;  %v3553_v12 = vsub.f32 %v8540_v55, %v8443_v41 }
 0xcd9   : > { %3788 = vrot.lane.b32.xlu0 %v5796_v0, %s6013_s19  ;;  %v3552_v0 = vsub.f32 %v8543_v38, %v8446_v59 }
 0xcda   : > { %v5798_v40 = vpop.eup %5797 }
 0xcdb   : > { %v5800_v13 = vpop.eup %5799 }
 0xcdc   : > { %3794 = vrot.lane.b32.xlu1 %v5798_v40, %s6013_s19  ;;  %v3697_v40 = vmul.f32 %v3553_v12, %v3553_v12  ;;  %v3673_v12 = vadd.f32 1.837877, %v8408_v37  ;;  %v3674_v37 = vadd.f32 1.837877, %v8419_v60 }
 0xcdd   : > { %3792 = vrot.lane.b32.xlu0 %v5800_v13, %s6013_s19  ;;  %v8552_v13 = vld [vmem:[%s8491_s23 + $0x58] sm:$0xff] }
 0xce1   : > { %v5802_v7 = vpop.eup %5801 }
 0xce2   : > { %v5804_v62 = vpop.eup %5803  ;;  %3798 = vrot.lane.b32.xlu1 %v5802_v7, %s6013_s19 }
 0xce3   : > { %3796 = vrot.lane.b32.xlu0 %v5804_v62, %s6013_s19  ;;  %v3696_v62 = vmul.f32 %v3552_v0, %v3552_v0 }
 0xd2c   : > { %v3771_v19 = vpop.permute.xlu1 %3770 }
 0xd2d   : > { %v3817_v4 = vmul.f32 %v3771_v19, %v3689_v8  ;;  %v3769_v54 = vpop.permute.xlu0 %3768  ;;  %v3555_v19 = vsub.f32 %v8552_v13, %v8454_v23 }
 0xd2e   : > { %v3816_v36 = vmul.f32 %v3769_v54, %v3688_v61  ;;  %v3554_v61 = vsub.f32 %v8555_v39, %v8457_v3  ;;  %v8567_v54 = vld [vmem:[%s8491_s23 + $0x60] sm:$0xff] }
 0xd2f   : > { %3850 = vrot.lane.b32.xlu1 %v3817_v4, %s6014_s27  ;;  %v8563_v4 = vld [vmem:[%s8491_s23 + $0x68] sm:$0xff] }
 0xd30   : > { %v3775_v53 = vpop.permute.xlu1 %3774  ;;  %3848 = vrot.lane.b32.xlu0 %v3816_v36, %s6014_s27  ;;  %v3699_v36 = vmul.f32 %v3555_v19, %v3555_v19 }
 0xd31   : > { %v3819_v15 = vmul.f32 %v3775_v53, %v3691_v14  ;;  %v3557_v14 = vsub.f32 %v8563_v4, %v8461_v25  ;;  %v3698_v53 = vmul.f32 %v3554_v61, %v3554_v61 }
 0xd33   : > { %3854 = vrot.lane.b32.xlu1 %v3819_v15, %s6014_s27  ;;  %v3556_v15 = vsub.f32 %v8567_v54, %v8467_v30 }
 0xd34   : > { %v3773_v56 = vpop.permute.xlu1 %3772 }
 0xd35   : > { %v3818_v32 = vmul.f32 %v3773_v56, %v3690_v34  ;;  %v3777_v16 = vpop.permute.xlu0 %3776  ;;  %v8574_v56 = vld [vmem:[%s8491_s23 + $0x78] sm:$0xff] }
 0xd36   : > { %v3820_v43 = vmul.f32 %v3777_v16, %v3692_v52  ;;  %v8578_v16 = vld [vmem:[%s8491_s23 + $0x70] sm:$0xff] }
 0xd37   : > { %3852 = vrot.lane.b32.xlu0 %v3818_v32, %s6014_s27  ;;  %v3701_v32 = vmul.f32 %v3557_v14, %v3557_v14 }
 0xd38   : > { %v3779_v49 = vpop.permute.xlu1 %3778 }
 0xd39   : > { %v3821_v44 = vmul.f32 %v3779_v49, %v3693_v29  ;;  %v3700_v29 = vmul.f32 %v3556_v15, %v3556_v15  ;;  %v3559_v49 = vsub.f32 %v8574_v56, %v8472_v20 }
 0xd3b   : > { %3858 = vrot.lane.b32.xlu1 %v3821_v44, %s6014_s27  ;;  %3856 = vrot.lane.b32.xlu0 %v3820_v43, %s6014_s27  ;;  %v3558_v44 = vsub.f32 %v8578_v16, %v8476_v35 }
 0xd3c   : > { %v3781_v17 = vpop.permute.xlu0 %3780  ;;  %v3783_v57 = vpop.permute.xlu1 %3782 }
 0xd3d   : > { %v3822_v6 = vmul.f32 %v3781_v17, %v3694_v51  ;;  %v3823_v33 = vmul.f32 %v3783_v57, %v3695_v18  ;;  %v3703_v51 = vmul.f32 %v3559_v49, %v3559_v49  ;;  %v3702_v17 = vmul.f32 %v3558_v44, %v3558_v44 }
 0xd3e   : > { %v3678_v44 = vadd.f32 1.837877, %v8435_v5  ;;  %v3681_v5 = vadd.f32 1.837877, %v8443_v41  ;;  %v3683_v41 = vadd.f32 1.837877, %v8454_v23 }
 0xd3f   : > { %3862 = vrot.lane.b32.xlu1 %v3823_v33, %s6014_s27  ;;  %3860 = vrot.lane.b32.xlu0 %v3822_v6, %s6014_s27 }
 0xd43   : > { %v3787_v7 = vpop.permute.xlu1 %3786 }
 0xd44   : > { %v3825_v22 = vmul.f32 %v3787_v7, %v3697_v40  ;;  %v3785_v8 = vpop.permute.xlu0 %3784  ;;  %v3672_v40 = vadd.f32 1.837877, %v8411_v24 }
 0xd45   : > { %v3824_v48 = vmul.f32 %v3785_v8, %v3696_v62 }
 0xd46   : > { %3866 = vrot.lane.b32.xlu1 %v3825_v22, %s6014_s27 }
 0xd47   : > { %3864 = vrot.lane.b32.xlu0 %v3824_v48, %s6014_s27  ;;  %v3675_v48 = vadd.f32 1.837877, %v8416_v42 }
 0xd4a   : > { %v3791_v27 = vpop.permute.xlu1 %3790 }
 0xd4b   : > { %v3827_v34 = vmul.f32 %v3791_v27, %v3699_v36  ;;  %v3789_v28 = vpop.permute.xlu0 %3788 }
 0xd4c   : > { %v3826_v46 = vmul.f32 %v3789_v28, %v3698_v53  ;;  %v3677_v28 = vadd.f32 1.837877, %v8424_v47 }
 0xd4d   : > { %3870 = vrot.lane.b32.xlu1 %v3827_v34, %s6014_s27 }
 0xd4e   : > { %v3795_v52 = vpop.permute.xlu1 %3794  ;;  %3868 = vrot.lane.b32.xlu0 %v3826_v46, %s6014_s27  ;;  %v3676_v46 = vadd.f32 1.837877, %v8427_v63 }
 0xd4f   : > { %v3829_v10 = vmul.f32 %v3795_v52, %v3701_v32  ;;  %v3793_v11 = vpop.permute.xlu0 %3792 }
 0xd50   : > { %v3828_v43 = vmul.f32 %v3793_v11, %v3700_v29 }
 0xd51   : > { %3874 = vrot.lane.b32.xlu1 %v3829_v10, %s6014_s27 }
 0xd52   : > { %3872 = vrot.lane.b32.xlu0 %v3828_v43, %s6014_s27  ;;  %v3679_v43 = vadd.f32 1.837877, %v8432_v21 }
 0xd54   : > { %v3799_v18 = vpop.permute.xlu1 %3798 }
 0xd55   : > { %v3831_v57 = vmul.f32 %v3799_v18, %v3703_v51  ;;  %v3797_v6 = vpop.permute.xlu0 %3796 }
 0xd56   : > { %v3830_v33 = vmul.f32 %v3797_v6, %v3702_v17 }
 0xd57   : > { %3878 = vrot.lane.b32.xlu1 %v3831_v57, %s6014_s27 }
 0xd58   : > { %3876 = vrot.lane.b32.xlu0 %v3830_v33, %s6014_s27 }
 0xda1   : > { %v3851_v0 = vpop.permute.xlu1 %3850 }
 0xda2   : > { %v3897_v7 = vadd.f32 %v3851_v0, %v3673_v12  ;;  %v3849_v62 = vpop.permute.xlu0 %3848 }
 0xda3   : > { %v3896_v22 = vadd.f32 %v3849_v62, %v3672_v40  ;;  %v3680_v40 = vadd.f32 1.837877, %v8446_v59 }
 0xda4   : > { %v3913_v8 = vmul.f32 -0.5, %v3897_v7 }
 0xda5   : > { %v3912_v19 = vmul.f32 -0.5, %v3896_v22  ;;  %v3855_v61 = vpop.permute.xlu1 %3854 }
 0xda6   : > { %v8592_v36 = vadd.f32 -0.2876821, %v3913_v8  ;;  %v3899_v14 = vadd.f32 %v3855_v61, %v3675_v48 }
 0xda7   : > { %v8594_v27 = vadd.f32 -0.2876821, %v3912_v19 }
 0xda8   : > { %v3915_v53 = vmul.f32 -0.5, %v3899_v14  ;;  %3962 = vrot.lane.b32.xlu1 %v8592_v36, %s6013_s19  ;;  %v3682_v14 = vadd.f32 1.837877, %v8457_v3 }
 0xda9   : > { %3960 = vrot.lane.b32.xlu0 %v8594_v27, %s6013_s19  ;;  %v3853_v24 = vpop.permute.xlu0 %3852 }
 0xdaa   : > { %v8601_v15 = vadd.f32 -0.2876821, %v3915_v53  ;;  %v3898_v42 = vadd.f32 %v3853_v24, %v3674_v37 }
 0xdac   : > { %v3914_v34 = vmul.f32 -0.5, %v3898_v42  ;;  %3966 = vrot.lane.b32.xlu1 %v8601_v15, %s6013_s19 }
 0xdad   : > { %v3859_v32 = vpop.permute.xlu1 %3858  ;;  %v3857_v52 = vpop.permute.xlu0 %3856 }
 0xdae   : > { %v8607_v29 = vadd.f32 -0.2876821, %v3914_v34  ;;  %v3901_v60 = vadd.f32 %v3859_v32, %v3677_v28  ;;  %v3900_v10 = vadd.f32 %v3857_v52, %v3676_v46  ;;  %v3685_v34 = vadd.f32 1.837877, %v8461_v25 }
 0xdaf   : > { %v3684_v32 = vadd.f32 1.837877, %v8467_v30 }
 0xdb0   : > { %v3917_v11 = vmul.f32 -0.5, %v3901_v60  ;;  %v3916_v49 = vmul.f32 -0.5, %v3900_v10  ;;  %3964 = vrot.lane.b32.xlu0 %v8607_v29, %s6013_s19 }
 0xdb1   : > { %v3863_v51 = vpop.permute.xlu1 %3862  ;;  %v3861_v18 = vpop.permute.xlu0 %3860 }
 0xdb2   : > { %v8613_v47 = vadd.f32 -0.2876821, %v3917_v11  ;;  %v8615_v63 = vadd.f32 -0.2876821, %v3916_v49  ;;  %v3903_v17 = vadd.f32 %v3863_v51, %v3679_v43  ;;  %v3902_v57 = vadd.f32 %v3861_v18, %v3678_v44 }
 0xdb3   : > { %v3687_v43 = vadd.f32 1.837877, %v8472_v20  ;;  %v3686_v51 = vadd.f32 1.837877, %v8476_v35  ;;  %v3529_v20 = vmul.f32 %v8494_v1, %v8494_v1  ;;  %v3528_v35 = vmul.f32 %v8497_v50, %v8497_v50 }
 0xdb4   : > { %v3919_v6 = vmul.f32 -0.5, %v3903_v17  ;;  %v3918_v33 = vmul.f32 -0.5, %v3902_v57  ;;  %3970 = vrot.lane.b32.xlu1 %v8613_v47, %s6013_s19  ;;  %3968 = vrot.lane.b32.xlu0 %v8615_v63, %s6013_s19  ;;  %v3533_v50 = vmul.f32 %v8519_v26, %v8519_v26 }
 0xdb6   : > { %v8621_v12 = vadd.f32 -0.2876821, %v3919_v6  ;;  %v8623_v21 = vadd.f32 -0.2876821, %v3918_v33  ;;  %v3613_v26 = vmul.f32 4.539993e-05, %v3533_v50 }
 0xdb8   : > { %v3867_v0 = vpop.permute.xlu1 %3866  ;;  %3974 = vrot.lane.b32.xlu1 %v8621_v12, %s6013_s19  ;;  %3972 = vrot.lane.b32.xlu0 %v8623_v21, %s6013_s19 }
 0xdb9   : > { %v3905_v7 = vadd.f32 %v3867_v0, %v3681_v5  ;;  %v3865_v62 = vpop.permute.xlu0 %3864 }
 0xdba   : > { %v3904_v22 = vadd.f32 %v3865_v62, %v3680_v40  ;;  %v3531_v40 = vmul.f32 %v8504_v2, %v8504_v2  ;;  %v3608_v62 = vmul.f32 4.539993e-05, %v3528_v35  ;;  %v3532_v2 = vmul.f32 %v8516_v45, %v8516_v45 }
 0xdbb   : > { %v3921_v8 = vmul.f32 -0.5, %v3905_v7  ;;  %v3609_v7 = vmul.f32 4.539993e-05, %v3529_v20 }
 0xdbc   : > { %v3920_v48 = vmul.f32 -0.5, %v3904_v22  ;;  %v3561_v22 = vadd.f32 1.837877, %v3529_v20 }
 0xdbd   : > { %v8631_v19 = vadd.f32 -0.2876821, %v3921_v8  ;;  %v3560_v8 = vadd.f32 1.837877, %v3528_v35  ;;  %v3564_v35 = vadd.f32 1.837877, %v3532_v2 }
 0xdbe   : > { %v8633_v61 = vadd.f32 -0.2876821, %v3920_v48  ;;  %v3611_v48 = vmul.f32 4.539993e-05, %v3531_v40 }
 0xdbf   : > { %3978 = vrot.lane.b32.xlu1 %v8631_v19, %s6013_s19  ;;  %v3871_v59 = vpop.permute.xlu1 %3870 }
 0xdc0   : > { %v3907_v53 = vadd.f32 %v3871_v59, %v3683_v41  ;;  %3976 = vrot.lane.b32.xlu0 %v8633_v61, %s6013_s19  ;;  %v3869_v37 = vpop.permute.xlu0 %3868  ;;  %v3530_v41 = vmul.f32 %v8509_v31, %v8509_v31  ;;  %v3625_v59 = vadd.f32 11.837877, %v3609_v7  ;;  %v3627_v1 = vadd.f32 11.837877, %v3611_v48 }
 0xdc1   : > { %v3906_v24 = vadd.f32 %v3869_v37, %v3682_v14  ;;  %v3624_v14 = vadd.f32 11.837877, %v3608_v62  ;;  %v3563_v37 = vadd.f32 1.837877, %v3531_v40  ;;  %v3629_v7 = vadd.f32 11.837877, %v3613_v26 }
 0xdc2   : > { %v3923_v42 = vmul.f32 -0.5, %v3907_v53  ;;  %v3577_v53 = vmul.f32 -0.5, %v3561_v22 }
 0xdc3   : > { %v3922_v28 = vmul.f32 -0.5, %v3906_v24  ;;  %v3875_v46 = vpop.permute.xlu1 %3874  ;;  %v3576_v24 = vmul.f32 -0.5, %v3560_v8 }
 0xdc4   : > { %v8643_v23 = vadd.f32 -0.2876821, %v3923_v42  ;;  %v3909_v52 = vadd.f32 %v3875_v46, %v3685_v34  ;;  %v3873_v60 = vpop.permute.xlu0 %3872  ;;  %v3641_v42 = vmul.f32 -0.5, %v3625_v59  ;;  %v3610_v34 = vmul.f32 4.539993e-05, %v3530_v41 }
 0xdc5   : > { %v8645_v10 = vadd.f32 -0.2876821, %v3922_v28  ;;  %v3908_v3 = vadd.f32 %v3873_v60, %v3684_v32  ;;  %v3640_v28 = vmul.f32 -0.5, %v3624_v14  ;;  %v8681_v46 = vadd.f32 -1.89712, %v3577_v53 }
 0xdc6   : > { %v3925_v11 = vmul.f32 -0.5, %v3909_v52  ;;  %3982 = vrot.lane.b32.xlu1 %v8643_v23, %s6013_s19  ;;  %v3579_v32 = vmul.f32 -0.5, %v3563_v37  ;;  %v3562_v52 = vadd.f32 1.837877, %v3530_v41  ;;  %v8683_v31 = vadd.f32 -1.89712, %v3576_v24 }
 0xdc7   : > { %v3924_v49 = vmul.f32 -0.5, %v3908_v3  ;;  %3980 = vrot.lane.b32.xlu0 %v8645_v10, %s6013_s19  ;;  %v3643_v60 = vmul.f32 -0.5, %v3627_v1  ;;  %v3535_v3 = vmul.f32 %v8530_v58, %v8530_v58  ;;  %v8691_v45 = vadd.f32 -2.3025851, %v3640_v28 }
 0xdc8   : > { %v8651_v25 = vadd.f32 -0.2876821, %v3925_v11  ;;  %v8687_v11 = vadd.f32 -2.3025851, %v3641_v42  ;;  %v3537_v24 = vmul.f32 %v8540_v55, %v8540_v55  ;;  %v3536_v1 = vmul.f32 %v8543_v38, %v8543_v38 }
 0xdc9   : > { %v8654_v30 = vadd.f32 -0.2876821, %v3924_v49  ;;  %v3879_v44 = vpop.permute.xlu1 %3878  ;;  %v3626_v49 = vadd.f32 11.837877, %v3610_v34  ;;  %v8697_v20 = vadd.f32 -2.3025851, %v3643_v60 }
 0xdca   : > { %v3911_v18 = vadd.f32 %v3879_v44, %v3687_v43  ;;  %v3877_v17 = vpop.permute.xlu0 %3876  ;;  %3986 = vrot.lane.b32.xlu1 %v8651_v25, %s6013_s19  ;;  %v3534_v43 = vmul.f32 %v8527_v9, %v8527_v9  ;;  %v3615_v62 = vmul.f32 4.539993e-05, %v3535_v3  ;;  %v3567_v37 = vadd.f32 1.837877, %v3535_v3 }
 0xdcb   : > { %v3910_v57 = vadd.f32 %v3877_v17, %v3686_v51  ;;  %3984 = vrot.lane.b32.xlu0 %v8654_v30, %s6013_s19  ;;  %v3612_v51 = vmul.f32 4.539993e-05, %v3532_v2  ;;  %v3642_v9 = vmul.f32 -0.5, %v3626_v49  ;;  %v3645_v28 = vmul.f32 -0.5, %v3629_v7 }
 0xdcc   : > { %v3927_v6 = vmul.f32 -0.5, %v3911_v18  ;;  %v3614_v41 = vmul.f32 4.539993e-05, %v3534_v43  ;;  %v3566_v42 = vadd.f32 1.837877, %v3534_v43  ;;  %v3583_v49 = vmul.f32 -0.5, %v3567_v37 }
 0xdcd   : > { %v3926_v33 = vmul.f32 -0.5, %v3910_v57  ;;  %v8694_v57 = vadd.f32 -1.89712, %v3579_v32  ;;  %v3628_v48 = vadd.f32 11.837877, %v3612_v51 }
 0xdce   : > { %v8661_v5 = vadd.f32 -0.2876821, %v3927_v6  ;;  %v3578_v6 = vmul.f32 -0.5, %v3562_v52  ;;  %v8719_v2 = vadd.f32 -2.3025851, %v3642_v9  ;;  %v3582_v43 = vmul.f32 -0.5, %v3566_v42 }
 0xdcf   : > { %v8663_v0 = vadd.f32 -0.2876821, %v3926_v33  ;;  %v3565_v33 = vadd.f32 1.837877, %v3533_v50  ;;  %v3580_v50 = vmul.f32 -0.5, %v3564_v35  ;;  %v3644_v60 = vmul.f32 -0.5, %v3628_v48 }
 0xdd0   : > { %3990 = vrot.lane.b32.xlu1 %v8661_v5, %s6013_s19  ;;  %v8708_v14 = vadd.f32 -1.89712, %v3578_v6  ;;  %v3631_v32 = vadd.f32 11.837877, %v3615_v62  ;;  %v3630_v3 = vadd.f32 11.837877, %v3614_v41  ;;  %v3539_v62 = vmul.f32 %v8552_v13, %v8552_v13 }
 0xdd1   : > { %3988 = vrot.lane.b32.xlu0 %v8663_v0, %s6013_s19  ;;  %v3581_v53 = vmul.f32 -0.5, %v3565_v33  ;;  %v8726_v26 = vadd.f32 -1.89712, %v3580_v50  ;;  %v3616_v6 = vmul.f32 4.539993e-05, %v3536_v1 }
 0xdd2   : > { %v3646_v9 = vmul.f32 -0.5, %v3630_v3  ;;  %v3569_v7 = vadd.f32 1.837877, %v3537_v24  ;;  %v8740_v48 = vadd.f32 -1.89712, %v3583_v49 }
 0xdd3   : > { %v8724_v38 = vadd.f32 -1.89712, %v3581_v53  ;;  %v3568_v41 = vadd.f32 1.837877, %v3536_v1  ;;  %v8745_v37 = vadd.f32 -1.89712, %v3582_v43  ;;  %v3540_v43 = vmul.f32 %v8567_v54, %v8567_v54 }
 0xdd4   : > { %9045 = vst [vmem:[#allocation8_spill] sm:$0xff] %v8740_v48  ;;  %v3632_v42 = vadd.f32 11.837877, %v3616_v6  ;;  %v3619_v49 = vmul.f32 4.539993e-05, %v3539_v62 }
 0xdd5   : > { %9046 = vst [vmem:[#allocation9_spill] sm:$0xff] %v8745_v37 }
 0xe1a   : > { %v3963_v44 = vpop.permute.xlu1 %3962 }
 0xe1b   : > { %v4009_v18 = vmax.f32 %v8681_v46, %v3963_v44  ;;  %v3961_v17 = vpop.permute.xlu0 %3960  ;;  %v3617_v44 = vmul.f32 4.539993e-05, %v3537_v24 }
 0xe1c   : > { %v4008_v58 = vmax.f32 %v8683_v31, %v3961_v17  ;;  %v3647_v17 = vmul.f32 -0.5, %v3631_v32 }
 0xe1d   : > { %v8700_v40 = vmax.f32 %v4009_v18, %v8687_v11  ;;  %v8731_v18 = vadd.f32 -2.3025851, %v3645_v28  ;;  %v3633_v50 = vadd.f32 11.837877, %v3617_v44 }
 0xe1e   : > { %v8703_v22 = vmax.f32 %v4008_v58, %v8691_v45  ;;  %v3967_v8 = vpop.permute.xlu1 %3966  ;;  %v8733_v58 = vadd.f32 -2.3025851, %v3644_v60  ;;  %v8750_v13 = vadd.f32 -2.3025851, %v3647_v17  ;;  %v3585_v60 = vmul.f32 -0.5, %v3569_v7 }
 0xe1f   : > { %v4011_v59 = vmax.f32 %v8694_v57, %v3967_v8  ;;  %4106 = vrot.lane.b32.xlu1 %v8700_v40, %s6014_s27  ;;  %v3649_v17 = vmul.f32 -0.5, %v3633_v50 }
 0xe20   : > { %4104 = vrot.lane.b32.xlu0 %v8703_v22, %s6014_s27  ;;  %9047 = vst [vmem:[#allocation10_spill] sm:$0xff] %v8750_v13  ;;  %v8773_v7 = vadd.f32 -1.89712, %v3585_v60 }
 0xe21   : > { %v8717_v34 = vmax.f32 %v4011_v59, %v8697_v20  ;;  %v3538_v59 = vmul.f32 %v8555_v39, %v8555_v39  ;;  %v3541_v39 = vmul.f32 %v8563_v4, %v8563_v4  ;;  %v3648_v4 = vmul.f32 -0.5, %v3632_v42 }
 0xe22   : > { %v3965_v52 = vpop.permute.xlu0 %3964  ;;  %v8779_v50 = vadd.f32 -2.3025851, %v3649_v17 }
 0xe23   : > { %v4010_v55 = vmax.f32 %v8708_v14, %v3965_v52  ;;  %4110 = vrot.lane.b32.xlu1 %v8717_v34, %s6014_s27  ;;  %v8755_v52 = vadd.f32 -2.3025851, %v3646_v9  ;;  %v3618_v6 = vmul.f32 4.539993e-05, %v3538_v59  ;;  %v8785_v60 = vadd.f32 -2.3025851, %v3648_v4 }
 0xe25   : > { %v8729_v51 = vmax.f32 %v4010_v55, %v8719_v2  ;;  %9048 = vst [vmem:[#allocation11_spill] sm:$0xff] %v8755_v52  ;;  %v3584_v55 = vmul.f32 -0.5, %v3568_v41  ;;  %v3635_v41 = vadd.f32 11.837877, %v3619_v49  ;;  %v3634_v42 = vadd.f32 11.837877, %v3618_v6 }
 0xe26   : > { %v3971_v33 = vpop.permute.xlu1 %3970  ;;  %v3969_v35 = vpop.permute.xlu0 %3968  ;;  %9051 = vst [vmem:[#allocation14_spill] sm:$0xff] %v8785_v60 }
 0xe27   : > { %v4013_v8 = vmax.f32 %v8724_v38, %v3971_v33  ;;  %4108 = vrot.lane.b32.xlu0 %v8729_v51, %s6014_s27  ;;  %v4012_v53 = vmax.f32 %v8726_v26, %v3969_v35  ;;  %v3571_v35 = vadd.f32 1.837877, %v3539_v62  ;;  %v8777_v54 = vadd.f32 -1.89712, %v3584_v55 }
 0xe28   : > { %v3620_v62 = vmul.f32 4.539993e-05, %v3540_v43  ;;  %v3542_v55 = vmul.f32 %v8578_v16, %v8578_v16  ;;  %v3651_v6 = vmul.f32 -0.5, %v3635_v41 }
 0xe29   : > { %v8748_v24 = vmax.f32 %v4013_v8, %v8731_v18  ;;  %v8753_v28 = vmax.f32 %v4012_v53, %v8733_v58  ;;  %v3570_v8 = vadd.f32 1.837877, %v3538_v59  ;;  %9050 = vst [vmem:[#allocation13_spill] sm:$0xff] %v8777_v54  ;;  %v3621_v53 = vmul.f32 4.539993e-05, %v3541_v39 }
 0xe2a   : > { %v3975_v32 = vpop.permute.xlu1 %3974  ;;  %v3973_v1 = vpop.permute.xlu0 %3972  ;;  %v3587_v59 = vmul.f32 -0.5, %v3571_v35  ;;  %v3636_v4 = vadd.f32 11.837877, %v3620_v62  ;;  %v3622_v41 = vmul.f32 4.539993e-05, %v3542_v55 }
 0xe2b   : > { %v4015_v3 = vmax.f32 %v8740_v48, %v3975_v32  ;;  %4114 = vrot.lane.b32.xlu1 %v8748_v24, %s6014_s27  ;;  %v4014_v44 = vmax.f32 %v8745_v37, %v3973_v1  ;;  %4112 = vrot.lane.b32.xlu0 %v8753_v28, %s6014_s27  ;;  %v3543_v32 = vmul.f32 %v8574_v56, %v8574_v56  ;;  %v3586_v17 = vmul.f32 -0.5, %v3570_v8 }
 0xe2c   : > { %v3650_v56 = vmul.f32 -0.5, %v3634_v42 }
 0xe2d   : > { %v8768_v33 = vmax.f32 %v4015_v3, %v8750_v13  ;;  %v8771_v9 = vmax.f32 %v4014_v44, %v8755_v52  ;;  %v3573_v3 = vadd.f32 1.837877, %v3541_v39  ;;  %v3572_v52 = vadd.f32 1.837877, %v3540_v43 }
 0xe2e   : > { %v8797_v39 = vadd.f32 -1.89712, %v3587_v59  ;;  %v3623_v48 = vmul.f32 4.539993e-05, %v3543_v32  ;;  %v8801_v43 = vadd.f32 -1.89712, %v3586_v17 }
 0xe2f   : > { %9049 = vst [vmem:[#allocation12_spill] sm:$0xff] %v8771_v9  ;;  %4118 = vrot.lane.b32.xlu1 %v8768_v33, %s6014_s27  ;;  %4116 = vrot.lane.b32.xlu0 %v8771_v9, %s6014_s27  ;;  %v3637_v9 = vadd.f32 11.837877, %v3621_v53  ;;  %v3589_v16 = vmul.f32 -0.5, %v3573_v3  ;;  %v3588_v8 = vmul.f32 -0.5, %v3572_v52  ;;  %v3652_v59 = vmul.f32 -0.5, %v3636_v4 }
 0xe30   : > { %v8805_v53 = vadd.f32 -2.3025851, %v3651_v6  ;;  %v3575_v62 = vadd.f32 1.837877, %v3543_v32  ;;  %v3574_v3 = vadd.f32 1.837877, %v3542_v55 }
 0xe31   : > { %v3979_v1 = vpop.permute.xlu1 %3978  ;;  %v3653_v42 = vmul.f32 -0.5, %v3637_v9  ;;  %v3639_v17 = vadd.f32 11.837877, %v3623_v48  ;;  %v8823_v4 = vadd.f32 -2.3025851, %v3652_v59 }
 0xe32   : > { %v4017_v49 = vmax.f32 %v8773_v7, %v3979_v1  ;;  %v3977_v44 = vpop.permute.xlu0 %3976  ;;  %v8807_v1 = vadd.f32 -2.3025851, %v3650_v56  ;;  %v3591_v32 = vmul.f32 -0.5, %v3575_v62 }
 0xe33   : > { %v4016_v37 = vmax.f32 %v8777_v54, %v3977_v44  ;;  %v8813_v54 = vadd.f32 -1.89712, %v3588_v8  ;;  %v8818_v9 = vadd.f32 -2.3025851, %v3653_v42 }
 0xe34   : > { %v8792_v13 = vmax.f32 %v4017_v49, %v8779_v50 }
 0xe35   : > { %v8795_v35 = vmax.f32 %v4016_v37, %v8785_v60  ;;  %v8810_v60 = vadd.f32 -1.89712, %v3589_v16  ;;  %v3590_v16 = vmul.f32 -0.5, %v3574_v3 }
 0xe36   : > { %4122 = vrot.lane.b32.xlu1 %v8792_v13, %s6014_s27 }
 0xe37   : > { %9052 = vst [vmem:[#allocation15_spill] sm:$0xff] %v8795_v35  ;;  %4120 = vrot.lane.b32.xlu0 %v8795_v35, %s6014_s27  ;;  %v3638_v35 = vadd.f32 11.837877, %v3622_v41  ;;  %v3655_v41 = vmul.f32 -0.5, %v3639_v17  ;;  %v8839_v3 = vadd.f32 -1.89712, %v3590_v16 }
 0xe38   : > { %v3983_v37 = vpop.permute.xlu1 %3982 }
 0xe39   : > { %v4019_v49 = vmax.f32 %v8797_v39, %v3983_v37  ;;  %v3981_v44 = vpop.permute.xlu0 %3980  ;;  %v3654_v42 = vmul.f32 -0.5, %v3638_v35  ;;  %9054 = vst [vmem:[#allocation17_spill] sm:$0xff] %v8839_v3 }
 0xe3a   : > { %v4018_v52 = vmax.f32 %v8801_v43, %v3981_v44  ;;  %v8841_v44 = vadd.f32 -2.3025851, %v3655_v41 }
 0xe3b   : > { %v8816_v6 = vmax.f32 %v4019_v49, %v8805_v53  ;;  %v8834_v49 = vadd.f32 -1.89712, %v3591_v32 }
 0xe3c   : > { %v8821_v56 = vmax.f32 %v4018_v52, %v8807_v1  ;;  %v3987_v55 = vpop.permute.xlu1 %3986  ;;  %9055 = vst [vmem:[#allocation18_spill] sm:$0xff] %v8841_v44  ;;  %v8845_v52 = vadd.f32 -2.3025851, %v3654_v42 }
 0xe3d   : > { %v4021_v48 = vmax.f32 %v8810_v60, %v3987_v55  ;;  %4126 = vrot.lane.b32.xlu1 %v8816_v6, %s6014_s27  ;;  %v3985_v8 = vpop.permute.xlu0 %3984  ;;  %9053 = vst [vmem:[#allocation16_spill] sm:$0xff] %v8834_v49 }
 0xe3e   : > { %v4020_v37 = vmax.f32 %v8813_v54, %v3985_v8  ;;  %4124 = vrot.lane.b32.xlu0 %v8821_v56, %s6014_s27  ;;  %9056 = vst [vmem:[#allocation19_spill] sm:$0xff] %v8845_v52 }
 0xe3f   : > { %v8832_v62 = vmax.f32 %v4021_v48, %v8818_v9 }
 0xe40   : > { %v8837_v59 = vmax.f32 %v4020_v37, %v8823_v4 }
 0xe41   : > { %4130 = vrot.lane.b32.xlu1 %v8832_v62, %s6014_s27 }
 0xe42   : > { %v3991_v17 = vpop.permute.xlu1 %3990  ;;  %4128 = vrot.lane.b32.xlu0 %v8837_v59, %s6014_s27 }
 0xe43   : > { %v4023_v35 = vmax.f32 %v8834_v49, %v3991_v17  ;;  %v3989_v32 = vpop.permute.xlu0 %3988 }
 0xe44   : > { %v4022_v55 = vmax.f32 %v8839_v3, %v3989_v32 }
 0xe45   : > { %v8852_v48 = vmax.f32 %v4023_v35, %v8841_v44 }
 0xe46   : > { %v8855_v16 = vmax.f32 %v4022_v55, %v8845_v52 }
 0xe47   : > { %4134 = vrot.lane.b32.xlu1 %v8852_v48, %s6014_s27 }
 0xe48   : > { %9057 = vst [vmem:[#allocation20_spill] sm:$0xff] %v8855_v16  ;;  %4132 = vrot.lane.b32.xlu0 %v8855_v16, %s6014_s27 }
 0xe91   : > { %v4107_v8 = vpop.permute.xlu1 %4106 }
 0xe92   : > { %v4153_v41 = vsub.f32 %v8592_v36, %v4107_v8  ;;  %v4105_v37 = vpop.permute.xlu0 %4104 }
 0xe93   : > { %v4152_v42 = vsub.f32 %v8594_v27, %v4105_v37 }
 0xe94   : > { %v4170_v17 = vmul.f32 1.442695, %v4153_v41 }
 0xe95   : > { %v4168_v32 = vmul.f32 1.442695, %v4152_v42  ;;  %v4111_v3 = vpop.permute.xlu1 %4110 }
 0xe96   : > { %5805 = vpow2.f32 %v4170_v17  ;;  %v4155_v35 = vsub.f32 %v8601_v15, %v4111_v3 }
 0xe97   : > { %5807 = vpow2.f32 %v4168_v32 }
 0xe98   : > { %v4174_v55 = vmul.f32 1.442695, %v4155_v35 }
 0xe99   : > { %v4109_v52 = vpop.permute.xlu0 %4108 }
 0xe9a   : > { %5809 = vpow2.f32 %v4174_v55  ;;  %v4154_v44 = vsub.f32 %v8607_v29, %v4109_v52 }
 0xe9c   : > { %v4172_v49 = vmul.f32 1.442695, %v4154_v44 }
 0xe9d   : > { %v4115_v16 = vpop.permute.xlu1 %4114  ;;  %v4113_v8 = vpop.permute.xlu0 %4112 }
 0xe9e   : > { %5811 = vpow2.f32 %v4172_v49  ;;  %v4157_v36 = vsub.f32 %v8613_v47, %v4115_v16  ;;  %v4156_v27 = vsub.f32 %v8615_v63, %v4113_v8 }
 0xea0   : > { %v5806_v41 = vpop.eup %5805  ;;  %v4178_v37 = vmul.f32 1.442695, %v4157_v36  ;;  %v4176_v17 = vmul.f32 1.442695, %v4156_v27 }
 0xea1   : > { %v5808_v42 = vpop.eup %5807  ;;  %4218 = vrot.lane.b32.xlu1 %v5806_v41, %s6013_s19  ;;  %v4119_v15 = vpop.permute.xlu1 %4118 }
 0xea2   : > { %5813 = vpow2.f32 %v4178_v37  ;;  %v4159_v3 = vsub.f32 %v8621_v12, %v4119_v15  ;;  %v4117_v32 = vpop.permute.xlu0 %4116  ;;  %4216 = vrot.lane.b32.xlu0 %v5808_v42, %s6013_s19 }
 0xea3   : > { %5815 = vpow2.f32 %v4176_v17  ;;  %v4158_v29 = vsub.f32 %v8623_v21, %v4117_v32 }
 0xea4   : > { %v5810_v47 = vpop.eup %5809  ;;  %v4182_v49 = vmul.f32 1.442695, %v4159_v3 }
 0xea5   : > { %v4180_v44 = vmul.f32 1.442695, %v4158_v29  ;;  %4222 = vrot.lane.b32.xlu1 %v5810_v47, %s6013_s19 }
 0xea6   : > { %5817 = vpow2.f32 %v4182_v49 }
 0xea7   : > { %5819 = vpow2.f32 %v4180_v44 }
 0xea8   : > { %v5812_v63 = vpop.eup %5811  ;;  %v4123_v52 = vpop.permute.xlu1 %4122 }
 0xea9   : > { %v4161_v16 = vsub.f32 %v8631_v19, %v4123_v52  ;;  %v4121_v35 = vpop.permute.xlu0 %4120  ;;  %4220 = vrot.lane.b32.xlu0 %v5812_v63, %s6013_s19 }
 0xeaa   : > { %v4160_v12 = vsub.f32 %v8633_v61, %v4121_v35 }
 0xeab   : > { %v4186_v55 = vmul.f32 1.442695, %v4161_v16 }
 0xeac   : > { %v5814_v36 = vpop.eup %5813  ;;  %v4184_v8 = vmul.f32 1.442695, %v4160_v12 }
 0xead   : > { %v5816_v21 = vpop.eup %5815  ;;  %5821 = vpow2.f32 %v4186_v55  ;;  %4226 = vrot.lane.b32.xlu1 %v5814_v36, %s6013_s19 }
 0xeae   : > { %5823 = vpow2.f32 %v4184_v8  ;;  %4224 = vrot.lane.b32.xlu0 %v5816_v21, %s6013_s19 }
 0xeaf   : > { %v4127_v27 = vpop.permute.xlu1 %4126 }
 0xeb0   : > { %v5818_v41 = vpop.eup %5817  ;;  %v4163_v37 = vsub.f32 %v8643_v23, %v4127_v27  ;;  %v4125_v19 = vpop.permute.xlu0 %4124  ;;  %v4040_v27 = vsub.f32 %v8683_v31, %v8703_v22  ;;  %v4282_v31 = vsub.f32 %v8719_v2, %v8729_v51  ;;  %v4284_v2 = vsub.f32 %v8733_v58, %v8753_v28 }
 0xeb1   : > { %v5820_v42 = vpop.eup %5819  ;;  %v4162_v17 = vsub.f32 %v8645_v10, %v4125_v19  ;;  %4230 = vrot.lane.b32.xlu1 %v5818_v41, %s6013_s19  ;;  %v4281_v41 = vsub.f32 %v8687_v11, %v8700_v40 }
 0xeb2   : > { %v4190_v61 = vmul.f32 1.442695, %v4163_v37  ;;  %4228 = vrot.lane.b32.xlu0 %v5820_v42, %s6013_s19  ;;  %v4280_v37 = vsub.f32 %v8691_v45, %v8703_v22  ;;  %v4043_v42 = vsub.f32 %v8694_v57, %v8717_v34  ;;  %v4045_v45 = vsub.f32 %v8724_v38, %v8748_v24 }
 0xeb3   : > { %v4188_v15 = vmul.f32 1.442695, %v4162_v17  ;;  %v4131_v3 = vpop.permute.xlu1 %4130  ;;  %v4056_v17 = vmul.f32 1.442695, %v4040_v27  ;;  %v4285_v57 = vsub.f32 %v8731_v18, %v8748_v24 }
 0xeb4   : > { %5825 = vpow2.f32 %v4190_v61  ;;  %v4165_v32 = vsub.f32 %v8651_v25, %v4131_v3  ;;  %v4129_v29 = vpop.permute.xlu0 %4128  ;;  %v4283_v61 = vsub.f32 %v8697_v20, %v8717_v34  ;;  %v4296_v3 = vmul.f32 1.442695, %v4280_v37 }
 0xeb5   : > { %5827 = vpow2.f32 %v4188_v15  ;;  %v4164_v47 = vsub.f32 %v8654_v30, %v4129_v29  ;;  %v4298_v15 = vmul.f32 1.442695, %v4281_v41  ;;  %v4062_v11 = vmul.f32 1.442695, %v4043_v42 }
 0xeb6   : > { %v4194_v49 = vmul.f32 1.442695, %v4165_v32  ;;  %v4302_v32 = vmul.f32 1.442695, %v4283_v61  ;;  %v4044_v29 = vsub.f32 %v8726_v26, %v8753_v28  ;;  %v4289_v41 = vsub.f32 %v8779_v50, %v8792_v13  ;;  %v9065_v50 = vld [vmem:[#allocation14_spill] sm:$0xff] }
 0xeb7   : > { %v5822_v23 = vpop.eup %5821  ;;  %v4192_v44 = vmul.f32 1.442695, %v4164_v47  ;;  %v4066_v47 = vmul.f32 1.442695, %v4045_v45 }
 0xeb8   : > { %v5824_v63 = vpop.eup %5823  ;;  %5829 = vpow2.f32 %v4194_v49  ;;  %4234 = vrot.lane.b32.xlu1 %v5822_v23, %s6013_s19  ;;  %v9058_v49 = vld [vmem:[#allocation8_spill] sm:$0xff]  ;;  %v4306_v23 = vmul.f32 1.442695, %v4285_v57 }
 0xeb9   : > { %5831 = vpow2.f32 %v4192_v44  ;;  %v4135_v10 = vpop.permute.xlu1 %4134  ;;  %4232 = vrot.lane.b32.xlu0 %v5824_v63, %s6013_s19  ;;  %v4047_v38 = vsub.f32 %v9058_v49, %v8768_v33  ;;  %v9059_v44 = vld [vmem:[#allocation10_spill] sm:$0xff]  ;;  %v4064_v63 = vmul.f32 1.442695, %v4044_v29 }
 0xeba   : > { %v4167_v52 = vsub.f32 %v8661_v5, %v4135_v10  ;;  %v4133_v16 = vpop.permute.xlu0 %4132  ;;  %v4287_v18 = vsub.f32 %v9059_v44, %v8768_v33  ;;  %v9060_v10 = vld [vmem:[#allocation12_spill] sm:$0xff] }
 0xebb   : > { %v4166_v25 = vsub.f32 %v8663_v0, %v4133_v16  ;;  %v4041_v0 = vsub.f32 %v8681_v46, %v8700_v40  ;;  %v4042_v46 = vsub.f32 %v8708_v14, %v8729_v51  ;;  %v4300_v14 = vmul.f32 1.442695, %v4282_v31 }
 0xebc   : > { %v4198_v35 = vmul.f32 1.442695, %v4167_v52  ;;  %v9061_v52 = vld [vmem:[#allocation9_spill] sm:$0xff]  ;;  %v4304_v16 = vmul.f32 1.442695, %v4284_v2  ;;  %v4051_v2 = vsub.f32 %v8797_v39, %v8816_v6  ;;  %v4290_v39 = vsub.f32 %v8807_v1, %v8821_v56 }
 0xebd   : > { %v4196_v12 = vmul.f32 1.442695, %v4166_v25  ;;  %v4058_v19 = vmul.f32 1.442695, %v4041_v0  ;;  %v4060_v20 = vmul.f32 1.442695, %v4042_v46  ;;  %v4046_v26 = vsub.f32 %v9061_v52, %v9060_v10 }
 0xebe   : > { %v5826_v55 = vpop.eup %5825  ;;  %5833 = vpow2.f32 %v4198_v35  ;;  %v4070_v25 = vmul.f32 1.442695, %v4047_v38  ;;  %v4310_v58 = vmul.f32 1.442695, %v4287_v18  ;;  %v9062_v35 = vld [vmem:[#allocation11_spill] sm:$0xff]  ;;  %v4053_v1 = vsub.f32 %v8810_v60, %v8832_v62 }
 0xebf   : > { %v5828_v30 = vpop.eup %5827  ;;  %5835 = vpow2.f32 %v4196_v12  ;;  %4238 = vrot.lane.b32.xlu1 %v5826_v55, %s6013_s19  ;;  %v4286_v12 = vsub.f32 %v9062_v35, %v9060_v10  ;;  %v9063_v46 = vld [vmem:[#allocation15_spill] sm:$0xff]  ;;  %v4293_v60 = vsub.f32 %v8818_v9, %v8832_v62 }
 0xec0   : > { %4236 = vrot.lane.b32.xlu0 %v5828_v30, %s6013_s19  ;;  %5837 = vpow2.f32 %v4058_v19  ;;  %v4068_v30 = vmul.f32 1.442695, %v4046_v26  ;;  %v4288_v29 = vsub.f32 %v9065_v50, %v9063_v46  ;;  %v4291_v26 = vsub.f32 %v8805_v53, %v8816_v6 }
 0xec1   : > { %5839 = vpow2.f32 %v4056_v17  ;;  %v4308_v42 = vmul.f32 1.442695, %v4286_v12 }
 0xec2   : > { %v5830_v36 = vpop.eup %5829  ;;  %5841 = vpow2.f32 %v4298_v15  ;;  %v4312_v52 = vmul.f32 1.442695, %v4288_v29  ;;  %v4318_v53 = vmul.f32 1.442695, %v4291_v26 }
 0xec3   : > { %v5832_v8 = vpop.eup %5831  ;;  %4242 = vrot.lane.b32.xlu1 %v5830_v36, %s6013_s19  ;;  %5843 = vpow2.f32 %v4296_v3  ;;  %v4049_v36 = vsub.f32 %v8773_v7, %v8792_v13  ;;  %v9064_v7 = vld [vmem:[#allocation13_spill] sm:$0xff] }
 0xec4   : > { %4240 = vrot.lane.b32.xlu0 %v5832_v8, %s6013_s19  ;;  %5845 = vpow2.f32 %v4062_v11  ;;  %v4048_v3 = vsub.f32 %v9064_v7, %v9063_v46 }
 0xec5   : > { %5847 = vpow2.f32 %v4302_v32  ;;  %v4074_v15 = vmul.f32 1.442695, %v4049_v36 }
 0xec6   : > { %5849 = vpow2.f32 %v4060_v20  ;;  %v4314_v20 = vmul.f32 1.442695, %v4289_v41  ;;  %v4072_v38 = vmul.f32 1.442695, %v4048_v3 }
 0xec7   : > { %5851 = vpow2.f32 %v4300_v14 }
 0xec8   : > { %v5834_v5 = vpop.eup %5833  ;;  %5853 = vpow2.f32 %v4066_v47 }
 0xec9   : > { %v5836_v21 = vpop.eup %5835  ;;  %4246 = vrot.lane.b32.xlu1 %v5834_v5, %s6013_s19  ;;  %5855 = vpow2.f32 %v4306_v23 }
 0xeca   : > { %4244 = vrot.lane.b32.xlu0 %v5836_v21, %s6013_s19  ;;  %v5838_v55 = vpop.eup %5837  ;;  %5857 = vpow2.f32 %v4064_v63 }
 0xecb   : > { %v5840_v5 = vpop.eup %5839  ;;  %5859 = vpow2.f32 %v4304_v16 }
 0xecc   : > { %v5842_v27 = vpop.eup %5841  ;;  %5861 = vpow2.f32 %v4070_v25  ;;  %v4078_v25 = vmul.f32 1.442695, %v4051_v2 }
 0xecd   : > { %v5844_v19 = vpop.eup %5843  ;;  %5863 = vpow2.f32 %v4310_v58  ;;  %v4050_v58 = vsub.f32 %v8801_v43, %v8821_v56  ;;  %v4316_v43 = vmul.f32 1.442695, %v4290_v39 }
 0xece   : > { %v5846_v61 = vpop.eup %5845  ;;  %5865 = vpow2.f32 %v4068_v30 }
 0xecf   : > { %v5848_v45 = vpop.eup %5847 }
 0xed0   : > { %v5850_v57 = vpop.eup %5849 }
 0xed1   : > { %v5852_v14 = vpop.eup %5851 }
 0xed2   : > { %v5854_v49 = vpop.eup %5853 }
 0xed3   : > { %v5856_v44 = vpop.eup %5855 }
 0xed4   : > { %v5858_v63 = vpop.eup %5857 }
 0xed5   : > { %v5860_v16 = vpop.eup %5859 }
 0xed6   : > { %v5862_v12 = vpop.eup %5861 }
 0xed7   : > { %v5864_v30 = vpop.eup %5863 }
 0xf13   : > { %v4219_v8 = vpop.permute.xlu1 %4218 }
 0xf14   : > { %v4265_v21 = vadd.f32 %v5838_v55, %v4219_v8  ;;  %v4217_v0 = vpop.permute.xlu0 %4216 }
 0xf15   : > { %v4264_v37 = vadd.f32 %v5840_v5, %v4217_v0  ;;  %v5866_v5 = vpop.eup %5865 }
 0xf16   : > { %v4329_v17 = vadd.f32 %v5842_v27, %v4265_v21  ;;  %v4076_v27 = vmul.f32 1.442695, %v4050_v58 }
 0xf17   : > { %v4328_v31 = vadd.f32 %v5844_v19, %v4264_v37  ;;  %v4223_v11 = vpop.permute.xlu1 %4222  ;;  %v4052_v19 = vsub.f32 %v8813_v54, %v8837_v59 }
 0xf18   : > { %5867 = vlog2.f32 %v4329_v17  ;;  %v4267_v32 = vadd.f32 %v5846_v61, %v4223_v11 }
 0xf19   : > { %5869 = vlog2.f32 %v4328_v31 }
 0xf1a   : > { %5871 = vpow2.f32 %v4308_v42  ;;  %v4331_v47 = vadd.f32 %v5848_v45, %v4267_v32 }
 0xf1b   : > { %5873 = vpow2.f32 %v4074_v15  ;;  %v4221_v23 = vpop.permute.xlu0 %4220 }
 0xf1c   : > { %5875 = vlog2.f32 %v4331_v47  ;;  %v4266_v18 = vadd.f32 %v5850_v57, %v4221_v23  ;;  %v4292_v57 = vsub.f32 %v8823_v4, %v8837_v59  ;;  %v4080_v47 = vmul.f32 1.442695, %v4052_v19 }
 0xf1d   : > { %5877 = vpow2.f32 %v4314_v20 }
 0xf1e   : > { %v4330_v35 = vadd.f32 %v5852_v14, %v4266_v18  ;;  %5879 = vpow2.f32 %v4072_v38  ;;  %v4082_v14 = vmul.f32 1.442695, %v4053_v1  ;;  %v9066_v38 = vld [vmem:[#allocation16_spill] sm:$0xff] }
 0xf1f   : > { %v4227_v55 = vpop.permute.xlu1 %4226  ;;  %v4055_v4 = vsub.f32 %v9066_v38, %v8852_v48  ;;  %v9067_v18 = vld [vmem:[#allocation20_spill] sm:$0xff] }
 0xf20   : > { %5881 = vlog2.f32 %v4330_v35  ;;  %v4269_v36 = vadd.f32 %v5854_v49, %v4227_v55  ;;  %v4225_v8 = vpop.permute.xlu0 %4224  ;;  %v4322_v49 = vmul.f32 1.442695, %v4293_v60  ;;  %v9070_v55 = vld [vmem:[#allocation19_spill] sm:$0xff] }
 0xf21   : > { %5883 = vpow2.f32 %v4312_v52  ;;  %v4268_v21 = vadd.f32 %v5858_v63, %v4225_v8  ;;  %v9068_v63 = vld [vmem:[#allocation17_spill] sm:$0xff]  ;;  %v4086_v8 = vmul.f32 1.442695, %v4055_v4 }
 0xf22   : > { %v5868_v0 = vpop.eup %5867  ;;  %5885 = vpow2.f32 %v4078_v25  ;;  %v4333_v41 = vadd.f32 %v5856_v44, %v4269_v36  ;;  %v4320_v44 = vmul.f32 1.442695, %v4292_v57  ;;  %v4054_v52 = vsub.f32 %v9068_v63, %v9067_v18  ;;  %v9069_v25 = vld [vmem:[#allocation18_spill] sm:$0xff] }
 0xf23   : > { %v5870_v37 = vpop.eup %5869  ;;  %v4347_v42 = vmul.f32 0.6931472, %v5868_v0  ;;  %v4332_v17 = vadd.f32 %v5860_v16, %v4268_v21  ;;  %v4231_v61 = vpop.permute.xlu1 %4230  ;;  %v4295_v58 = vsub.f32 %v9069_v25, %v8852_v48 }
 0xf24   : > { %v5872_v15 = vpop.eup %5871  ;;  %v4345_v7 = vmul.f32 0.6931472, %v5870_v37  ;;  %5887 = vlog2.f32 %v4333_v41  ;;  %v4271_v3 = vadd.f32 %v5862_v12, %v4231_v61  ;;  %v4229_v31 = vpop.permute.xlu0 %4228  ;;  %v4084_v0 = vmul.f32 1.442695, %v4054_v52 }
 0xf25   : > { %v5874_v11 = vpop.eup %5873  ;;  %v4377_v54 = vadd.f32 %v4347_v42, %v8700_v40  ;;  %5889 = vlog2.f32 %v4332_v17  ;;  %v4270_v45 = vadd.f32 %v5866_v5, %v4229_v31  ;;  %v4326_v41 = vmul.f32 1.442695, %v4295_v58 }
 0xf26   : > { %v5876_v32 = vpop.eup %5875  ;;  %5891 = vpow2.f32 %v4318_v53  ;;  %v4376_v20 = vadd.f32 %v4345_v7, %v8703_v22  ;;  %v4335_v50 = vadd.f32 %v5864_v30, %v4271_v3  ;;  %v4294_v30 = vsub.f32 %v9070_v55, %v9067_v18 }
 0xf27   : > { %v5878_v29 = vpop.eup %5877  ;;  %5893 = vpow2.f32 %v4076_v27  ;;  %4394 = vst.msk [vmem:[%s8949_s24 + $0x8] sm:$0xff] %vm4392_vm1, %v4377_v54  ;;  %v4351_v2 = vmul.f32 0.6931472, %v5876_v32  ;;  %v4334_v9 = vadd.f32 %v5872_v15, %v4270_v45 }
 0xf28   : > { %4393 = vst.msk [vmem:[%s8949_s24] sm:$0xff] %vm4392_vm1, %v4376_v20  ;;  %5895 = vlog2.f32 %v4335_v50  ;;  %v5880_v40 = vpop.eup %5879  ;;  %v4324_v19 = vmul.f32 1.442695, %v4294_v30 }
 0xf29   : > { %v4379_v22 = vadd.f32 %v4351_v2, %v8717_v34  ;;  %5897 = vlog2.f32 %v4334_v9 }
 0xf2a   : > { %v5882_v23 = vpop.eup %5881  ;;  %5899 = vpow2.f32 %v4316_v43  ;;  %v4235_v26 = vpop.permute.xlu1 %4234 }
 0xf2b   : > { %v5884_v16 = vpop.eup %5883  ;;  %5901 = vpow2.f32 %v4082_v14  ;;  %4396 = vst.msk [vmem:[%s8949_s24 + $0x18] sm:$0xff] %vm4392_vm1, %v4379_v22  ;;  %v4349_v39 = vmul.f32 0.6931472, %v5882_v23  ;;  %v4273_v35 = vadd.f32 %v5874_v11, %v4235_v26  ;;  %v4233_v12 = vpop.permute.xlu0 %4232 }
 0xf2c   : > { %v5886_v34 = vpop.eup %5885  ;;  %5903 = vpow2.f32 %v4080_v47  ;;  %v4272_v36 = vadd.f32 %v5880_v40, %v4233_v12 }
 0xf2d   : > { %5905 = vpow2.f32 %v4322_v49  ;;  %v4378_v5 = vadd.f32 %v4349_v39, %v8729_v51  ;;  %v4337_v53 = vadd.f32 %v5878_v29, %v4273_v35 }
 0xf2e   : > { %v5888_v21 = vpop.eup %5887  ;;  %5907 = vpow2.f32 %v4320_v44  ;;  %v4336_v27 = vadd.f32 %v5884_v16, %v4272_v36 }
 0xf2f   : > { %v5890_v43 = vpop.eup %5889  ;;  %4395 = vst.msk [vmem:[%s8949_s24 + $0x10] sm:$0xff] %vm4392_vm1, %v4378_v5  ;;  %v4355_v37 = vmul.f32 0.6931472, %v5888_v21  ;;  %5909 = vlog2.f32 %v4337_v53 }
 0xf30   : > { %v5892_v1 = vpop.eup %5891  ;;  %v4353_v42 = vmul.f32 0.6931472, %v5890_v43  ;;  %5911 = vlog2.f32 %v4336_v27 }
 0xf31   : > { %v5894_v17 = vpop.eup %5893  ;;  %5913 = vpow2.f32 %v4086_v8  ;;  %v4381_v51 = vadd.f32 %v4355_v37, %v8748_v24  ;;  %v4239_v61 = vpop.permute.xlu1 %4238 }
 0xf32   : > { %v5896_v15 = vpop.eup %5895  ;;  %5915 = vpow2.f32 %v4084_v0  ;;  %v4380_v7 = vadd.f32 %v4353_v42, %v8753_v28  ;;  %v4275_v3 = vadd.f32 %v5886_v34, %v4239_v61  ;;  %v4237_v31 = vpop.permute.xlu0 %4236 }
 0xf33   : > { %v5898_v11 = vpop.eup %5897  ;;  %5917 = vpow2.f32 %v4326_v41  ;;  %4398 = vst.msk [vmem:[%s8949_s24 + $0x28] sm:$0xff] %vm4392_vm1, %v4381_v51  ;;  %v4359_v60 = vmul.f32 0.6931472, %v5896_v15  ;;  %v4274_v54 = vadd.f32 %v5894_v17, %v4237_v31 }
 0xf34   : > { %v5900_v45 = vpop.eup %5899  ;;  %5919 = vpow2.f32 %v4324_v19  ;;  %4397 = vst.msk [vmem:[%s8949_s24 + $0x20] sm:$0xff] %vm4392_vm1, %v4380_v7  ;;  %v4357_v32 = vmul.f32 0.6931472, %v5898_v11  ;;  %v4339_v24 = vadd.f32 %v5892_v1, %v4275_v3 }
 0xf35   : > { %v5902_v57 = vpop.eup %5901  ;;  %v4383_v20 = vadd.f32 %v4359_v60, %v8768_v33  ;;  %v4338_v28 = vadd.f32 %v5900_v45, %v4274_v54  ;;  %v4243_v50 = vpop.permute.xlu1 %4242 }
 0xf36   : > { %v5904_v29 = vpop.eup %5903  ;;  %v4382_v14 = vadd.f32 %v4357_v32, %v9060_v10  ;;  %5921 = vlog2.f32 %v4339_v24  ;;  %v4277_v2 = vadd.f32 %v5902_v57, %v4243_v50  ;;  %v4241_v9 = vpop.permute.xlu0 %4240 }
 0xf37   : > { %v5906_v47 = vpop.eup %5905  ;;  %4400 = vst.msk [vmem:[%s8949_s24 + $0x38] sm:$0xff] %vm4392_vm1, %v4383_v20  ;;  %5923 = vlog2.f32 %v4338_v28  ;;  %v4276_v40 = vadd.f32 %v5904_v29, %v4241_v9 }
 0xf38   : > { %v5908_v49 = vpop.eup %5907  ;;  %4399 = vst.msk [vmem:[%s8949_s24 + $0x30] sm:$0xff] %vm4392_vm1, %v4382_v14  ;;  %v4341_v38 = vadd.f32 %v5906_v47, %v4277_v2 }
 0xf39   : > { %v5910_v4 = vpop.eup %5909  ;;  %v4340_v22 = vadd.f32 %v5908_v49, %v4276_v40 }
 0xf3a   : > { %v5912_v33 = vpop.eup %5911  ;;  %v4363_v23 = vmul.f32 0.6931472, %v5910_v4  ;;  %5925 = vlog2.f32 %v4341_v38 }
 0xf3b   : > { %v5914_v10 = vpop.eup %5913  ;;  %v4361_v44 = vmul.f32 0.6931472, %v5912_v33  ;;  %5927 = vlog2.f32 %v4340_v22  ;;  %v4247_v63 = vpop.permute.xlu1 %4246 }
 0xf3c   : > { %v5916_v52 = vpop.eup %5915  ;;  %v4385_v26 = vadd.f32 %v4363_v23, %v8792_v13  ;;  %v4279_v16 = vadd.f32 %v5914_v10, %v4247_v63  ;;  %v4245_v25 = vpop.permute.xlu0 %4244 }
 0xf3d   : > { %v5918_v58 = vpop.eup %5917  ;;  %v4384_v39 = vadd.f32 %v4361_v44, %v9063_v46  ;;  %v4278_v35 = vadd.f32 %v5916_v52, %v4245_v25 }
 0xf3e   : > { %v5920_v12 = vpop.eup %5919  ;;  %4402 = vst.msk [vmem:[%s8949_s24 + $0x48] sm:$0xff] %vm4392_vm1, %v4385_v26  ;;  %v4343_v34 = vadd.f32 %v5918_v58, %v4279_v16 }
 0xf3f   : > { %4401 = vst.msk [vmem:[%s8949_s24 + $0x40] sm:$0xff] %vm4392_vm1, %v4384_v39  ;;  %v4342_v55 = vadd.f32 %v5920_v12, %v4278_v35 }
 0xf40   : > { %v5922_v30 = vpop.eup %5921  ;;  %5929 = vlog2.f32 %v4343_v34 }
 0xf41   : > { %v5924_v36 = vpop.eup %5923  ;;  %v4367_v13 = vmul.f32 0.6931472, %v5922_v30  ;;  %5931 = vlog2.f32 %v4342_v55 }
 0xf42   : > { %v4365_v8 = vmul.f32 0.6931472, %v5924_v36 }
 0xf43   : > { %v4387_v46 = vadd.f32 %v4367_v13, %v8816_v6 }
 0xf44   : > { %v5926_v5 = vpop.eup %5925  ;;  %v4386_v53 = vadd.f32 %v4365_v8, %v8821_v56 }
 0xf45   : > { %v5928_v21 = vpop.eup %5927  ;;  %4404 = vst.msk [vmem:[%s8949_s24 + $0x58] sm:$0xff] %vm4392_vm1, %v4387_v46  ;;  %v4371_v0 = vmul.f32 0.6931472, %v5926_v5 }
 0xf46   : > { %4403 = vst.msk [vmem:[%s8949_s24 + $0x50] sm:$0xff] %vm4392_vm1, %v4386_v53  ;;  %v4369_v27 = vmul.f32 0.6931472, %v5928_v21 }
 0xf47   : > { %v4389_v43 = vadd.f32 %v4371_v0, %v8832_v62 }
 0xf48   : > { %v4388_v41 = vadd.f32 %v4369_v27, %v8837_v59 }
 0xf49   : > { %4406 = vst.msk [vmem:[%s8949_s24 + $0x68] sm:$0xff] %vm4392_vm1, %v4389_v43 }
 0xf4a   : > { %v5930_v37 = vpop.eup %5929  ;;  %4405 = vst.msk [vmem:[%s8949_s24 + $0x60] sm:$0xff] %vm4392_vm1, %v4388_v41 }
 0xf4b   : > { %v5932_v6 = vpop.eup %5931  ;;  %v4375_v56 = vmul.f32 0.6931472, %v5930_v37 }
 0xf4c   : > { %v4373_v1 = vmul.f32 0.6931472, %v5932_v6 }
 0xf4d   : > { %v4391_v19 = vadd.f32 %v4375_v56, %v8852_v48 }
 0xf4e   : > { %v4390_v42 = vadd.f32 %v4373_v1, %v9067_v18 }
 0xf4f   : > { %4408 = vst.msk [vmem:[%s8949_s24 + $0x78] sm:$0xff] %vm4392_vm1, %v4391_v19 }
 0xf50   : > { %4407 = vst.msk [vmem:[%s8949_s24 + $0x70] sm:$0xff] %vm4392_vm1, %v4390_v42 }
 0xf51 PF: > { %s18_s21 = sadd.s32 1, %s6007_s21  }
 0xf52   : > { %p15_p5 = scmp.ge.s32.totalorder %s18_s21, 4  }
 0xf54   :  { %17 = sbr.rel (!%p15_p5) target bundleno = 2 (0x2), region = 89 }
 0xf5b   :  { %4431 = vsyncpa [#allocation3], 1 }
 0xf5c   :  { %4433 = vsyncpa [#allocation3 + $0x1], 1 }
 0xf5d   :  { %4434 = vsyncpa [#allocation5], 1 }

</bundles_post_ra>
